<compile_context>
chip_gen: v6e
topology: v6e:2x2x1
jax: 0.10.0
libtpu: 0.0.40
codegen_flags: <defaults>
</compile_context>

<pallas_src>
import numpy as np
import jax
import jax.numpy as jnp
from jax.experimental import pallas as pl
from jax.experimental.pallas import tpu as pltpu

F_FEAT = 32   # fixed by the module (conv2 kernel width / fc1 sizing)
N_F1 = 16     # conv1 output channels
N_F2 = 4      # conv2 / conv3 output channels

# lane-layout widths (fixed by the architecture, not by bt or C)
_W1 = N_F1 * F_FEAT          # 512  : conv1 output lanes  (h*32 + w)
_Q2 = N_F2 * 4 * 9           # 144  : pooled conv2 values (oc*36 + i*9 + j)
_BLK2 = 256                  # padded block per (di,dj) pool-2 candidate
_W2 = 4 * _BLK2              # 1024 : conv2 output lanes
_W3 = 128                    # conv3 output lanes (pre-permuted for pool3)
_AFFW = _W1 + _W2 + _W3      # 1664 : packed per-lane affine width


def _elu(v):
    # same formula in kernel and reference (exp(v)-1 on the negative branch)
    return jnp.where(v > 0, v, jnp.exp(v) - 1.0)


def _eegnet_kernel(x_ref, w1_ref, w2_ref, w3_ref, aff_ref, wfcb_ref, out_ref):
    f32 = jnp.float32
    aff = aff_ref[...]                                              # (3, 1664) per-lane affines

    # ---- conv1 (1 x C kernel): one shared right-multiply (bt, C*32) @ (C*32, 512) ----
    a1 = jnp.dot(x_ref[...], w1_ref[...], preferred_element_type=f32)          # (bt, 512)
    a1 = _elu(a1 + aff[0:1, 0:512]) * aff[1:2, 0:512] + aff[2:3, 0:512]        # bias+ELU+BN1

    # ---- ZeroPad2d((16,17,0,1)) + conv2(1->4,(2,32)): only the columns MaxPool2d(2,4)
    #      reads, pre-arranged in 4 lane blocks of 256 (lanes>=144 of each block zero) ----
    z2 = jnp.dot(a1, w2_ref[...], preferred_element_type=f32)                  # (bt, 1024)
    z2 = _elu(z2 + aff[0:1, 512:1536]) * aff[1:2, 512:1536] + aff[2:3, 512:1536]

    # ---- MaxPool2d(2, stride 4): two lane fold-maxima -> (bt, 256) ----
    m = jnp.maximum(z2[:, 0:512], z2[:, 512:1024])
    pooled = jnp.maximum(m[:, 0:256], m[:, 256:512])

    # ---- ZeroPad2d((2,1,4,3)) + conv3(4->4,(8,4)): output columns pre-permuted so
    #      MaxPool2d((2,4)) + flatten become three fold-maxima ----
    y3 = jnp.dot(pooled, w3_ref[...], preferred_element_type=f32)              # (bt, 128)
    y3 = _elu(y3 + aff[0:1, 1536:1664]) * aff[1:2, 1536:1664] + aff[2:3, 1536:1664]

    m64 = jnp.maximum(y3[:, 0:64], y3[:, 64:128])
    m32 = jnp.maximum(m64[:, 0:32], m64[:, 32:64])
    m16 = jnp.maximum(m32[:, 0:16], m32[:, 16:32])                             # (bt, 16) torch .view order

    # ---- fc1 + sigmoid (lane-dense output, NCpad >= 128) ----
    logits = jnp.dot(m16, wfcb_ref[0:16, :], preferred_element_type=f32) + wfcb_ref[16:17, :]
    out_ref[...] = 1.0 / (1.0 + jnp.exp(-logits))


def _round_up(n, m):
    return ((n + m - 1) // m) * m


def eegnet_fe_forward(x, kp, bt_max=128):
    B, C, F = x.shape
    assert F == F_FEAT
    NC = kp['NC']
    NCpad = kp['WFCB'].shape[1]

    # batch tile: as large as possible (default 128 rows/step), clamped to the real batch
    bt = int(min(bt_max, max(8, _round_up(B, 8))))
    B_pad = _round_up(B, bt)
    if B_pad != B:
        x = jnp.pad(x, ((0, B_pad - B), (0, 0), (0, 0)))
    x2d = x.reshape(B_pad, C * F_FEAT)                      # lane = c*32 + f (host-side, free)

    def cspec(a):                                           # constant operand, revisited every step
        return pl.BlockSpec(a.shape, lambda i: (0, 0))

    out = pl.pallas_call(
        _eegnet_kernel,
        grid=(B_pad // bt,),
        in_specs=[
            pl.BlockSpec((bt, C * F_FEAT), lambda i: (i, 0)),   # x tile (batch on sublanes)
            cspec(kp['W1R']),     # conv1 right-matrix            (C*32, 512)
            cspec(kp['W2R']),     # pad1+conv2 right-matrix       (512, 1024)
            cspec(kp['W3R']),     # pad2+conv3 right-matrix       (256, 128)
            cspec(kp['AFF']),     # packed bias/BN-scale/BN-shift (3, 1664)
            cspec(kp['WFCB']),    # fc1 weight (rows 0..15) + bias (row 16)  (17, NCpad)
        ],
        out_specs=pl.BlockSpec((bt, NCpad), lambda i: (i, 0)),
        out_shape=jax.ShapeDtypeStruct((B_pad, NCpad), jnp.float32),
        compiler_params=pltpu.CompilerParams(dimension_semantics=("parallel",)),
    )(x2d, kp['W1R'], kp['W2R'], kp['W3R'], kp['AFF'], kp['WFCB'])
    return out[:B, :NC]


def init_params(key, num_channels, num_classes):
    C, NC = num_channels, num_classes
    ks = jax.random.split(key, 12)
    nrm = lambda k, s, sc=0.1: (sc * jax.random.normal(k, s)).astype(jnp.float32)

    w1_full = nrm(ks[0], (N_F1, 1, 1, C))
    b1 = nrm(ks[1], (N_F1,))
    w2_full = nrm(ks[2], (N_F2, 1, 2, 32))
    b2 = nrm(ks[3], (N_F2,))
    w3_full = nrm(ks[4], (N_F2, N_F2, 8, 4))
    b3 = nrm(ks[5], (N_F2,))
    wfc_t = nrm(ks[6], (NC, N_F1))            # torch fc1.weight layout (NC, 16)
    bfc = nrm(ks[7], (NC,))

    def bn_params(k, n):
        k1, k2, k3, k4 = jax.random.split(k, 4)
        mean = (0.1 * jax.random.normal(k1, (n,))).astype(jnp.float32)
        var = (1.0 + 0.1 * jnp.abs(jax.random.normal(k2, (n,)))).astype(jnp.float32)
        gamma = (1.0 + 0.1 * jax.random.normal(k3, (n,))).astype(jnp.float32)
        beta = (0.1 * jax.random.normal(k4, (n,))).astype(jnp.float32)
        return mean, var, gamma, beta

    rm1, rv1, g1, be1 = bn_params(ks[8], N_F1)
    rm2, rv2, g2, be2 = bn_params(ks[9], N_F2)
    rm3, rv3, g3, be3 = bn_params(ks[10], N_F2)

    torch_params = dict(w1_full=w1_full, b1=b1, w2_full=w2_full, b2=b2,
                        w3_full=w3_full, b3=b3, wfc=jnp.transpose(wfc_t),
                        bfc=bfc[None, :],
                        rm1=rm1, rv1=rv1, g1=g1, be1=be1,
                        rm2=rm2, rv2=rv2, g2=g2, be2=be2,
                        rm3=rm3, rv3=rv3, g3=g3, be3=be3)

    # ---------------- kernel-side derived parameters (bt-independent) ----------------
    def bn_affine(mean, var, gamma, beta):    # eval-mode BN, eps = 0 (matches BatchNorm2d(n, False))
        scale = np.asarray(gamma) / np.sqrt(np.asarray(var))
        shift = np.asarray(beta) - np.asarray(mean) * scale
        return scale.astype(np.float32), shift.astype(np.float32)

    s1, t1 = bn_affine(rm1, rv1, g1, be1)
    s2, t2 = bn_affine(rm2, rv2, g2, be2)
    s3, t3 = bn_affine(rm3, rv3, g3, be3)
    b1n, b2n, b3n = np.asarray(b1), np.asarray(b2), np.asarray(b3)

    # conv1 (1 x C) as a shared right-multiply: out lane = h*32 + w, in lane = c*32 + w
    w1 = np.asarray(w1_full).reshape(N_F1, C)
    W1R = np.zeros((C * F_FEAT, _W1), np.float32)
    for h in range(N_F1):
        for c in range(C):
            for w in range(F_FEAT):
                W1R[c * F_FEAT + w, h * F_FEAT + w] = w1[h, c]

    # packed per-lane affine vectors: [0:512] stage1, [512:1536] stage2, [1536:1664] stage3
    AFF = np.zeros((3, _AFFW), np.float32)
    for h in range(N_F1):
        AFF[0, h * 32:(h + 1) * 32] = b1n[h]
        AFF[1, h * 32:(h + 1) * 32] = s1[h]
        AFF[2, h * 32:(h + 1) * 32] = t1[h]

    # ZeroPad2d((16,17,0,1)) + conv2(1->4,(2,32)): only outputs read by MaxPool2d(2,4).
    # out lane = (di*2+dj)*256 + oc*36 + i*9 + j, with (ho, wo) = (4i+di, 4j+dj)
    w2 = np.asarray(w2_full)                                   # (4, 1, 2, 32)
    W2R = np.zeros((_W1, _W2), np.float32)
    for oc in range(N_F2):
        for i in range(4):
            for j in range(9):
                for di in range(2):
                    for dj in range(2):
                        ho, wo = 4 * i + di, 4 * j + dj
                        col = (di * 2 + dj) * _BLK2 + oc * 36 + i * 9 + j
                        for kh in range(2):
                            h = ho + kh
                            if h >= N_F1:          # bottom zero-pad row (never hit for kept ho)
                                continue
                            for kw in range(32):
                                w = wo + kw - 16   # left pad 16 folded
                                if 0 <= w < F_FEAT:
                                    W2R[h * F_FEAT + w, col] += w2[oc, 0, kh, kw]
    for blk in range(4):
        for oc in range(N_F2):
            base = _W1 + blk * _BLK2 + oc * 36
            AFF[0, base:base + 36] = b2n[oc]
            AFF[1, base:base + 36] = s2[oc]
            AFF[2, base:base + 36] = t2[oc]        # dummy lanes (q>=144) stay 0/0/0

    # ZeroPad2d((2,1,4,3)) + conv3(4->4,(8,4)) from pooled lanes (ic*36 + h_in*9 + w_in).
    # Output lane = (dh*4+dw)*16 + oc*4 + po*2 + qo with (ho, wo) = (2po+dh, 4qo+dw);
    # wo = 8 is dropped (never read by MaxPool2d((2,4))).
    w3 = np.asarray(w3_full)                                   # (4, 4, 8, 4)
    W3R = np.zeros((_BLK2, _W3), np.float32)
    for oc in range(N_F2):
        for po in range(2):
            for qo in range(2):
                for dh in range(2):
                    for dw in range(4):
                        ho, wo = 2 * po + dh, 4 * qo + dw
                        col = (dh * 4 + dw) * 16 + oc * 4 + po * 2 + qo
                        for ic in range(N_F2):
                            for h_in in range(4):
                                kh = h_in - ho + 4
                                if not (0 <= kh < 8):
                                    continue
                                for w_in in range(9):
                                    kw = w_in - wo + 2
                                    if 0 <= kw < 4:
                                        W3R[ic * 36 + h_in * 9 + w_in, col] += w3[oc, ic, kh, kw]
    for lane in range(_W3):
        oc = (lane % 16) // 4
        AFF[0, _W1 + _W2 + lane] = b3n[oc]
        AFF[1, _W1 + _W2 + lane] = s3[oc]
        AFF[2, _W1 + _W2 + lane] = t3[oc]

    # fc1 weight (transposed) + bias, lane-padded to a multiple of 128 for dense stores
    NCpad = max(128, _round_up(NC, 128))
    WFCB = np.zeros((N_F1 + 1, NCpad), np.float32)
    WFCB[0:N_F1, 0:NC] = np.asarray(wfc_t).T
    WFCB[N_F1, 0:NC] = np.asarray(bfc)

    kernel_params = dict(
        NC=NC,
        W1R=jnp.asarray(W1R), W2R=jnp.asarray(W2R), W3R=jnp.asarray(W3R),
        AFF=jnp.asarray(AFF), WFCB=jnp.asarray(WFCB))
    return torch_params, kernel_params


def reference_forward(x, P):
    """Pure-JAX re-implementation of the torch forward (eval semantics)."""
    elu = lambda v: jnp.where(v > 0, v, jnp.exp(v) - 1.0)

    def bn(v, mean, var, gamma, beta):    # eps = 0
        sh = (1, -1, 1, 1)
        return ((v - mean.reshape(sh)) / jnp.sqrt(var.reshape(sh))
                * gamma.reshape(sh) + beta.reshape(sh))

    dn = ('NCHW', 'OIHW', 'NCHW')
    y = jnp.transpose(x[:, None, :, :], (0, 1, 3, 2))                  # (B,1,F,C)
    y = jax.lax.conv_general_dilated(y, P['w1_full'], (1, 1), 'VALID', dimension_numbers=dn)
    y = elu(y + P['b1'][None, :, None, None])
    y = bn(y, P['rm1'], P['rv1'], P['g1'], P['be1'])
    y = jnp.transpose(y, (0, 3, 1, 2))                                 # (B,1,16,32)
    y = jnp.pad(y, ((0, 0), (0, 0), (0, 1), (16, 17)))                 # ZeroPad2d((16,17,0,1))
    y = jax.lax.conv_general_dilated(y, P['w2_full'], (1, 1), 'VALID', dimension_numbers=dn)
    y = elu(y + P['b2'][None, :, None, None])
    y = bn(y, P['rm2'], P['rv2'], P['g2'], P['be2'])
    y = jax.lax.reduce_window(y, -jnp.inf, jax.lax.max, (1, 1, 2, 2), (1, 1, 4, 4), 'VALID')
    y = jnp.pad(y, ((0, 0), (0, 0), (4, 3), (2, 1)))                   # ZeroPad2d((2,1,4,3))
    y = jax.lax.conv_general_dilated(y, P['w3_full'], (1, 1), 'VALID', dimension_numbers=dn)
    y = elu(y + P['b3'][None, :, None, None])
    y = bn(y, P['rm3'], P['rv3'], P['g3'], P['be3'])
    y = jax.lax.reduce_window(y, -jnp.inf, jax.lax.max, (1, 1, 2, 4), (1, 1, 2, 4), 'VALID')
    y = y.reshape(y.shape[0], -1)                                      # (B, 16)
    return jax.nn.sigmoid(y @ P['wfc'] + P['bfc'])


if __name__ == "__main__":
    C, NC = 16, 4                 # small num_channels / num_classes; F must be 32
    key = jax.random.PRNGKey(0)
    kx, kprm = jax.random.split(key)
    torch_params, kernel_params = init_params(kprm, num_channels=C, num_classes=NC)

    # B=12: tiny single-step case; B=200: exercises bt=128, a 2-step grid and batch padding.
    for B in (12, 200):
        x = jax.random.normal(jax.random.fold_in(kx, B), (B, C, F_FEAT), jnp.float32)
        out = jax.block_until_ready(eegnet_fe_forward(x, kernel_params, bt_max=128))
        ref = jax.block_until_ready(reference_forward(x, torch_params))
        assert out.shape == (B, NC)
        np.testing.assert_allclose(np.asarray(out), np.asarray(ref), atol=2e-2, rtol=2e-2)

    print("KERNEL_OK")
</pallas_src>

<mosaic_0001>
module attributes {stable_mosaic.version = 11 : i64} {
  func.func @_eegnet_kernel(%arg0: i32, %arg1: memref<16x512xf32, #tpu.memory_space<vmem>>, %arg2: memref<512x512xf32, #tpu.memory_space<vmem>>, %arg3: memref<512x1024xf32, #tpu.memory_space<vmem>>, %arg4: memref<256x128xf32, #tpu.memory_space<vmem>>, %arg5: memref<3x1664xf32, #tpu.memory_space<vmem>>, %arg6: memref<17x128xf32, #tpu.memory_space<vmem>>, %arg7: memref<16x128xf32, #tpu.memory_space<vmem>>) attributes {dimension_semantics = [#tpu.dimension_semantics<parallel>], iteration_bounds = array<i64: 1>, scalar_prefetch = 0 : i64, scratch_operands = 0 : i64, tpu.core_type = #tpu.core_type<tc>, window_params = [{transform_indices = @transform_0, window_bounds = array<i64: 16, 512>}, {pipeline_mode = #tpu.pipeline_mode<synchronous>, transform_indices = @transform_1, window_bounds = array<i64: 512, 512>}, {pipeline_mode = #tpu.pipeline_mode<synchronous>, transform_indices = @transform_2, window_bounds = array<i64: 512, 1024>}, {pipeline_mode = #tpu.pipeline_mode<synchronous>, transform_indices = @transform_3, window_bounds = array<i64: 256, 128>}, {pipeline_mode = #tpu.pipeline_mode<synchronous>, transform_indices = @transform_4, window_bounds = array<i64: 3, 1664>}, {pipeline_mode = #tpu.pipeline_mode<synchronous>, transform_indices = @transform_5, window_bounds = array<i64: 17, 128>}, {transform_indices = @transform_6, window_bounds = array<i64: 16, 128>}]} {
    %c0 = arith.constant 0 : index
    %c0_0 = arith.constant 0 : index
    %0 = vector.load %arg5[%c0, %c0_0] : memref<3x1664xf32, #tpu.memory_space<vmem>>, vector<3x1664xf32>
    %c0_1 = arith.constant 0 : index
    %c0_2 = arith.constant 0 : index
    %1 = vector.load %arg1[%c0_1, %c0_2] : memref<16x512xf32, #tpu.memory_space<vmem>>, vector<16x512xf32>
    %c0_3 = arith.constant 0 : index
    %c0_4 = arith.constant 0 : index
    %2 = vector.load %arg2[%c0_3, %c0_4] : memref<512x512xf32, #tpu.memory_space<vmem>>, vector<512x512xf32>
    %cst = arith.constant dense<0.000000e+00> : vector<16x512xf32>
    %3 = tpu.matmul %1, %2, %cst {dimension_numbers = #tpu.dot_dimension_numbers<[1], [0], [0], [1], [0, 0, 1, 1], [], []>} : vector<16x512xf32>, vector<512x512xf32>, vector<16x512xf32> -> vector<16x512xf32>
    %4 = vector.extract_strided_slice %0 {offsets = [0, 0], sizes = [1, 512], strides = [1, 1]} : vector<3x1664xf32> to vector<1x512xf32>
    %5 = vector.broadcast %4 : vector<1x512xf32> to vector<16x512xf32>
    %6 = arith.addf %3, %5 : vector<16x512xf32>
    %cst_5 = arith.constant 0.000000e+00 : f32
    %7 = vector.broadcast %cst_5 : f32 to vector<16x512xf32>
    %8 = arith.cmpf ogt, %6, %7 : vector<16x512xf32>
    %9 = math.exp %6 : vector<16x512xf32>
    %cst_6 = arith.constant 1.000000e+00 : f32
    %10 = vector.broadcast %cst_6 : f32 to vector<16x512xf32>
    %11 = arith.subf %9, %10 : vector<16x512xf32>
    %12 = arith.select %8, %6, %11 : vector<16x512xi1>, vector<16x512xf32>
    %13 = vector.extract_strided_slice %0 {offsets = [1, 0], sizes = [1, 512], strides = [1, 1]} : vector<3x1664xf32> to vector<1x512xf32>
    %14 = vector.broadcast %13 : vector<1x512xf32> to vector<16x512xf32>
    %15 = arith.mulf %12, %14 : vector<16x512xf32>
    %16 = vector.extract_strided_slice %0 {offsets = [2, 0], sizes = [1, 512], strides = [1, 1]} : vector<3x1664xf32> to vector<1x512xf32>
    %17 = vector.broadcast %16 : vector<1x512xf32> to vector<16x512xf32>
    %18 = arith.addf %15, %17 : vector<16x512xf32>
    %c0_7 = arith.constant 0 : index
    %c0_8 = arith.constant 0 : index
    %19 = vector.load %arg3[%c0_7, %c0_8] : memref<512x1024xf32, #tpu.memory_space<vmem>>, vector<512x1024xf32>
    %cst_9 = arith.constant dense<0.000000e+00> : vector<16x1024xf32>
    %20 = tpu.matmul %18, %19, %cst_9 {dimension_numbers = #tpu.dot_dimension_numbers<[1], [0], [0], [1], [0, 0, 1, 1], [], []>} : vector<16x512xf32>, vector<512x1024xf32>, vector<16x1024xf32> -> vector<16x1024xf32>
    %21 = vector.extract_strided_slice %0 {offsets = [0, 512], sizes = [1, 1024], strides = [1, 1]} : vector<3x1664xf32> to vector<1x1024xf32>
    %22 = vector.broadcast %21 : vector<1x1024xf32> to vector<16x1024xf32>
    %23 = arith.addf %20, %22 : vector<16x1024xf32>
    %cst_10 = arith.constant 0.000000e+00 : f32
    %24 = vector.broadcast %cst_10 : f32 to vector<16x1024xf32>
    %25 = arith.cmpf ogt, %23, %24 : vector<16x1024xf32>
    %26 = math.exp %23 : vector<16x1024xf32>
    %cst_11 = arith.constant 1.000000e+00 : f32
    %27 = vector.broadcast %cst_11 : f32 to vector<16x1024xf32>
    %28 = arith.subf %26, %27 : vector<16x1024xf32>
    %29 = arith.select %25, %23, %28 : vector<16x1024xi1>, vector<16x1024xf32>
    %30 = vector.extract_strided_slice %0 {offsets = [1, 512], sizes = [1, 1024], strides = [1, 1]} : vector<3x1664xf32> to vector<1x1024xf32>
    %31 = vector.broadcast %30 : vector<1x1024xf32> to vector<16x1024xf32>
    %32 = arith.mulf %29, %31 : vector<16x1024xf32>
    %33 = vector.extract_strided_slice %0 {offsets = [2, 512], sizes = [1, 1024], strides = [1, 1]} : vector<3x1664xf32> to vector<1x1024xf32>
    %34 = vector.broadcast %33 : vector<1x1024xf32> to vector<16x1024xf32>
    %35 = arith.addf %32, %34 : vector<16x1024xf32>
    %36 = vector.extract_strided_slice %35 {offsets = [0, 0], sizes = [16, 512], strides = [1, 1]} : vector<16x1024xf32> to vector<16x512xf32>
    %37 = vector.extract_strided_slice %35 {offsets = [0, 512], sizes = [16, 512], strides = [1, 1]} : vector<16x1024xf32> to vector<16x512xf32>
    %38 = arith.maximumf %36, %37 : vector<16x512xf32>
    %39 = vector.extract_strided_slice %38 {offsets = [0, 0], sizes = [16, 256], strides = [1, 1]} : vector<16x512xf32> to vector<16x256xf32>
    %40 = vector.extract_strided_slice %38 {offsets = [0, 256], sizes = [16, 256], strides = [1, 1]} : vector<16x512xf32> to vector<16x256xf32>
    %41 = arith.maximumf %39, %40 : vector<16x256xf32>
    %c0_12 = arith.constant 0 : index
    %c0_13 = arith.constant 0 : index
    %42 = vector.load %arg4[%c0_12, %c0_13] : memref<256x128xf32, #tpu.memory_space<vmem>>, vector<256x128xf32>
    %cst_14 = arith.constant dense<0.000000e+00> : vector<16x128xf32>
    %43 = tpu.matmul %41, %42, %cst_14 {dimension_numbers = #tpu.dot_dimension_numbers<[1], [0], [0], [1], [0, 0, 1, 1], [], []>} : vector<16x256xf32>, vector<256x128xf32>, vector<16x128xf32> -> vector<16x128xf32>
    %44 = vector.extract_strided_slice %0 {offsets = [0, 1536], sizes = [1, 128], strides = [1, 1]} : vector<3x1664xf32> to vector<1x128xf32>
    %45 = vector.broadcast %44 : vector<1x128xf32> to vector<16x128xf32>
    %46 = arith.addf %43, %45 : vector<16x128xf32>
    %cst_15 = arith.constant 0.000000e+00 : f32
    %47 = vector.broadcast %cst_15 : f32 to vector<16x128xf32>
    %48 = arith.cmpf ogt, %46, %47 : vector<16x128xf32>
    %49 = math.exp %46 : vector<16x128xf32>
    %cst_16 = arith.constant 1.000000e+00 : f32
    %50 = vector.broadcast %cst_16 : f32 to vector<16x128xf32>
    %51 = arith.subf %49, %50 : vector<16x128xf32>
    %52 = arith.select %48, %46, %51 : vector<16x128xi1>, vector<16x128xf32>
    %53 = vector.extract_strided_slice %0 {offsets = [1, 1536], sizes = [1, 128], strides = [1, 1]} : vector<3x1664xf32> to vector<1x128xf32>
    %54 = vector.broadcast %53 : vector<1x128xf32> to vector<16x128xf32>
    %55 = arith.mulf %52, %54 : vector<16x128xf32>
    %56 = vector.extract_strided_slice %0 {offsets = [2, 1536], sizes = [1, 128], strides = [1, 1]} : vector<3x1664xf32> to vector<1x128xf32>
    %57 = vector.broadcast %56 : vector<1x128xf32> to vector<16x128xf32>
    %58 = arith.addf %55, %57 : vector<16x128xf32>
    %59 = vector.extract_strided_slice %58 {offsets = [0, 0], sizes = [16, 64], strides = [1, 1]} : vector<16x128xf32> to vector<16x64xf32>
    %60 = vector.extract_strided_slice %58 {offsets = [0, 64], sizes = [16, 64], strides = [1, 1]} : vector<16x128xf32> to vector<16x64xf32>
    %61 = arith.maximumf %59, %60 : vector<16x64xf32>
    %62 = vector.extract_strided_slice %61 {offsets = [0, 0], sizes = [16, 32], strides = [1, 1]} : vector<16x64xf32> to vector<16x32xf32>
    %63 = vector.extract_strided_slice %61 {offsets = [0, 32], sizes = [16, 32], strides = [1, 1]} : vector<16x64xf32> to vector<16x32xf32>
    %64 = arith.maximumf %62, %63 : vector<16x32xf32>
    %65 = vector.extract_strided_slice %64 {offsets = [0, 0], sizes = [16, 16], strides = [1, 1]} : vector<16x32xf32> to vector<16x16xf32>
    %66 = vector.extract_strided_slice %64 {offsets = [0, 16], sizes = [16, 16], strides = [1, 1]} : vector<16x32xf32> to vector<16x16xf32>
    %67 = arith.maximumf %65, %66 : vector<16x16xf32>
    %c0_17 = arith.constant 0 : index
    %c0_18 = arith.constant 0 : index
    %68 = vector.load %arg6[%c0_17, %c0_18] : memref<17x128xf32, #tpu.memory_space<vmem>>, vector<16x128xf32>
    %cst_19 = arith.constant dense<0.000000e+00> : vector<16x128xf32>
    %69 = tpu.matmul %67, %68, %cst_19 {dimension_numbers = #tpu.dot_dimension_numbers<[1], [0], [0], [1], [0, 0, 1, 1], [], []>} : vector<16x16xf32>, vector<16x128xf32>, vector<16x128xf32> -> vector<16x128xf32>
    %c16 = arith.constant 16 : index
    %c0_20 = arith.constant 0 : index
    %70 = vector.load %arg6[%c16, %c0_20] : memref<17x128xf32, #tpu.memory_space<vmem>>, vector<1x128xf32>
    %71 = vector.broadcast %70 : vector<1x128xf32> to vector<16x128xf32>
    %72 = arith.addf %69, %71 : vector<16x128xf32>
    %cst_21 = arith.constant 0.000000e+00 : f32
    %73 = vector.broadcast %cst_21 : f32 to vector<16x128xf32>
    %74 = arith.subf %73, %72 : vector<16x128xf32>
    %75 = math.exp %74 : vector<16x128xf32>
    %cst_22 = arith.constant 1.000000e+00 : f32
    %76 = vector.broadcast %cst_22 : f32 to vector<16x128xf32>
    %77 = arith.addf %76, %75 : vector<16x128xf32>
    %cst_23 = arith.constant 1.000000e+00 : f32
    %78 = vector.broadcast %cst_23 : f32 to vector<16x128xf32>
    %79 = arith.divf %78, %77 : vector<16x128xf32>
    %c0_24 = arith.constant 0 : index
    %c0_25 = arith.constant 0 : index
    %80 = vector.load %arg7[%c0_24, %c0_25] : memref<16x128xf32, #tpu.memory_space<vmem>>, vector<16x128xf32>
    tpu.vector_store %arg7[%c0_24, %c0_25], %79 {strides = array<i32>} : memref<16x128xf32, #tpu.memory_space<vmem>>, vector<16x128xf32>,
    return
  }
  func.func @transform_0(%arg0: i32) -> (i32, i32) {
    %c0_i32 = arith.constant 0 : i32
    %c0_i32_0 = arith.constant 0 : i32
    return %arg0, %c0_i32 : i32, i32
  }
  func.func @transform_1(%arg0: i32) -> (i32, i32) {
    %c0_i32 = arith.constant 0 : i32
    %c0_i32_0 = arith.constant 0 : i32
    %c0_i32_1 = arith.constant 0 : i32
    return %c0_i32, %c0_i32_0 : i32, i32
  }
  func.func @transform_2(%arg0: i32) -> (i32, i32) {
    %c0_i32 = arith.constant 0 : i32
    %c0_i32_0 = arith.constant 0 : i32
    %c0_i32_1 = arith.constant 0 : i32
    return %c0_i32, %c0_i32_0 : i32, i32
  }
  func.func @transform_3(%arg0: i32) -> (i32, i32) {
    %c0_i32 = arith.constant 0 : i32
    %c0_i32_0 = arith.constant 0 : i32
    %c0_i32_1 = arith.constant 0 : i32
    return %c0_i32, %c0_i32_0 : i32, i32
  }
  func.func @transform_4(%arg0: i32) -> (i32, i32) {
    %c0_i32 = arith.constant 0 : i32
    %c0_i32_0 = arith.constant 0 : i32
    %c0_i32_1 = arith.constant 0 : i32
    return %c0_i32, %c0_i32_0 : i32, i32
  }
  func.func @transform_5(%arg0: i32) -> (i32, i32) {
    %c0_i32 = arith.constant 0 : i32
    %c0_i32_0 = arith.constant 0 : i32
    %c0_i32_1 = arith.constant 0 : i32
    return %c0_i32, %c0_i32_0 : i32, i32
  }
  func.func @transform_6(%arg0: i32) -> (i32, i32) {
    %c0_i32 = arith.constant 0 : i32
    %c0_i32_0 = arith.constant 0 : i32
    return %arg0, %c0_i32 : i32, i32
  }
}

</mosaic_0001>

<bundles_post_ra>
// kernel: tpu_custom_call.1
= control target key start
LH: loop header
LB: loop body
LE: loop exit
PB: predicated region body
PF: predicated region fallthrough
CT: control target
= control target key end

     0   :  { %11 = vsyncpa [#allocation3], 0  ;;  %s3355_s0 = inlined_call_operand.hbm [shape: f32[16,512], index: 0, kind: input, shape index: {}]   ;;  %s3356_s1 = inlined_call_operand.hbm [shape: f32[512,512], index: 1, kind: input, shape index: {}]   ;;  %s3357_s2 = inlined_call_operand.hbm [shape: f32[512,1024], index: 2, kind: input, shape index: {}]   ;;  %s3358_s3 = inlined_call_operand.hbm [shape: f32[256,128], index: 3, kind: input, shape index: {}]   ;;  %s3359_s4 = inlined_call_operand.hbm [shape: f32[3,1664], index: 4, kind: input, shape index: {}]   ;;  %s3360_s5 = inlined_call_operand.hbm [shape: f32[17,128], index: 5, kind: input, shape index: {}]   ;;  %s3361_s6 = inlined_call_operand.hbm [shape: f32[16,128], index: 6, kind: output, shape index: {}]  }
   0x1   :  { %12 = vsyncpa [#allocation6], 0 }
   0x2   :  { %13 = vsyncpa [#allocation9], 0 }
   0x3   :  { %14 = vsyncpa [#allocation12], 0 }
   0x4   :  { %15 = vsyncpa [#allocation4], 0  ;;  %s2910_s21 = smov [#allocation5]   ;;  %s2911_s23 = smov [#allocation8]  }
   0x5   :  { %s33_s22 = sshll.u32 %s2910_s21, 4  ;;  %s57_s24 = sshll.u32 %s2911_s23, 4  ;;  %s34_s22 = int_to_ptr.vmem [resolvable:$true] %s33_s22  ;;  %s58_s24 = int_to_ptr.vmem [resolvable:$true] %s57_s24 }
   0x6   :  { %s2768_s25 = scalar_lea.vmem %s34_s22, 32768  ;;  %p2773_p1 = scmp.lt.s32.totalorder %s34_s22, %s34_s22 }
   0x7   :  { %p2769_p0 = scmp.ne.s32.totalorder %s34_s22, %s2768_s25  ;;  %p2774_p2 = scmp.lt.s32.totalorder %s2768_s25, %s2768_s25 }
   0x9   :  { %p2775_p3 = por %p2774_p2, %p2773_p1 }
   0xb   :  { %p2776_p4 = pnand %p2775_p3, %p2769_p0 }
   0xd   :  { %2779 = shalt.err (!%p2776_p4)
}
   0xe   :  { %s2912_s26 = smov 512   ;;  %s2913_s27 = smov 32  }
   0xf   :  { %39 = dma.hbm_to_vmem [thread:$0]  %s3356_s1, 32768, %s34_s22, [#allocation6], %s2912_s26, %s2912_s26, %s2913_s27  }
  0x10   :  { %s2788_s30 = scalar_lea.vmem %s58_s24, 4096  ;;  %p2793_p6 = scmp.lt.s32.totalorder %s58_s24, %s58_s24 }
  0x11   :  { %p2789_p5 = scmp.ne.s32.totalorder %s58_s24, %s2788_s30  ;;  %p2794_p7 = scmp.lt.s32.totalorder %s2788_s30, %s2788_s30 }
  0x13   :  { %p2795_p8 = por %p2794_p7, %p2793_p6 }
  0x15   :  { %p2796_p9 = pnand %p2795_p8, %p2789_p5 }
  0x17   :  { %2799 = shalt.err (!%p2796_p9)
}
  0x18   :  { %s2914_s7 = smov 128   ;;  %s2915_s8 = smov 8  }
  0x19   :  { %63 = dma.hbm_to_vmem [thread:$0]  %s3358_s3, 4096, %s58_s24, [#allocation9], %s2914_s7, %s2914_s7, %s2915_s8  }
  0x1a   :  { %s2916_s11 = smov [#allocation2]   ;;  %s2917_s13 = smov [#allocation7]  }
  0x1b   :  { %s21_s12 = sshll.u32 %s2916_s11, 4  ;;  %s45_s1 = sshll.u32 %s2917_s13, 4  ;;  %s22_s12 = int_to_ptr.vmem [resolvable:$true] %s21_s12  ;;  %s46_s1 = int_to_ptr.vmem [resolvable:$true] %s45_s1 }
  0x1c   :  { %s2808_s14 = scalar_lea.vmem %s22_s12, 1024  ;;  %p2813_p11 = scmp.lt.s32.totalorder %s22_s12, %s22_s12 }
  0x1d   :  { %p2809_p10 = scmp.ne.s32.totalorder %s22_s12, %s2808_s14  ;;  %p2814_p12 = scmp.lt.s32.totalorder %s2808_s14, %s2808_s14 }
  0x1f   :  { %p2815_p13 = por %p2814_p12, %p2813_p11 }
  0x21   :  { %p2816_p0 = pnand %p2815_p13, %p2809_p10 }
  0x23   :  { %2819 = shalt.err (!%p2816_p0)
}
  0x24   :  { %27 = dma.hbm_to_vmem [thread:$0]  %s3355_s0, 1024, %s22_s12, [#allocation3], %s2912_s26, %s2912_s26, %s2913_s27  }
  0x25   :  { %s2828_s17 = scalar_lea.vmem %s46_s1, 65536  ;;  %p2833_p2 = scmp.lt.s32.totalorder %s46_s1, %s46_s1 }
  0x26   :  { %p2829_p1 = scmp.ne.s32.totalorder %s46_s1, %s2828_s17  ;;  %p2834_p3 = scmp.lt.s32.totalorder %s2828_s17, %s2828_s17 }
  0x28   :  { %p2835_p4 = por %p2834_p3, %p2833_p2 }
  0x2a   :  { %p2836_p5 = pnand %p2835_p4, %p2829_p1 }
  0x2c   :  { %2839 = shalt.err (!%p2836_p5)
}
  0x2d   :  { %s2918_s3 = smov 1024   ;;  %s2919_s18 = smov 64  }
  0x2e   :  { %51 = dma.hbm_to_vmem [thread:$0]  %s3357_s2, 65536, %s46_s1, [#allocation6], %s2918_s3, %s2918_s3, %s2919_s18  }
  0x2f   :  { %s2920_s21 = smov [#allocation10]   ;;  %s2921_s23 = smov [#allocation11]  }
  0x30   :  { %s70_s22 = sshll.u32 %s2920_s21, 4  ;;  %s79_s24 = sshll.u32 %s2921_s23, 4  ;;  %s71_s22 = int_to_ptr.vmem [resolvable:$true] %s70_s22  ;;  %s80_s24 = int_to_ptr.vmem [resolvable:$true] %s79_s24 }
  0x31   :  { %s2848_s0 = scalar_lea.vmem %s71_s22, 832  ;;  %p2853_p7 = scmp.lt.s32.totalorder %s71_s22, %s71_s22 }
  0x32   :  { %p2849_p6 = scmp.ne.s32.totalorder %s71_s22, %s2848_s0  ;;  %p2854_p8 = scmp.lt.s32.totalorder %s2848_s0, %s2848_s0 }
  0x34   :  { %p2855_p9 = por %p2854_p8, %p2853_p7 }
  0x36   :  { %p2856_p10 = pnand %p2855_p9, %p2849_p6 }
  0x38   :  { %2859 = shalt.err (!%p2856_p10)
}
  0x39   :  { %73 = dma.hbm_to_vmem [thread:$0]  %s3359_s4, 832, %s71_s22, [#allocation9]  }
  0x3a   :  { %s2868_s27 = scalar_lea.vmem %s80_s24, 384  ;;  %p2873_p12 = scmp.lt.s32.totalorder %s80_s24, %s80_s24 }
  0x3b   :  { %p2869_p11 = scmp.ne.s32.totalorder %s80_s24, %s2868_s27  ;;  %p2874_p13 = scmp.lt.s32.totalorder %s2868_s27, %s2868_s27 }
  0x3d   :  { %p2875_p0 = por %p2874_p13, %p2873_p12 }
  0x3f   :  { %p2876_p1 = pnand %p2875_p0, %p2869_p11 }
  0x41   :  { %2879 = shalt.err (!%p2876_p1)
}
  0x42   :  { %85 = dma.hbm_to_vmem [thread:$0]  %s3360_s5, 384, %s80_s24, [#allocation12], %s2914_s7, %s2914_s7, %s2915_s8  }
  0x43   :  { %2900 = dma.done.wait [#allocation3], 1024  }
  0x44   :  { %2901 = vsyncadd [#allocation3], 4294966272 }
  0x45   :  { %2902 = dma.done.wait [#allocation6], 98304  }
  0x46   :  { %2903 = vsyncadd [#allocation6], 4294868992 }
  0x47   :  { %2904 = dma.done.wait [#allocation9], 4928  }
  0x48   :  { %2905 = vsyncadd [#allocation9], 4294962368 }
  0x49   :  { %2906 = dma.done.wait [#allocation12], 384  }
  0x4a   :  { %2907 = vsyncadd [#allocation12], 4294966912  ;;  %v180_v0 = vld [vmem:[#allocation5 + $0x1e8] sm:$0xff]  ;;  %v179_v2 = vld [vmem:[#allocation5 + $0x1e0] sm:$0xff]  ;;  %s2922_s4 = smov 96   ;;  %s2923_s5 = smov 112  }
  0x4b   :  { %v308_v1 = vld [vmem:[#allocation5 + $0x5e8] sm:$0xff]  ;;  %413 = vmatprep.subr.mxu0 %v180_v0  ;;  %v307_v3 = vld [vmem:[#allocation5 + $0x5e0] sm:$0xff]  ;;  %s2924_s29 = smov [#allocation13]  }
  0x4c   :  { %490 = vmatprep.subr.mxu1 %v308_v1  ;;  %v176_v4 = vld [vmem:[#allocation5 + $0x1c8] sm:$0xff]  ;;  %414 = vmatpush1.msra.mxu0 %v179_v2  ;;  %v175_v6 = vld [vmem:[#allocation5 + $0x1c0] sm:$0xff]  ;;  %s2592_s30 = sshll.u32 %s2924_s29, 4  ;;  %s2593_s30 = int_to_ptr.vmem [resolvable:$true] %s2592_s30 }
  0x4d   :  { %v304_v5 = vld [vmem:[#allocation5 + $0x5c8] sm:$0xff]  ;;  %491 = vmatpush1.msra.mxu1 %v307_v3  ;;  %v303_v7 = vld [vmem:[#allocation5 + $0x5c0] sm:$0xff]  ;;  %415 = vmatprep.subr.mxu0 %v176_v4  ;;  %s2880_s9 = scalar_lea.vmem %s2593_s30, 256  ;;  %p2885_p3 = scmp.lt.s32.totalorder %s2593_s30, %s2593_s30 }
  0x4e   :  { %v172_v8 = vld [vmem:[#allocation5 + $0x1a8] sm:$0xff]  ;;  %492 = vmatprep.subr.mxu1 %v304_v5  ;;  %v171_v10 = vld [vmem:[#allocation5 + $0x1a0] sm:$0xff]  ;;  %416 = vmatpush1.msra.mxu0 %v175_v6  ;;  %p2881_p2 = scmp.ne.s32.totalorder %s2593_s30, %s2880_s9  ;;  %p2886_p4 = scmp.lt.s32.totalorder %s2880_s9, %s2880_s9 }
  0x4f   :  { %v300_v9 = vld [vmem:[#allocation5 + $0x5a8] sm:$0xff]  ;;  %v299_v11 = vld [vmem:[#allocation5 + $0x5a0] sm:$0xff]  ;;  %493 = vmatpush1.msra.mxu1 %v303_v7  ;;  %417 = vmatprep.subr.mxu0 %v172_v8 }
  0x50   :  { %v168_v12 = vld [vmem:[#allocation5 + $0x188] sm:$0xff]  ;;  %494 = vmatprep.subr.mxu1 %v300_v9  ;;  %v167_v14 = vld [vmem:[#allocation5 + $0x180] sm:$0xff]  ;;  %418 = vmatpush1.msra.mxu0 %v171_v10  ;;  %p2887_p5 = por %p2886_p4, %p2885_p3 }
  0x51   :  { %v296_v13 = vld [vmem:[#allocation5 + $0x588] sm:$0xff]  ;;  %v295_v15 = vld [vmem:[#allocation5 + $0x580] sm:$0xff]  ;;  %495 = vmatpush1.msra.mxu1 %v299_v11  ;;  %419 = vmatprep.subr.mxu0 %v168_v12 }
  0x52   :  { %v164_v16 = vld [vmem:[#allocation5 + $0x168] sm:$0xff]  ;;  %496 = vmatprep.subr.mxu1 %v296_v13  ;;  %v163_v18 = vld [vmem:[#allocation5 + $0x160] sm:$0xff]  ;;  %420 = vmatpush1.msra.mxu0 %v167_v14  ;;  %p2888_p6 = pnand %p2887_p5, %p2881_p2 }
  0x53   :  { %v292_v17 = vld [vmem:[#allocation5 + $0x568] sm:$0xff]  ;;  %v291_v19 = vld [vmem:[#allocation5 + $0x560] sm:$0xff]  ;;  %497 = vmatpush1.msra.mxu1 %v295_v15  ;;  %421 = vmatprep.subr.mxu0 %v164_v16 }
  0x54   :  { %v160_v20 = vld [vmem:[#allocation5 + $0x148] sm:$0xff]  ;;  %498 = vmatprep.subr.mxu1 %v292_v17  ;;  %v159_v22 = vld [vmem:[#allocation5 + $0x140] sm:$0xff]  ;;  %422 = vmatpush1.msra.mxu0 %v163_v18 }
  0x55   :  { %v288_v21 = vld [vmem:[#allocation5 + $0x548] sm:$0xff]  ;;  %v287_v23 = vld [vmem:[#allocation5 + $0x540] sm:$0xff]  ;;  %499 = vmatpush1.msra.mxu1 %v291_v19  ;;  %423 = vmatprep.subr.mxu0 %v160_v20 }
  0x56   :  { %v156_v24 = vld [vmem:[#allocation5 + $0x128] sm:$0xff]  ;;  %500 = vmatprep.subr.mxu1 %v288_v21  ;;  %v155_v26 = vld [vmem:[#allocation5 + $0x120] sm:$0xff]  ;;  %424 = vmatpush1.msra.mxu0 %v159_v22 }
  0x57   :  { %v284_v25 = vld [vmem:[#allocation5 + $0x528] sm:$0xff]  ;;  %v283_v27 = vld [vmem:[#allocation5 + $0x520] sm:$0xff]  ;;  %501 = vmatpush1.msra.mxu1 %v287_v23  ;;  %425 = vmatprep.subr.mxu0 %v156_v24 }
  0x58   :  { %v152_v28 = vld [vmem:[#allocation5 + $0x108] sm:$0xff]  ;;  %502 = vmatprep.subr.mxu1 %v284_v25  ;;  %v151_v30 = vld [vmem:[#allocation5 + $0x100] sm:$0xff]  ;;  %426 = vmatpush1.msra.mxu0 %v155_v26 }
  0x59   :  { %v280_v29 = vld [vmem:[#allocation5 + $0x508] sm:$0xff]  ;;  %v279_v31 = vld [vmem:[#allocation5 + $0x500] sm:$0xff]  ;;  %503 = vmatpush1.msra.mxu1 %v283_v27  ;;  %427 = vmatprep.subr.mxu0 %v152_v28 }
  0x5a   :  { %v148_v32 = vld [vmem:[#allocation5 + $0xe8] sm:$0xff]  ;;  %504 = vmatprep.subr.mxu1 %v280_v29  ;;  %v147_v34 = vld [vmem:[#allocation5 + $0xe0] sm:$0xff]  ;;  %428 = vmatpush1.msra.mxu0 %v151_v30 }
  0x5b   :  { %v276_v33 = vld [vmem:[#allocation5 + $0x4e8] sm:$0xff]  ;;  %v275_v35 = vld [vmem:[#allocation5 + $0x4e0] sm:$0xff]  ;;  %505 = vmatpush1.msra.mxu1 %v279_v31  ;;  %429 = vmatprep.subr.mxu0 %v148_v32 }
  0x5c   :  { %v144_v36 = vld [vmem:[#allocation5 + $0xc8] sm:$0xff]  ;;  %506 = vmatprep.subr.mxu1 %v276_v33  ;;  %v143_v38 = vld [vmem:[#allocation5 + $0xc0] sm:$0xff]  ;;  %430 = vmatpush1.msra.mxu0 %v147_v34 }
  0x5d   :  { %v272_v37 = vld [vmem:[#allocation5 + $0x4c8] sm:$0xff]  ;;  %v271_v39 = vld [vmem:[#allocation5 + $0x4c0] sm:$0xff]  ;;  %507 = vmatpush1.msra.mxu1 %v275_v35  ;;  %431 = vmatprep.subr.mxu0 %v144_v36 }
  0x5e   :  { %v140_v40 = vld [vmem:[#allocation5 + $0xa8] sm:$0xff]  ;;  %508 = vmatprep.subr.mxu1 %v272_v37  ;;  %v139_v42 = vld [vmem:[#allocation5 + $0xa0] sm:$0xff]  ;;  %432 = vmatpush1.msra.mxu0 %v143_v38 }
  0x5f   :  { %v268_v41 = vld [vmem:[#allocation5 + $0x4a8] sm:$0xff]  ;;  %v267_v43 = vld [vmem:[#allocation5 + $0x4a0] sm:$0xff]  ;;  %509 = vmatpush1.msra.mxu1 %v271_v39  ;;  %433 = vmatprep.subr.mxu0 %v140_v40 }
  0x60   :  { %v136_v44 = vld [vmem:[#allocation5 + $0x88] sm:$0xff]  ;;  %510 = vmatprep.subr.mxu1 %v268_v41  ;;  %v135_v46 = vld [vmem:[#allocation5 + $0x80] sm:$0xff]  ;;  %434 = vmatpush1.msra.mxu0 %v139_v42 }
  0x61   :  { %v264_v45 = vld [vmem:[#allocation5 + $0x488] sm:$0xff]  ;;  %v263_v47 = vld [vmem:[#allocation5 + $0x480] sm:$0xff]  ;;  %511 = vmatpush1.msra.mxu1 %v267_v43  ;;  %435 = vmatprep.subr.mxu0 %v136_v44 }
  0x62   :  { %v132_v48 = vld [vmem:[#allocation5 + $0x68] sm:$0xff]  ;;  %512 = vmatprep.subr.mxu1 %v264_v45  ;;  %v131_v50 = vld [vmem:[#allocation5 + $0x60] sm:$0xff]  ;;  %436 = vmatpush1.msra.mxu0 %v135_v46 }
  0x63   :  { %v260_v49 = vld [vmem:[#allocation5 + $0x468] sm:$0xff]  ;;  %v259_v51 = vld [vmem:[#allocation5 + $0x460] sm:$0xff]  ;;  %513 = vmatpush1.msra.mxu1 %v263_v47  ;;  %437 = vmatprep.subr.mxu0 %v132_v48 }
  0x64   :  { %v128_v52 = vld [vmem:[#allocation5 + $0x48] sm:$0xff]  ;;  %514 = vmatprep.subr.mxu1 %v260_v49  ;;  %v127_v54 = vld [vmem:[#allocation5 + $0x40] sm:$0xff]  ;;  %438 = vmatpush1.msra.mxu0 %v131_v50 }
  0x65   :  { %v256_v53 = vld [vmem:[#allocation5 + $0x448] sm:$0xff]  ;;  %v255_v55 = vld [vmem:[#allocation5 + $0x440] sm:$0xff]  ;;  %515 = vmatpush1.msra.mxu1 %v259_v51  ;;  %439 = vmatprep.subr.mxu0 %v128_v52 }
  0x66   :  { %v124_v56 = vld [vmem:[#allocation5 + $0x28] sm:$0xff]  ;;  %516 = vmatprep.subr.mxu1 %v256_v53  ;;  %v123_v58 = vld [vmem:[#allocation5 + $0x20] sm:$0xff]  ;;  %440 = vmatpush1.msra.mxu0 %v127_v54 }
  0x67   :  { %v252_v57 = vld [vmem:[#allocation5 + $0x428] sm:$0xff]  ;;  %v251_v59 = vld [vmem:[#allocation5 + $0x420] sm:$0xff]  ;;  %517 = vmatpush1.msra.mxu1 %v255_v55  ;;  %441 = vmatprep.subr.mxu0 %v124_v56 }
  0x68   :  { %v120_v60 = vld [vmem:[#allocation5 + $0x8] sm:$0xff]  ;;  %518 = vmatprep.subr.mxu1 %v252_v57  ;;  %v119_v62 = vld [vmem:[#allocation5] sm:$0xff]  ;;  %442 = vmatpush1.msra.mxu0 %v123_v58 }
  0x69   :  { %v248_v61 = vld [vmem:[#allocation5 + $0x408] sm:$0xff]  ;;  %v247_v63 = vld [vmem:[#allocation5 + $0x400] sm:$0xff]  ;;  %519 = vmatpush1.msra.mxu1 %v251_v59  ;;  %443 = vmatprep.subr.mxu0 %v120_v60 }
  0x6a   :  { %v244_v0 = vld [vmem:[#allocation5 + $0x3e8] sm:$0xff]  ;;  %520 = vmatprep.subr.mxu1 %v248_v61  ;;  %v243_v2 = vld [vmem:[#allocation5 + $0x3e0] sm:$0xff]  ;;  %444 = vmatpush1.msra.mxu0 %v119_v62 }
  0x6b   :  { %v372_v1 = vld [vmem:[#allocation5 + $0x7e8] sm:$0xff]  ;;  %v371_v3 = vld [vmem:[#allocation5 + $0x7e0] sm:$0xff]  ;;  %521 = vmatpush1.msra.mxu1 %v247_v63  ;;  %445 = vmatprep.subr.mxu0 %v244_v0 }
  0x6c   :  { %v240_v4 = vld [vmem:[#allocation5 + $0x3c8] sm:$0xff]  ;;  %522 = vmatprep.subr.mxu1 %v372_v1  ;;  %v239_v6 = vld [vmem:[#allocation5 + $0x3c0] sm:$0xff]  ;;  %446 = vmatpush2.msra.mxu0 %v243_v2  ;;  %v2989_v2 = vld [vmem:[#allocation2 + $0x18] sm:$0xff] }
  0x6d   :  { %v368_v5 = vld [vmem:[#allocation5 + $0x7c8] sm:$0xff]  ;;  %v367_v7 = vld [vmem:[#allocation5 + $0x7c0] sm:$0xff]  ;;  %523 = vmatpush2.msra.mxu1 %v371_v3  ;;  %447 = vmatprep.subr.mxu0 %v240_v4  ;;  %v182_v3 = vld [vmem:[#allocation5 + $0x1f8] sm:$0xff] }
  0x6e   :  { %v236_v8 = vld [vmem:[#allocation5 + $0x3a8] sm:$0xff]  ;;  %524 = vmatprep.subr.mxu1 %v368_v5  ;;  %v235_v10 = vld [vmem:[#allocation5 + $0x3a0] sm:$0xff]  ;;  %448 = vmatpush2.msra.mxu0 %v239_v6  ;;  %v310_v4 = vld [vmem:[#allocation5 + $0x5f8] sm:$0xff] }
  0x6f   :  { %v364_v9 = vld [vmem:[#allocation5 + $0x7a8] sm:$0xff]  ;;  %v363_v11 = vld [vmem:[#allocation5 + $0x7a0] sm:$0xff]  ;;  %525 = vmatpush2.msra.mxu1 %v367_v7  ;;  %449 = vmatprep.subr.mxu0 %v236_v8  ;;  %v2992_v5 = vld [vmem:[#allocation2 + $0x10] sm:$0xff] }
  0x70   :  { %v232_v12 = vld [vmem:[#allocation5 + $0x388] sm:$0xff]  ;;  %526 = vmatprep.subr.mxu1 %v364_v9  ;;  %v231_v14 = vld [vmem:[#allocation5 + $0x380] sm:$0xff]  ;;  %450 = vmatpush2.msra.mxu0 %v235_v10  ;;  %v181_v6 = vld [vmem:[#allocation5 + $0x1f0] sm:$0xff] }
  0x71   :  { %v360_v13 = vld [vmem:[#allocation5 + $0x788] sm:$0xff]  ;;  %v359_v15 = vld [vmem:[#allocation5 + $0x780] sm:$0xff]  ;;  %527 = vmatpush2.msra.mxu1 %v363_v11  ;;  %451 = vmatprep.subr.mxu0 %v232_v12  ;;  %v309_v7 = vld [vmem:[#allocation5 + $0x5f0] sm:$0xff] }
  0x72   :  { %v228_v16 = vld [vmem:[#allocation5 + $0x368] sm:$0xff]  ;;  %528 = vmatprep.subr.mxu1 %v360_v13  ;;  %v227_v18 = vld [vmem:[#allocation5 + $0x360] sm:$0xff]  ;;  %452 = vmatpush2.msra.mxu0 %v231_v14  ;;  %v178_v8 = vld [vmem:[#allocation5 + $0x1d8] sm:$0xff] }
  0x73   :  { %v356_v17 = vld [vmem:[#allocation5 + $0x768] sm:$0xff]  ;;  %v355_v19 = vld [vmem:[#allocation5 + $0x760] sm:$0xff]  ;;  %529 = vmatpush2.msra.mxu1 %v359_v15  ;;  %453 = vmatprep.subr.mxu0 %v228_v16  ;;  %v306_v9 = vld [vmem:[#allocation5 + $0x5d8] sm:$0xff] }
  0x74   :  { %v224_v20 = vld [vmem:[#allocation5 + $0x348] sm:$0xff]  ;;  %530 = vmatprep.subr.mxu1 %v356_v17  ;;  %v223_v22 = vld [vmem:[#allocation5 + $0x340] sm:$0xff]  ;;  %454 = vmatpush2.msra.mxu0 %v227_v18  ;;  %v177_v11 = vld [vmem:[#allocation5 + $0x1d0] sm:$0xff] }
  0x75   :  { %v352_v21 = vld [vmem:[#allocation5 + $0x748] sm:$0xff]  ;;  %v351_v23 = vld [vmem:[#allocation5 + $0x740] sm:$0xff]  ;;  %531 = vmatpush2.msra.mxu1 %v355_v19  ;;  %455 = vmatprep.subr.mxu0 %v224_v20  ;;  %v305_v12 = vld [vmem:[#allocation5 + $0x5d0] sm:$0xff] }
  0x76   :  { %v220_v24 = vld [vmem:[#allocation5 + $0x328] sm:$0xff]  ;;  %532 = vmatprep.subr.mxu1 %v352_v21  ;;  %v219_v26 = vld [vmem:[#allocation5 + $0x320] sm:$0xff]  ;;  %456 = vmatpush2.msra.mxu0 %v223_v22  ;;  %v174_v14 = vld [vmem:[#allocation5 + $0x1b8] sm:$0xff] }
  0x77   :  { %v348_v25 = vld [vmem:[#allocation5 + $0x728] sm:$0xff]  ;;  %v347_v27 = vld [vmem:[#allocation5 + $0x720] sm:$0xff]  ;;  %533 = vmatpush2.msra.mxu1 %v351_v23  ;;  %457 = vmatprep.subr.mxu0 %v220_v24  ;;  %v302_v15 = vld [vmem:[#allocation5 + $0x5b8] sm:$0xff] }
  0x78   :  { %v216_v28 = vld [vmem:[#allocation5 + $0x308] sm:$0xff]  ;;  %534 = vmatprep.subr.mxu1 %v348_v25  ;;  %v215_v30 = vld [vmem:[#allocation5 + $0x300] sm:$0xff]  ;;  %458 = vmatpush2.msra.mxu0 %v219_v26  ;;  %v3002_v16 = vld [vmem:[#allocation2 + $0x38] sm:$0xff] }
  0x79   :  { %v344_v29 = vld [vmem:[#allocation5 + $0x708] sm:$0xff]  ;;  %v343_v31 = vld [vmem:[#allocation5 + $0x700] sm:$0xff]  ;;  %535 = vmatpush2.msra.mxu1 %v347_v27  ;;  %459 = vmatprep.subr.mxu0 %v216_v28  ;;  %v173_v17 = vld [vmem:[#allocation5 + $0x1b0] sm:$0xff] }
  0x7a   :  { %v212_v32 = vld [vmem:[#allocation5 + $0x2e8] sm:$0xff]  ;;  %536 = vmatprep.subr.mxu1 %v344_v29  ;;  %v211_v34 = vld [vmem:[#allocation5 + $0x2e0] sm:$0xff]  ;;  %460 = vmatpush2.msra.mxu0 %v215_v30  ;;  %v301_v18 = vld [vmem:[#allocation5 + $0x5b0] sm:$0xff] }
  0x7b   :  { %v340_v33 = vld [vmem:[#allocation5 + $0x6e8] sm:$0xff]  ;;  %v339_v35 = vld [vmem:[#allocation5 + $0x6e0] sm:$0xff]  ;;  %537 = vmatpush2.msra.mxu1 %v343_v31  ;;  %461 = vmatprep.subr.mxu0 %v212_v32  ;;  %v170_v19 = vld [vmem:[#allocation5 + $0x198] sm:$0xff] }
  0x7c   :  { %v208_v36 = vld [vmem:[#allocation5 + $0x2c8] sm:$0xff]  ;;  %538 = vmatprep.subr.mxu1 %v340_v33  ;;  %v207_v38 = vld [vmem:[#allocation5 + $0x2c0] sm:$0xff]  ;;  %462 = vmatpush2.msra.mxu0 %v211_v34  ;;  %v3005_v20 = vld [vmem:[#allocation2 + $0x30] sm:$0xff] }
  0x7d   :  { %v336_v37 = vld [vmem:[#allocation5 + $0x6c8] sm:$0xff]  ;;  %v335_v39 = vld [vmem:[#allocation5 + $0x6c0] sm:$0xff]  ;;  %539 = vmatpush2.msra.mxu1 %v339_v35  ;;  %463 = vmatprep.subr.mxu0 %v208_v36  ;;  %v298_v21 = vld [vmem:[#allocation5 + $0x598] sm:$0xff] }
  0x7e   :  { %v204_v40 = vld [vmem:[#allocation5 + $0x2a8] sm:$0xff]  ;;  %540 = vmatprep.subr.mxu1 %v336_v37  ;;  %v203_v42 = vld [vmem:[#allocation5 + $0x2a0] sm:$0xff]  ;;  %464 = vmatpush2.msra.mxu0 %v207_v38  ;;  %v169_v22 = vld [vmem:[#allocation5 + $0x190] sm:$0xff] }
  0x7f   :  { %v332_v41 = vld [vmem:[#allocation5 + $0x6a8] sm:$0xff]  ;;  %v331_v43 = vld [vmem:[#allocation5 + $0x6a0] sm:$0xff]  ;;  %541 = vmatpush2.msra.mxu1 %v335_v39  ;;  %465 = vmatprep.subr.mxu0 %v204_v40  ;;  %v297_v23 = vld [vmem:[#allocation5 + $0x590] sm:$0xff] }
  0x80   :  { %v200_v44 = vld [vmem:[#allocation5 + $0x288] sm:$0xff]  ;;  %542 = vmatprep.subr.mxu1 %v332_v41  ;;  %v199_v46 = vld [vmem:[#allocation5 + $0x280] sm:$0xff]  ;;  %466 = vmatpush2.msra.mxu0 %v203_v42  ;;  %v166_v24 = vld [vmem:[#allocation5 + $0x178] sm:$0xff] }
  0x81   :  { %v328_v45 = vld [vmem:[#allocation5 + $0x688] sm:$0xff]  ;;  %v327_v47 = vld [vmem:[#allocation5 + $0x680] sm:$0xff]  ;;  %543 = vmatpush2.msra.mxu1 %v331_v43  ;;  %467 = vmatprep.subr.mxu0 %v200_v44  ;;  %v294_v25 = vld [vmem:[#allocation5 + $0x578] sm:$0xff] }
  0x82   :  { %v196_v48 = vld [vmem:[#allocation5 + $0x268] sm:$0xff]  ;;  %544 = vmatprep.subr.mxu1 %v328_v45  ;;  %v195_v50 = vld [vmem:[#allocation5 + $0x260] sm:$0xff]  ;;  %468 = vmatpush2.msra.mxu0 %v199_v46  ;;  %v165_v26 = vld [vmem:[#allocation5 + $0x170] sm:$0xff] }
  0x83   :  { %v324_v49 = vld [vmem:[#allocation5 + $0x668] sm:$0xff]  ;;  %v323_v51 = vld [vmem:[#allocation5 + $0x660] sm:$0xff]  ;;  %545 = vmatpush2.msra.mxu1 %v327_v47  ;;  %469 = vmatprep.subr.mxu0 %v196_v48  ;;  %v293_v27 = vld [vmem:[#allocation5 + $0x570] sm:$0xff] }
  0x84   :  { %v192_v52 = vld [vmem:[#allocation5 + $0x248] sm:$0xff]  ;;  %546 = vmatprep.subr.mxu1 %v324_v49  ;;  %v191_v54 = vld [vmem:[#allocation5 + $0x240] sm:$0xff]  ;;  %470 = vmatpush2.msra.mxu0 %v195_v50  ;;  %v162_v28 = vld [vmem:[#allocation5 + $0x158] sm:$0xff] }
  0x85   :  { %v320_v53 = vld [vmem:[#allocation5 + $0x648] sm:$0xff]  ;;  %v319_v55 = vld [vmem:[#allocation5 + $0x640] sm:$0xff]  ;;  %547 = vmatpush2.msra.mxu1 %v323_v51  ;;  %471 = vmatprep.subr.mxu0 %v192_v52  ;;  %v290_v29 = vld [vmem:[#allocation5 + $0x558] sm:$0xff] }
  0x86   :  { %v188_v56 = vld [vmem:[#allocation5 + $0x228] sm:$0xff]  ;;  %548 = vmatprep.subr.mxu1 %v320_v53  ;;  %v187_v58 = vld [vmem:[#allocation5 + $0x220] sm:$0xff]  ;;  %472 = vmatpush2.msra.mxu0 %v191_v54  ;;  %v161_v30 = vld [vmem:[#allocation5 + $0x150] sm:$0xff] }
  0x87   :  { %v316_v57 = vld [vmem:[#allocation5 + $0x628] sm:$0xff]  ;;  %v315_v59 = vld [vmem:[#allocation5 + $0x620] sm:$0xff]  ;;  %549 = vmatpush2.msra.mxu1 %v319_v55  ;;  %473 = vmatprep.subr.mxu0 %v188_v56  ;;  %v289_v31 = vld [vmem:[#allocation5 + $0x550] sm:$0xff] }
  0x88   :  { %v184_v60 = vld [vmem:[#allocation5 + $0x208] sm:$0xff]  ;;  %550 = vmatprep.subr.mxu1 %v316_v57  ;;  %v183_v62 = vld [vmem:[#allocation5 + $0x200] sm:$0xff]  ;;  %474 = vmatpush2.msra.mxu0 %v187_v58  ;;  %v158_v32 = vld [vmem:[#allocation5 + $0x138] sm:$0xff] }
  0x89   :  { %v312_v61 = vld [vmem:[#allocation5 + $0x608] sm:$0xff]  ;;  %551 = vmatpush2.msra.mxu1 %v315_v59  ;;  %v311_v0 = vld [vmem:[#allocation5 + $0x600] sm:$0xff]  ;;  %475 = vmatprep.subr.mxu0 %v184_v60  ;;  %v286_v33 = vld [vmem:[#allocation5 + $0x538] sm:$0xff] }
  0x8a   :  { %v2985_v63 = vld [vmem:[#allocation2 + $0x8] sm:$0xff]  ;;  %v2987_v1 = vld [vmem:[#allocation2] sm:$0xff]  ;;  %552 = vmatprep.subr.mxu1 %v312_v61  ;;  %476 = vmatpush2.msra.mxu0 %v183_v62  ;;  %v157_v34 = vld [vmem:[#allocation5 + $0x130] sm:$0xff] }
  0x8b   :  { %477 = vmatprep.mubr.f32.mxu0 %v2985_v63  ;;  %553 = vmatpush2.msra.mxu1 %v311_v0  ;;  %v2997_v10 = vld [vmem:[#allocation2 + $0x28] sm:$0xff]  ;;  %v2999_v13 = vld [vmem:[#allocation2 + $0x20] sm:$0xff]  ;;  %v285_v35 = vld [vmem:[#allocation5 + $0x530] sm:$0xff] }
  0x8c   :  { %478 = vmatmul.mubr.f32.vlgmr.msra.gmra.mxu0 %v2987_v1  ;;  %554 = vmatprep.mubr.f32.mxu1 %v2989_v2  ;;  %v154_v36 = vld [vmem:[#allocation5 + $0x118] sm:$0xff]  ;;  %v153_v38 = vld [vmem:[#allocation5 + $0x110] sm:$0xff] }
  0x8d   :  { %567 = vmatprep.subr.mxu0 %v182_v3  ;;  %644 = vmatprep.subr.mxu1 %v310_v4  ;;  %v282_v37 = vld [vmem:[#allocation5 + $0x518] sm:$0xff]  ;;  %v281_v39 = vld [vmem:[#allocation5 + $0x510] sm:$0xff] }
  0x8e   :  { %555 = vmatmul.mubr.f32.vlgmr.msra.gmra.mxu1 %v2992_v5  ;;  %568 = vmatpush1.msra.mxu0 %v181_v6  ;;  %v150_v40 = vld [vmem:[#allocation5 + $0xf8] sm:$0xff]  ;;  %v149_v42 = vld [vmem:[#allocation5 + $0xf0] sm:$0xff] }
  0x8f   :  { %645 = vmatpush1.msra.mxu1 %v309_v7  ;;  %569 = vmatprep.subr.mxu0 %v178_v8  ;;  %v278_v41 = vld [vmem:[#allocation5 + $0x4f8] sm:$0xff]  ;;  %v277_v43 = vld [vmem:[#allocation5 + $0x4f0] sm:$0xff] }
  0x90   :  { %646 = vmatprep.subr.mxu1 %v306_v9  ;;  %483 = vmatprep.mubr.f32.mxu0 %v2997_v10  ;;  %v146_v44 = vld [vmem:[#allocation5 + $0xd8] sm:$0xff]  ;;  %v145_v46 = vld [vmem:[#allocation5 + $0xd0] sm:$0xff] }
  0x91   :  { %570 = vmatpush1.msra.mxu0 %v177_v11  ;;  %647 = vmatpush1.msra.mxu1 %v305_v12  ;;  %v274_v45 = vld [vmem:[#allocation5 + $0x4d8] sm:$0xff]  ;;  %v273_v47 = vld [vmem:[#allocation5 + $0x4d0] sm:$0xff] }
  0x92   :  { %484 = vmatmul.mubr.f32.gmra.mxu0 %v2999_v13  ;;  %571 = vmatprep.subr.mxu0 %v174_v14  ;;  %v142_v48 = vld [vmem:[#allocation5 + $0xb8] sm:$0xff]  ;;  %v141_v50 = vld [vmem:[#allocation5 + $0xb0] sm:$0xff] }
  0x93   :  { %648 = vmatprep.subr.mxu1 %v302_v15  ;;  %560 = vmatprep.mubr.f32.mxu1 %v3002_v16  ;;  %v270_v49 = vld [vmem:[#allocation5 + $0x4b8] sm:$0xff]  ;;  %v269_v51 = vld [vmem:[#allocation5 + $0x4b0] sm:$0xff] }
  0x94   :  { %572 = vmatpush1.msra.mxu0 %v173_v17  ;;  %649 = vmatpush1.msra.mxu1 %v301_v18  ;;  %v138_v52 = vld [vmem:[#allocation5 + $0x98] sm:$0xff]  ;;  %v137_v54 = vld [vmem:[#allocation5 + $0x90] sm:$0xff] }
  0x95   :  { %573 = vmatprep.subr.mxu0 %v170_v19  ;;  %561 = vmatmul.mubr.f32.gmra.mxu1 %v3005_v20  ;;  %v266_v53 = vld [vmem:[#allocation5 + $0x498] sm:$0xff]  ;;  %v265_v55 = vld [vmem:[#allocation5 + $0x490] sm:$0xff] }
  0x96   :  { %650 = vmatprep.subr.mxu1 %v298_v21  ;;  %574 = vmatpush1.msra.mxu0 %v169_v22  ;;  %v134_v56 = vld [vmem:[#allocation5 + $0x78] sm:$0xff]  ;;  %v133_v58 = vld [vmem:[#allocation5 + $0x70] sm:$0xff] }
  0x97   :  { %651 = vmatpush1.msra.mxu1 %v297_v23  ;;  %575 = vmatprep.subr.mxu0 %v166_v24  ;;  %v262_v57 = vld [vmem:[#allocation5 + $0x478] sm:$0xff]  ;;  %v261_v59 = vld [vmem:[#allocation5 + $0x470] sm:$0xff] }
  0x98   :  { %652 = vmatprep.subr.mxu1 %v294_v25  ;;  %576 = vmatpush1.msra.mxu0 %v165_v26  ;;  %v130_v60 = vld [vmem:[#allocation5 + $0x58] sm:$0xff]  ;;  %v129_v62 = vld [vmem:[#allocation5 + $0x50] sm:$0xff] }
  0x99   :  { %653 = vmatpush1.msra.mxu1 %v293_v27  ;;  %577 = vmatprep.subr.mxu0 %v162_v28  ;;  %v258_v61 = vld [vmem:[#allocation5 + $0x458] sm:$0xff]  ;;  %v257_v0 = vld [vmem:[#allocation5 + $0x450] sm:$0xff] }
  0x9a   :  { %654 = vmatprep.subr.mxu1 %v290_v29  ;;  %578 = vmatpush1.msra.mxu0 %v161_v30  ;;  %v126_v3 = vld [vmem:[#allocation5 + $0x38] sm:$0xff]  ;;  %v125_v6 = vld [vmem:[#allocation5 + $0x30] sm:$0xff] }
  0x9b   :  { %655 = vmatpush1.msra.mxu1 %v289_v31  ;;  %579 = vmatprep.subr.mxu0 %v158_v32  ;;  %v254_v4 = vld [vmem:[#allocation5 + $0x438] sm:$0xff]  ;;  %v253_v7 = vld [vmem:[#allocation5 + $0x430] sm:$0xff] }
  0x9c   :  { %656 = vmatprep.subr.mxu1 %v286_v33  ;;  %580 = vmatpush1.msra.mxu0 %v157_v34  ;;  %v122_v8 = vld [vmem:[#allocation5 + $0x18] sm:$0xff]  ;;  %v121_v11 = vld [vmem:[#allocation5 + $0x10] sm:$0xff] }
  0x9d   :  { %657 = vmatpush1.msra.mxu1 %v285_v35  ;;  %581 = vmatprep.subr.mxu0 %v154_v36  ;;  %v250_v9 = vld [vmem:[#allocation5 + $0x418] sm:$0xff]  ;;  %v249_v12 = vld [vmem:[#allocation5 + $0x410] sm:$0xff] }
  0x9e   :  { %658 = vmatprep.subr.mxu1 %v282_v37  ;;  %582 = vmatpush1.msra.mxu0 %v153_v38  ;;  %v246_v14 = vld [vmem:[#allocation5 + $0x3f8] sm:$0xff]  ;;  %v245_v17 = vld [vmem:[#allocation5 + $0x3f0] sm:$0xff] }
  0x9f   :  { %659 = vmatpush1.msra.mxu1 %v281_v39  ;;  %583 = vmatprep.subr.mxu0 %v150_v40  ;;  %v374_v15 = vld [vmem:[#allocation5 + $0x7f8] sm:$0xff]  ;;  %v373_v18 = vld [vmem:[#allocation5 + $0x7f0] sm:$0xff] }
  0xa0   :  { %660 = vmatprep.subr.mxu1 %v278_v41  ;;  %584 = vmatpush1.msra.mxu0 %v149_v42  ;;  %v242_v19 = vld [vmem:[#allocation5 + $0x3d8] sm:$0xff]  ;;  %v241_v22 = vld [vmem:[#allocation5 + $0x3d0] sm:$0xff] }
  0xa1   :  { %661 = vmatpush1.msra.mxu1 %v277_v43  ;;  %585 = vmatprep.subr.mxu0 %v146_v44  ;;  %v370_v21 = vld [vmem:[#allocation5 + $0x7d8] sm:$0xff]  ;;  %v369_v23 = vld [vmem:[#allocation5 + $0x7d0] sm:$0xff] }
  0xa2   :  { %662 = vmatprep.subr.mxu1 %v274_v45  ;;  %586 = vmatpush1.msra.mxu0 %v145_v46  ;;  %v238_v24 = vld [vmem:[#allocation5 + $0x3b8] sm:$0xff]  ;;  %v237_v26 = vld [vmem:[#allocation5 + $0x3b0] sm:$0xff] }
  0xa3   :  { %663 = vmatpush1.msra.mxu1 %v273_v47  ;;  %587 = vmatprep.subr.mxu0 %v142_v48  ;;  %v366_v25 = vld [vmem:[#allocation5 + $0x7b8] sm:$0xff]  ;;  %v365_v27 = vld [vmem:[#allocation5 + $0x7b0] sm:$0xff] }
  0xa4   :  { %664 = vmatprep.subr.mxu1 %v270_v49  ;;  %588 = vmatpush1.msra.mxu0 %v141_v50  ;;  %v234_v28 = vld [vmem:[#allocation5 + $0x398] sm:$0xff]  ;;  %v233_v30 = vld [vmem:[#allocation5 + $0x390] sm:$0xff] }
  0xa5   :  { %665 = vmatpush1.msra.mxu1 %v269_v51  ;;  %589 = vmatprep.subr.mxu0 %v138_v52  ;;  %v362_v29 = vld [vmem:[#allocation5 + $0x798] sm:$0xff]  ;;  %v361_v31 = vld [vmem:[#allocation5 + $0x790] sm:$0xff] }
  0xa6   :  { %666 = vmatprep.subr.mxu1 %v266_v53  ;;  %590 = vmatpush1.msra.mxu0 %v137_v54  ;;  %v230_v32 = vld [vmem:[#allocation5 + $0x378] sm:$0xff]  ;;  %v229_v34 = vld [vmem:[#allocation5 + $0x370] sm:$0xff] }
  0xa7   :  { %667 = vmatpush1.msra.mxu1 %v265_v55  ;;  %591 = vmatprep.subr.mxu0 %v134_v56  ;;  %v358_v33 = vld [vmem:[#allocation5 + $0x778] sm:$0xff]  ;;  %v357_v35 = vld [vmem:[#allocation5 + $0x770] sm:$0xff] }
  0xa8   :  { %668 = vmatprep.subr.mxu1 %v262_v57  ;;  %592 = vmatpush1.msra.mxu0 %v133_v58  ;;  %v226_v36 = vld [vmem:[#allocation5 + $0x358] sm:$0xff]  ;;  %v225_v38 = vld [vmem:[#allocation5 + $0x350] sm:$0xff] }
  0xa9   :  { %669 = vmatpush1.msra.mxu1 %v261_v59  ;;  %593 = vmatprep.subr.mxu0 %v130_v60  ;;  %v354_v37 = vld [vmem:[#allocation5 + $0x758] sm:$0xff]  ;;  %v353_v39 = vld [vmem:[#allocation5 + $0x750] sm:$0xff] }
  0xaa   :  { %670 = vmatprep.subr.mxu1 %v258_v61  ;;  %594 = vmatpush1.msra.mxu0 %v129_v62  ;;  %v222_v40 = vld [vmem:[#allocation5 + $0x338] sm:$0xff]  ;;  %v221_v42 = vld [vmem:[#allocation5 + $0x330] sm:$0xff] }
  0xab   :  { %671 = vmatpush1.msra.mxu1 %v257_v0  ;;  %595 = vmatprep.subr.mxu0 %v126_v3  ;;  %v350_v41 = vld [vmem:[#allocation5 + $0x738] sm:$0xff]  ;;  %v349_v43 = vld [vmem:[#allocation5 + $0x730] sm:$0xff] }
  0xac   :  { %672 = vmatprep.subr.mxu1 %v254_v4  ;;  %596 = vmatpush1.msra.mxu0 %v125_v6  ;;  %v218_v44 = vld [vmem:[#allocation5 + $0x318] sm:$0xff]  ;;  %v217_v46 = vld [vmem:[#allocation5 + $0x310] sm:$0xff] }
  0xad   :  { %673 = vmatpush1.msra.mxu1 %v253_v7  ;;  %597 = vmatprep.subr.mxu0 %v122_v8  ;;  %v346_v45 = vld [vmem:[#allocation5 + $0x718] sm:$0xff]  ;;  %v345_v47 = vld [vmem:[#allocation5 + $0x710] sm:$0xff] }
  0xae   :  { %674 = vmatprep.subr.mxu1 %v250_v9  ;;  %598 = vmatpush1.msra.mxu0 %v121_v11  ;;  %v214_v48 = vld [vmem:[#allocation5 + $0x2f8] sm:$0xff]  ;;  %v213_v50 = vld [vmem:[#allocation5 + $0x2f0] sm:$0xff] }
  0xaf   :  { %675 = vmatpush1.msra.mxu1 %v249_v12  ;;  %599 = vmatprep.subr.mxu0 %v246_v14  ;;  %v342_v49 = vld [vmem:[#allocation5 + $0x6f8] sm:$0xff]  ;;  %v341_v51 = vld [vmem:[#allocation5 + $0x6f0] sm:$0xff] }
  0xb0   :  { %676 = vmatprep.subr.mxu1 %v374_v15  ;;  %600 = vmatpush2.msra.mxu0 %v245_v17  ;;  %v210_v52 = vld [vmem:[#allocation5 + $0x2d8] sm:$0xff]  ;;  %v209_v54 = vld [vmem:[#allocation5 + $0x2d0] sm:$0xff] }
  0xb1   :  { %677 = vmatpush2.msra.mxu1 %v373_v18  ;;  %601 = vmatprep.subr.mxu0 %v242_v19  ;;  %v338_v53 = vld [vmem:[#allocation5 + $0x6d8] sm:$0xff]  ;;  %v337_v55 = vld [vmem:[#allocation5 + $0x6d0] sm:$0xff] }
  0xb2   :  { %678 = vmatprep.subr.mxu1 %v370_v21  ;;  %602 = vmatpush2.msra.mxu0 %v241_v22  ;;  %v206_v56 = vld [vmem:[#allocation5 + $0x2b8] sm:$0xff]  ;;  %v205_v58 = vld [vmem:[#allocation5 + $0x2b0] sm:$0xff] }
  0xb3   :  { %679 = vmatpush2.msra.mxu1 %v369_v23  ;;  %603 = vmatprep.subr.mxu0 %v238_v24  ;;  %v334_v57 = vld [vmem:[#allocation5 + $0x6b8] sm:$0xff]  ;;  %v333_v59 = vld [vmem:[#allocation5 + $0x6b0] sm:$0xff]  ;;  %v970_v24 = vld [vmem:[#allocation7 + $0x3c8] sm:$0xff] }
  0xb4   :  { %680 = vmatprep.subr.mxu1 %v366_v25  ;;  %604 = vmatpush2.msra.mxu0 %v237_v26  ;;  %v202_v60 = vld [vmem:[#allocation5 + $0x298] sm:$0xff]  ;;  %v201_v62 = vld [vmem:[#allocation5 + $0x290] sm:$0xff]  ;;  %v969_v25 = vld [vmem:[#allocation7 + $0x3c0] sm:$0xff] }
  0xb5   :  { %681 = vmatpush2.msra.mxu1 %v365_v27  ;;  %605 = vmatprep.subr.mxu0 %v234_v28  ;;  %v330_v61 = vld [vmem:[#allocation5 + $0x698] sm:$0xff]  ;;  %v329_v0 = vld [vmem:[#allocation5 + $0x690] sm:$0xff]  ;;  %v962_v26 = vld [vmem:[#allocation7 + $0x388] sm:$0xff] }
  0xb6   :  { %682 = vmatprep.subr.mxu1 %v362_v29  ;;  %606 = vmatpush2.msra.mxu0 %v233_v30  ;;  %v198_v3 = vld [vmem:[#allocation5 + $0x278] sm:$0xff]  ;;  %v197_v6 = vld [vmem:[#allocation5 + $0x270] sm:$0xff]  ;;  %v961_v27 = vld [vmem:[#allocation7 + $0x380] sm:$0xff] }
  0xb7   :  { %683 = vmatpush2.msra.mxu1 %v361_v31  ;;  %607 = vmatprep.subr.mxu0 %v230_v32  ;;  %v326_v4 = vld [vmem:[#allocation5 + $0x678] sm:$0xff]  ;;  %v325_v7 = vld [vmem:[#allocation5 + $0x670] sm:$0xff]  ;;  %v938_v28 = vld [vmem:[#allocation7 + $0x2c8] sm:$0xff] }
  0xb8   :  { %684 = vmatprep.subr.mxu1 %v358_v33  ;;  %608 = vmatpush2.msra.mxu0 %v229_v34  ;;  %v194_v8 = vld [vmem:[#allocation5 + $0x258] sm:$0xff]  ;;  %v193_v11 = vld [vmem:[#allocation5 + $0x250] sm:$0xff]  ;;  %v929_v29 = vld [vmem:[#allocation7 + $0x280] sm:$0xff] }
  0xb9   :  { %685 = vmatpush2.msra.mxu1 %v357_v35  ;;  %609 = vmatprep.subr.mxu0 %v226_v36  ;;  %v322_v9 = vld [vmem:[#allocation5 + $0x658] sm:$0xff]  ;;  %v321_v12 = vld [vmem:[#allocation5 + $0x650] sm:$0xff]  ;;  %v922_v30 = vld [vmem:[#allocation7 + $0x248] sm:$0xff] }
  0xba   :  { %686 = vmatprep.subr.mxu1 %v354_v37  ;;  %610 = vmatpush2.msra.mxu0 %v225_v38  ;;  %v190_v14 = vld [vmem:[#allocation5 + $0x238] sm:$0xff]  ;;  %v189_v17 = vld [vmem:[#allocation5 + $0x230] sm:$0xff]  ;;  %v913_v31 = vld [vmem:[#allocation7 + $0x200] sm:$0xff] }
  0xbb   :  { %687 = vmatpush2.msra.mxu1 %v353_v39  ;;  %611 = vmatprep.subr.mxu0 %v222_v40  ;;  %v318_v15 = vld [vmem:[#allocation5 + $0x638] sm:$0xff]  ;;  %v317_v18 = vld [vmem:[#allocation5 + $0x630] sm:$0xff]  ;;  %v906_v32 = vld [vmem:[#allocation7 + $0x1c8] sm:$0xff] }
  0xbc   :  { %688 = vmatprep.subr.mxu1 %v350_v41  ;;  %612 = vmatpush2.msra.mxu0 %v221_v42  ;;  %v186_v19 = vld [vmem:[#allocation5 + $0x218] sm:$0xff]  ;;  %v185_v22 = vld [vmem:[#allocation5 + $0x210] sm:$0xff]  ;;  %v905_v33 = vld [vmem:[#allocation7 + $0x1c0] sm:$0xff] }
  0xbd   :  { %689 = vmatpush2.msra.mxu1 %v349_v43  ;;  %613 = vmatprep.subr.mxu0 %v218_v44  ;;  %v314_v21 = vld [vmem:[#allocation5 + $0x618] sm:$0xff]  ;;  %v313_v23 = vld [vmem:[#allocation5 + $0x610] sm:$0xff]  ;;  %v898_v34 = vld [vmem:[#allocation7 + $0x188] sm:$0xff] }
  0xbe   :  { %690 = vmatprep.subr.mxu1 %v346_v45  ;;  %614 = vmatpush2.msra.mxu0 %v217_v46  ;;  %v897_v35 = vld [vmem:[#allocation7 + $0x180] sm:$0xff]  ;;  %v890_v36 = vld [vmem:[#allocation7 + $0x148] sm:$0xff] }
  0xbf   :  { %691 = vmatpush2.msra.mxu1 %v345_v47  ;;  %615 = vmatprep.subr.mxu0 %v214_v48  ;;  %v889_v37 = vld [vmem:[#allocation7 + $0x140] sm:$0xff]  ;;  %v882_v38 = vld [vmem:[#allocation7 + $0x108] sm:$0xff] }
  0xc0   :  { %692 = vmatprep.subr.mxu1 %v342_v49  ;;  %616 = vmatpush2.msra.mxu0 %v213_v50  ;;  %v881_v39 = vld [vmem:[#allocation7 + $0x100] sm:$0xff]  ;;  %v874_v40 = vld [vmem:[#allocation7 + $0xc8] sm:$0xff] }
  0xc1   :  { %693 = vmatpush2.msra.mxu1 %v341_v51  ;;  %617 = vmatprep.subr.mxu0 %v210_v52  ;;  %v873_v41 = vld [vmem:[#allocation7 + $0xc0] sm:$0xff]  ;;  %v866_v42 = vld [vmem:[#allocation7 + $0x88] sm:$0xff] }
  0xc2   :  { %694 = vmatprep.subr.mxu1 %v338_v53  ;;  %618 = vmatpush2.msra.mxu0 %v209_v54  ;;  %v865_v43 = vld [vmem:[#allocation7 + $0x80] sm:$0xff]  ;;  %v858_v44 = vld [vmem:[#allocation7 + $0x48] sm:$0xff] }
  0xc3   :  { %695 = vmatpush2.msra.mxu1 %v337_v55  ;;  %619 = vmatprep.subr.mxu0 %v206_v56  ;;  %v857_v45 = vld [vmem:[#allocation7 + $0x40] sm:$0xff]  ;;  %v1226_v46 = vld [vmem:[#allocation7 + $0xbc8] sm:$0xff] }
  0xc4   :  { %696 = vmatprep.subr.mxu1 %v334_v57  ;;  %620 = vmatpush2.msra.mxu0 %v205_v58  ;;  %v1225_v47 = vld [vmem:[#allocation7 + $0xbc0] sm:$0xff]  ;;  %v850_v48 = vld [vmem:[#allocation7 + $0x8] sm:$0xff] }
  0xc5   :  { %697 = vmatpush2.msra.mxu1 %v333_v59  ;;  %621 = vmatprep.subr.mxu0 %v202_v60  ;;  %v1218_v49 = vld [vmem:[#allocation7 + $0xb88] sm:$0xff]  ;;  %v849_v50 = vld [vmem:[#allocation7] sm:$0xff] }
  0xc6   :  { %698 = vmatprep.subr.mxu1 %v330_v61  ;;  %622 = vmatpush2.msra.mxu0 %v201_v62  ;;  %v1217_v51 = vld [vmem:[#allocation7 + $0xb80] sm:$0xff]  ;;  %v1098_v52 = vld [vmem:[#allocation7 + $0x7c8] sm:$0xff] }
  0xc7   :  { %699 = vmatpush2.msra.mxu1 %v329_v0  ;;  %623 = vmatprep.subr.mxu0 %v198_v3  ;;  %v1097_v53 = vld [vmem:[#allocation7 + $0x7c0] sm:$0xff]  ;;  %v1210_v54 = vld [vmem:[#allocation7 + $0xb48] sm:$0xff] }
  0xc8   :  { %700 = vmatprep.subr.mxu1 %v326_v4  ;;  %624 = vmatpush2.msra.mxu0 %v197_v6  ;;  %v1090_v55 = vld [vmem:[#allocation7 + $0x788] sm:$0xff]  ;;  %v1209_v56 = vld [vmem:[#allocation7 + $0xb40] sm:$0xff] }
  0xc9   :  { %701 = vmatpush2.msra.mxu1 %v325_v7  ;;  %625 = vmatprep.subr.mxu0 %v194_v8  ;;  %v1202_v57 = vld [vmem:[#allocation7 + $0xb08] sm:$0xff]  ;;  %v1089_v58 = vld [vmem:[#allocation7 + $0x780] sm:$0xff] }
  0xca   :  { %702 = vmatprep.subr.mxu1 %v322_v9  ;;  %626 = vmatpush2.msra.mxu0 %v193_v11  ;;  %v1201_v59 = vld [vmem:[#allocation7 + $0xb00] sm:$0xff]  ;;  %v1082_v60 = vld [vmem:[#allocation7 + $0x748] sm:$0xff] }
  0xcb   :  { %703 = vmatpush2.msra.mxu1 %v321_v12  ;;  %627 = vmatprep.subr.mxu0 %v190_v14  ;;  %v1194_v61 = vld [vmem:[#allocation7 + $0xac8] sm:$0xff]  ;;  %v1193_v62 = vld [vmem:[#allocation7 + $0xac0] sm:$0xff] }
  0xcc   :  { %704 = vmatprep.subr.mxu1 %v318_v15  ;;  %628 = vmatpush2.msra.mxu0 %v189_v17  ;;  %v1081_v0 = vld [vmem:[#allocation7 + $0x740] sm:$0xff]  ;;  %v1186_v3 = vld [vmem:[#allocation7 + $0xa88] sm:$0xff] }
  0xcd   :  { %705 = vmatpush2.msra.mxu1 %v317_v18  ;;  %629 = vmatprep.subr.mxu0 %v186_v19  ;;  %v1074_v4 = vld [vmem:[#allocation7 + $0x708] sm:$0xff]  ;;  %v1185_v6 = vld [vmem:[#allocation7 + $0xa80] sm:$0xff] }
  0xce   :  { %706 = vmatprep.subr.mxu1 %v314_v21  ;;  %630 = vmatpush2.msra.mxu0 %v185_v22  ;;  %v1073_v7 = vld [vmem:[#allocation7 + $0x700] sm:$0xff]  ;;  %v1178_v8 = vld [vmem:[#allocation7 + $0xa48] sm:$0xff] }
  0xcf   :  { %631 = vmatprep.mubr.f32.mxu0 %v2985_v63  ;;  %707 = vmatpush2.msra.mxu1 %v313_v23  ;;  %v954_v63 = vld [vmem:[#allocation7 + $0x348] sm:$0xff]  ;;  %v1177_v11 = vld [vmem:[#allocation7 + $0xa40] sm:$0xff] }
  0xd0   :  { %708 = vmatprep.mubr.f32.mxu1 %v2989_v2  ;;  %632 = vmatmul.mubr.f32.vlgmr.msra.gmra.mxu0 %v2987_v1  ;;  %v953_v2 = vld [vmem:[#allocation7 + $0x340] sm:$0xff]  ;;  %v946_v1 = vld [vmem:[#allocation7 + $0x308] sm:$0xff] }
  0xd1   :  { %709 = vmatmul.mubr.f32.vlgmr.msra.gmra.mxu1 %v2992_v5  ;;  %637 = vmatprep.mubr.f32.mxu0 %v2997_v10  ;;  %v945_v5 = vld [vmem:[#allocation7 + $0x300] sm:$0xff]  ;;  %v1066_v9 = vld [vmem:[#allocation7 + $0x6c8] sm:$0xff] }
  0xd2   :  { %714 = vmatprep.mubr.f32.mxu1 %v3002_v16  ;;  %1437 = vmatprep.subr.mxu0 %v970_v24  ;;  %v937_v10 = vld [vmem:[#allocation7 + $0x2c0] sm:$0xff]  ;;  %v930_v16 = vld [vmem:[#allocation7 + $0x288] sm:$0xff] }
  0xd3   :  { %1438 = vmatpush1.msra.mxu0 %v969_v25  ;;  %1514 = vmatprep.subr.mxu1 %v1226_v46  ;;  %v1065_v12 = vld [vmem:[#allocation7 + $0x6c0] sm:$0xff]  ;;  %v1170_v14 = vld [vmem:[#allocation7 + $0xa08] sm:$0xff] }
  0xd4   :  { %638 = vmatmul.mubr.f32.gmra.mxu0 %v2999_v13  ;;  %1439 = vmatprep.subr.mxu0 %v962_v26  ;;  %v921_v13 = vld [vmem:[#allocation7 + $0x240] sm:$0xff]  ;;  %v1058_v15 = vld [vmem:[#allocation7 + $0x688] sm:$0xff] }
  0xd5   :  { %715 = vmatmul.mubr.f32.gmra.mxu1 %v3005_v20  ;;  %1440 = vmatpush1.msra.mxu0 %v961_v27  ;;  %v914_v20 = vld [vmem:[#allocation7 + $0x208] sm:$0xff]  ;;  %v1169_v17 = vld [vmem:[#allocation7 + $0xa00] sm:$0xff] }
  0xd6   :  { %1441 = vmatprep.subr.mxu0 %v954_v63  ;;  %1515 = vmatpush1.msra.mxu1 %v1225_v47  ;;  %v1057_v18 = vld [vmem:[#allocation7 + $0x680] sm:$0xff]  ;;  %v1162_v19 = vld [vmem:[#allocation7 + $0x9c8] sm:$0xff] }
  0xd7   :  { %1442 = vmatpush1.msra.mxu0 %v953_v2  ;;  %1516 = vmatprep.subr.mxu1 %v1218_v49  ;;  %v1050_v21 = vld [vmem:[#allocation7 + $0x648] sm:$0xff]  ;;  %v1161_v22 = vld [vmem:[#allocation7 + $0x9c0] sm:$0xff] }
  0xd8   :  { %1443 = vmatprep.subr.mxu0 %v946_v1  ;;  %1517 = vmatpush1.msra.mxu1 %v1217_v51  ;;  %v1049_v23 = vld [vmem:[#allocation7 + $0x640] sm:$0xff]  ;;  %v1154_v24 = vld [vmem:[#allocation7 + $0x988] sm:$0xff]  ;;  %v972_v51 = vld [vmem:[#allocation7 + $0x3d8] sm:$0xff] }
  0xd9   :  { %1444 = vmatpush1.msra.mxu0 %v945_v5  ;;  %1518 = vmatprep.subr.mxu1 %v1210_v54  ;;  %v1042_v25 = vld [vmem:[#allocation7 + $0x608] sm:$0xff]  ;;  %v1153_v26 = vld [vmem:[#allocation7 + $0x980] sm:$0xff] }
  0xda   :  { %1445 = vmatprep.subr.mxu0 %v938_v28  ;;  %1519 = vmatpush1.msra.mxu1 %v1209_v56  ;;  %v1041_v27 = vld [vmem:[#allocation7 + $0x600] sm:$0xff]  ;;  %v1146_v63 = vld [vmem:[#allocation7 + $0x948] sm:$0xff] }
  0xdb   :  { %1446 = vmatpush1.msra.mxu0 %v937_v10  ;;  %1520 = vmatprep.subr.mxu1 %v1202_v57  ;;  %v1034_v2 = vld [vmem:[#allocation7 + $0x5c8] sm:$0xff]  ;;  %v1145_v1 = vld [vmem:[#allocation7 + $0x940] sm:$0xff] }
  0xdc   :  { %1447 = vmatprep.subr.mxu0 %v930_v16  ;;  %1521 = vmatpush1.msra.mxu1 %v1201_v59  ;;  %v1033_v5 = vld [vmem:[#allocation7 + $0x5c0] sm:$0xff]  ;;  %v1138_v28 = vld [vmem:[#allocation7 + $0x908] sm:$0xff] }
  0xdd   :  { %1448 = vmatpush1.msra.mxu0 %v929_v29  ;;  %1522 = vmatprep.subr.mxu1 %v1194_v61  ;;  %v1026_v10 = vld [vmem:[#allocation7 + $0x588] sm:$0xff]  ;;  %v1137_v16 = vld [vmem:[#allocation7 + $0x900] sm:$0xff] }
  0xde   :  { %1449 = vmatprep.subr.mxu0 %v922_v30  ;;  %1523 = vmatpush1.msra.mxu1 %v1193_v62  ;;  %v1025_v29 = vld [vmem:[#allocation7 + $0x580] sm:$0xff]  ;;  %v1130_v30 = vld [vmem:[#allocation7 + $0x8c8] sm:$0xff] }
  0xdf   :  { %1450 = vmatpush1.msra.mxu0 %v921_v13  ;;  %1524 = vmatprep.subr.mxu1 %v1186_v3  ;;  %v1018_v13 = vld [vmem:[#allocation7 + $0x548] sm:$0xff]  ;;  %v1353_v46 = vld [vmem:[#allocation7 + $0xfc0] sm:$0xff] }
  0xe0   :  { %1451 = vmatprep.subr.mxu0 %v914_v20  ;;  %1525 = vmatpush1.msra.mxu1 %v1185_v6  ;;  %v1129_v20 = vld [vmem:[#allocation7 + $0x8c0] sm:$0xff]  ;;  %v1322_v57 = vld [vmem:[#allocation7 + $0xec8] sm:$0xff] }
  0xe1   :  { %1452 = vmatpush1.msra.mxu0 %v913_v31  ;;  %1526 = vmatprep.subr.mxu1 %v1178_v8  ;;  %v1017_v31 = vld [vmem:[#allocation7 + $0x540] sm:$0xff]  ;;  %v1314_v59 = vld [vmem:[#allocation7 + $0xe88] sm:$0xff] }
  0xe2   :  { %1453 = vmatprep.subr.mxu0 %v906_v32  ;;  %1527 = vmatpush1.msra.mxu1 %v1177_v11  ;;  %v1122_v32 = vld [vmem:[#allocation7 + $0x888] sm:$0xff]  ;;  %v985_v47 = vld [vmem:[#allocation7 + $0x440] sm:$0xff] }
  0xe3   :  { %1454 = vmatpush1.msra.mxu0 %v905_v33  ;;  %1528 = vmatprep.subr.mxu1 %v1170_v14  ;;  %v1010_v33 = vld [vmem:[#allocation7 + $0x508] sm:$0xff]  ;;  %v977_v49 = vld [vmem:[#allocation7 + $0x400] sm:$0xff] }
  0xe4   :  { %1455 = vmatprep.subr.mxu0 %v898_v34  ;;  %1529 = vmatpush1.msra.mxu1 %v1169_v17  ;;  %v1121_v34 = vld [vmem:[#allocation7 + $0x880] sm:$0xff]  ;;  %v1306_v61 = vld [vmem:[#allocation7 + $0xe48] sm:$0xff] }
  0xe5   :  { %1456 = vmatpush1.msra.mxu0 %v897_v35  ;;  %1530 = vmatprep.subr.mxu1 %v1162_v19  ;;  %v1009_v35 = vld [vmem:[#allocation7 + $0x500] sm:$0xff] }
  0xe6   :  { %1457 = vmatprep.subr.mxu0 %v890_v36  ;;  %1531 = vmatpush1.msra.mxu1 %v1161_v22  ;;  %v1114_v36 = vld [vmem:[#allocation7 + $0x848] sm:$0xff]  ;;  %v1337_v54 = vld [vmem:[#allocation7 + $0xf40] sm:$0xff] }
  0xe7   :  { %1458 = vmatpush1.msra.mxu0 %v889_v37  ;;  %1532 = vmatprep.subr.mxu1 %v1154_v24  ;;  %v1002_v37 = vld [vmem:[#allocation7 + $0x4c8] sm:$0xff]  ;;  %v1329_v56 = vld [vmem:[#allocation7 + $0xf00] sm:$0xff] }
  0xe8   :  { %1459 = vmatprep.subr.mxu0 %v882_v38  ;;  %1533 = vmatpush1.msra.mxu1 %v1153_v26  ;;  %v1113_v38 = vld [vmem:[#allocation7 + $0x840] sm:$0xff]  ;;  %v377_v26 = vlaneseq }
  0xe9   :  { %1460 = vmatpush1.msra.mxu0 %v881_v39  ;;  %1534 = vmatprep.subr.mxu1 %v1146_v63  ;;  %v1001_v39 = vld [vmem:[#allocation7 + $0x4c0] sm:$0xff] }
  0xea   :  { %1461 = vmatprep.subr.mxu0 %v874_v40  ;;  %1535 = vmatpush1.msra.mxu1 %v1145_v1  ;;  %v1106_v40 = vld [vmem:[#allocation7 + $0x808] sm:$0xff]  ;;  %v1305_v62 = vld [vmem:[#allocation7 + $0xe40] sm:$0xff] }
  0xeb   :  { %1462 = vmatpush1.msra.mxu0 %v873_v41  ;;  %1536 = vmatprep.subr.mxu1 %v1138_v28  ;;  %v994_v41 = vld [vmem:[#allocation7 + $0x488] sm:$0xff]  ;;  %v1297_v3 = vld [vmem:[#allocation7 + $0xe00] sm:$0xff] }
  0xec   :  { %1463 = vmatprep.subr.mxu0 %v866_v42  ;;  %1537 = vmatpush1.msra.mxu1 %v1137_v16  ;;  %v1105_v42 = vld [vmem:[#allocation7 + $0x800] sm:$0xff] }
  0xed   :  { %1464 = vmatpush1.msra.mxu0 %v865_v43  ;;  %1538 = vmatprep.subr.mxu1 %v1130_v30  ;;  %v993_v43 = vld [vmem:[#allocation7 + $0x480] sm:$0xff] }
  0xee   :  { %1465 = vmatprep.subr.mxu0 %v858_v44  ;;  %1539 = vmatpush1.msra.mxu1 %v1129_v20  ;;  %v1354_v44 = vld [vmem:[#allocation7 + $0xfc8] sm:$0xff]  ;;  %v1289_v6 = vld [vmem:[#allocation7 + $0xdc0] sm:$0xff] }
  0xef   :  { %1466 = vmatpush1.msra.mxu0 %v857_v45  ;;  %1540 = vmatprep.subr.mxu1 %v1122_v32  ;;  %v986_v45 = vld [vmem:[#allocation7 + $0x448] sm:$0xff]  ;;  %v1281_v8 = vld [vmem:[#allocation7 + $0xd80] sm:$0xff] }
  0xf0   :  { %1467 = vmatprep.subr.mxu0 %v850_v48  ;;  %1541 = vmatpush1.msra.mxu1 %v1121_v34  ;;  %v978_v48 = vld [vmem:[#allocation7 + $0x408] sm:$0xff]  ;;  %v1273_v11 = vld [vmem:[#allocation7 + $0xd40] sm:$0xff] }
  0xf1   :  { %1468 = vmatpush1.msra.mxu0 %v849_v50  ;;  %1542 = vmatprep.subr.mxu1 %v1114_v36  ;;  %v1346_v50 = vld [vmem:[#allocation7 + $0xf88] sm:$0xff]  ;;  %v1265_v14 = vld [vmem:[#allocation7 + $0xd00] sm:$0xff] }
  0xf2   :  { %1469 = vmatprep.subr.mxu0 %v1098_v52  ;;  %1543 = vmatpush1.msra.mxu1 %v1113_v38  ;;  %v1345_v52 = vld [vmem:[#allocation7 + $0xf80] sm:$0xff] }
  0xf3   :  { %1470 = vmatpush2.msra.mxu0 %v1097_v53  ;;  %1544 = vmatprep.subr.mxu1 %v1106_v40  ;;  %v1338_v53 = vld [vmem:[#allocation7 + $0xf48] sm:$0xff]  ;;  %v1257_v17 = vld [vmem:[#allocation7 + $0xcc0] sm:$0xff] }
  0xf4   :  { %1471 = vmatprep.subr.mxu0 %v1090_v55  ;;  %1545 = vmatpush1.msra.mxu1 %v1105_v42  ;;  %v1330_v55 = vld [vmem:[#allocation7 + $0xf08] sm:$0xff]  ;;  %v1249_v19 = vld [vmem:[#allocation7 + $0xc80] sm:$0xff] }
  0xf5   :  { %1472 = vmatpush2.msra.mxu0 %v1089_v58  ;;  %1546 = vmatprep.subr.mxu1 %v1354_v44  ;;  %v1321_v58 = vld [vmem:[#allocation7 + $0xec0] sm:$0xff] }
  0xf6   :  { %1473 = vmatprep.subr.mxu0 %v1082_v60  ;;  %1547 = vmatpush2.msra.mxu1 %v1353_v46  ;;  %v1313_v60 = vld [vmem:[#allocation7 + $0xe80] sm:$0xff] }
  0xf7   :  { %1474 = vmatpush2.msra.mxu0 %v1081_v0  ;;  %1548 = vmatprep.subr.mxu1 %v1346_v50  ;;  %v1298_v0 = vld [vmem:[#allocation7 + $0xe08] sm:$0xff]  ;;  %v1241_v22 = vld [vmem:[#allocation7 + $0xc40] sm:$0xff] }
  0xf8   :  { %1475 = vmatprep.subr.mxu0 %v1074_v4  ;;  %1549 = vmatpush2.msra.mxu1 %v1345_v52  ;;  %v1290_v4 = vld [vmem:[#allocation7 + $0xdc8] sm:$0xff]  ;;  %v1233_v24 = vld [vmem:[#allocation7 + $0xc00] sm:$0xff] }
  0xf9   :  { %1476 = vmatpush2.msra.mxu0 %v1073_v7  ;;  %1550 = vmatprep.subr.mxu1 %v1338_v53  ;;  %v1282_v7 = vld [vmem:[#allocation7 + $0xd88] sm:$0xff] }
  0xfa   :  { %1477 = vmatprep.subr.mxu0 %v1066_v9  ;;  %1551 = vmatpush2.msra.mxu1 %v1337_v54  ;;  %v1274_v9 = vld [vmem:[#allocation7 + $0xd48] sm:$0xff] }
  0xfb   :  { %1478 = vmatpush2.msra.mxu0 %v1065_v12  ;;  %1552 = vmatprep.subr.mxu1 %v1330_v55  ;;  %v1266_v12 = vld [vmem:[#allocation7 + $0xd08] sm:$0xff] }
  0xfc   :  { %1479 = vmatprep.subr.mxu0 %v1058_v15  ;;  %1553 = vmatpush2.msra.mxu1 %v1329_v56  ;;  %v1258_v15 = vld [vmem:[#allocation7 + $0xcc8] sm:$0xff] }
  0xfd   :  { %1480 = vmatpush2.msra.mxu0 %v1057_v18  ;;  %1554 = vmatprep.subr.mxu1 %v1322_v57  ;;  %v1250_v18 = vld [vmem:[#allocation7 + $0xc88] sm:$0xff] }
  0xfe   :  { %1481 = vmatprep.subr.mxu0 %v1050_v21  ;;  %1555 = vmatpush2.msra.mxu1 %v1321_v58  ;;  %v1242_v21 = vld [vmem:[#allocation7 + $0xc48] sm:$0xff] }
  0xff   :  { %1482 = vmatpush2.msra.mxu0 %v1049_v23  ;;  %1556 = vmatprep.subr.mxu1 %v1314_v59  ;;  %v1234_v23 = vld [vmem:[#allocation7 + $0xc08] sm:$0xff] }
 0x100   :  { %1483 = vmatprep.subr.mxu0 %v1042_v25  ;;  %1557 = vmatpush2.msra.mxu1 %v1313_v60  ;;  %v1228_v25 = vld [vmem:[#allocation7 + $0xbd8] sm:$0xff] }
 0x101   :  { %1484 = vmatpush2.msra.mxu0 %v1041_v27  ;;  %1558 = vmatprep.subr.mxu1 %v1306_v61  ;;  %v378_v27 = vshrl.u32 %v377_v26, 7  ;;  %v948_v26 = vld [vmem:[#allocation7 + $0x318] sm:$0xff] }
 0x102   :  { %1485 = vmatprep.subr.mxu0 %v1034_v2  ;;  %1559 = vmatpush2.msra.mxu1 %v1305_v62  ;;  %v104_v2 = vld [vmem:[#allocation10] sm:$0x77] }
 0x103   :  { %1486 = vmatpush2.msra.mxu0 %v1033_v5  ;;  %1560 = vmatprep.subr.mxu1 %v1298_v0  ;;  %v3017_v63 = vsub.s32 0, %v378_v27  ;;  %v3019_v1 = vsub.s32 4, %v378_v27  ;;  %v3025_v44 = vsub.s32 1, %v378_v27 }
 0x104   :  { %1487 = vmatprep.subr.mxu0 %v1026_v10  ;;  %1561 = vmatpush2.msra.mxu1 %v1297_v3 }
 0x105   :  { %1488 = vmatpush2.msra.mxu0 %v1025_v29  ;;  %1562 = vmatprep.subr.mxu1 %v1290_v4  ;;  %v380_v5 = vrot.slane %v104_v2, %v3017_v63  ;;  %v384_v28 = vrot.slane %v104_v2, %v3019_v1  ;;  %v764_v50 = vrot.slane %v104_v2, %v3025_v44 }
 0x106   :  { %1489 = vmatprep.subr.mxu0 %v1018_v13  ;;  %1563 = vmatpush2.msra.mxu1 %v1289_v6 }
 0x107   :  { %1490 = vmatpush2.msra.mxu0 %v1017_v31  ;;  %1564 = vmatprep.subr.mxu1 %v1282_v7  ;;  %v400_v10 = vrot.slane %v380_v5, %v3017_v63  ;;  %v404_v16 = vrot.slane %v384_v28, %v3017_v63  ;;  %v784_v56 = vrot.slane %v764_v50, %v3025_v44  ;;  %v940_v28 = vld [vmem:[#allocation7 + $0x2d8] sm:$0xff]  ;;  %v851_v50 = vld [vmem:[#allocation7 + $0x10] sm:$0xff] }
 0x108   :  { %1491 = vmatprep.subr.mxu0 %v1010_v33  ;;  %1565 = vmatpush2.msra.mxu1 %v1281_v8 }
 0x109   :  { %1492 = vmatpush2.msra.mxu0 %v1009_v35  ;;  %1566 = vmatprep.subr.mxu1 %v1274_v9 }
 0x10a   :  { %1493 = vmatprep.subr.mxu0 %v1002_v37  ;;  %1567 = vmatpush2.msra.mxu1 %v1273_v11 }
 0x10b   :  { %1494 = vmatpush2.msra.mxu0 %v1001_v39  ;;  %1568 = vmatprep.subr.mxu1 %v1266_v12  ;;  %v971_v12 = vld [vmem:[#allocation7 + $0x3d0] sm:$0xff] }
 0x10c   :  { %1495 = vmatprep.subr.mxu0 %v994_v41  ;;  %1569 = vmatpush2.msra.mxu1 %v1265_v14 }
 0x10d   :  { %1496 = vmatpush2.msra.mxu0 %v993_v43  ;;  %1570 = vmatprep.subr.mxu1 %v1258_v15  ;;  %v964_v15 = vld [vmem:[#allocation7 + $0x398] sm:$0xff] }
 0x10e   :  { %1497 = vmatprep.subr.mxu0 %v986_v45  ;;  %1571 = vmatpush2.msra.mxu1 %v1257_v17 }
 0x10f   :  { %1498 = vmatpush2.msra.mxu0 %v985_v47  ;;  %1572 = vmatprep.subr.mxu1 %v1250_v18  ;;  %v3027_v47 = vsub.s32 5, %v378_v27 }
 0x110   :  { %1499 = vmatprep.subr.mxu0 %v978_v48  ;;  %1573 = vmatpush2.msra.mxu1 %v1249_v19  ;;  %v963_v19 = vld [vmem:[#allocation7 + $0x390] sm:$0xff] }
 0x111   :  { %1500 = vmatpush2.msra.mxu0 %v977_v49  ;;  %1574 = vmatprep.subr.mxu1 %v1242_v21  ;;  %v3029_v49 = vsub.s32 6, %v378_v27  ;;  %v768_v52 = vrot.slane %v104_v2, %v3027_v47 }
 0x112   :  { %1591 = vmatprep.subr.mxu0 %v972_v51  ;;  %1575 = vmatpush2.msra.mxu1 %v1241_v22  ;;  %v3032_v51 = vsub.s32 2, %v378_v27  ;;  %v956_v22 = vld [vmem:[#allocation7 + $0x358] sm:$0xff] }
 0x113   :  { %1576 = vmatprep.subr.mxu1 %v1234_v23  ;;  %v812_v54 = vrot.slane %v104_v2, %v3029_v49  ;;  %v788_v59 = vrot.slane %v768_v52, %v3025_v44  ;;  %v3054_v52 = vld [vmem:[#allocation10 + $0x8] sm:$0x77] }
 0x114   :  { %1577 = vmatpush2.msra.mxu1 %v1233_v24  ;;  %v808_v57 = vrot.slane %v104_v2, %v3032_v51  ;;  %v955_v24 = vld [vmem:[#allocation7 + $0x350] sm:$0xff] }
 0x115   :  { %1668 = vmatprep.subr.mxu1 %v1228_v25  ;;  %v832_v62 = vrot.slane %v812_v54, %v3032_v51  ;;  %v947_v2 = vld [vmem:[#allocation7 + $0x310] sm:$0xff] }
 0x116   :  { %v828_v3 = vrot.slane %v808_v57, %v3032_v51  ;;  %v1099_v54 = vld [vmem:[#allocation7 + $0x7d0] sm:$0xff] }
 0x117   :  { %v1091_v57 = vld [vmem:[#allocation7 + $0x790] sm:$0xff] }
 0x14c   :  { %v479_v29 = vpop.f32.mrf.mxu0 }
 0x14d   :  { %v480_v30 = vadd.f32 %v479_v29, %v400_v10  ;;  %v931_v29 = vld [vmem:[#allocation7 + $0x290] sm:$0xff] }
 0x14e   :  { %v556_v13 = vpop.f32.mrf.mxu1  ;;  %v481_v20 = vpop.f32.mrf.mxu0 }
 0x14f   :  { %v557_v31 = vadd.f32 %v556_v13, %v480_v30  ;;  %v482_v32 = vadd.f32 %v481_v20, %v404_v16  ;;  %v924_v30 = vld [vmem:[#allocation7 + $0x258] sm:$0xff]  ;;  %v923_v13 = vld [vmem:[#allocation7 + $0x250] sm:$0xff] }
 0x150   :  { %v558_v33 = vpop.f32.mrf.mxu1  ;;  %v916_v20 = vld [vmem:[#allocation7 + $0x218] sm:$0xff] }
 0x151   :  { %v729_v34 = vmul.f32 1.442695, %v557_v31  ;;  %v559_v35 = vadd.f32 %v558_v33, %v482_v32  ;;  %vm721_vm0 = vcmp.gt.f32.partialorder %v557_v31, 0.0  ;;  %v908_v32 = vld [vmem:[#allocation7 + $0x1d8] sm:$0xff]  ;;  %v907_v33 = vld [vmem:[#allocation7 + $0x1d0] sm:$0xff] }
 0x152   :  { %v485_v36 = vpop.f32.mrf.mxu0 }
 0x153   :  { %2700 = vpow2.f32 %v729_v34  ;;  %v731_v37 = vmul.f32 1.442695, %v559_v35  ;;  %v486_v38 = vadd.f32 %v485_v36, %v400_v10  ;;  %vm722_vm1 = vcmp.gt.f32.partialorder %v559_v35, 0.0  ;;  %v939_v10 = vld [vmem:[#allocation7 + $0x2d0] sm:$0xff]  ;;  %v900_v34 = vld [vmem:[#allocation7 + $0x198] sm:$0xff] }
 0x154   :  { %v487_v39 = vpop.f32.mrf.mxu0  ;;  %v892_v36 = vld [vmem:[#allocation7 + $0x158] sm:$0xff] }
 0x155   :  { %2702 = vpow2.f32 %v731_v37  ;;  %v488_v40 = vadd.f32 %v487_v39, %v404_v16  ;;  %v562_v41 = vpop.f32.mrf.mxu1  ;;  %v932_v16 = vld [vmem:[#allocation7 + $0x298] sm:$0xff]  ;;  %v891_v37 = vld [vmem:[#allocation7 + $0x150] sm:$0xff] }
 0x156   :  { %v563_v42 = vadd.f32 %v562_v41, %v486_v38  ;;  %v884_v38 = vld [vmem:[#allocation7 + $0x118] sm:$0xff]  ;;  %v883_v39 = vld [vmem:[#allocation7 + $0x110] sm:$0xff] }
 0x157   :  { %v564_v43 = vpop.f32.mrf.mxu1  ;;  %v875_v41 = vld [vmem:[#allocation7 + $0xd0] sm:$0xff] }
 0x158   :  { %v737_v45 = vmul.f32 1.442695, %v563_v42  ;;  %v565_v46 = vadd.f32 %v564_v43, %v488_v40  ;;  %vm725_vm2 = vcmp.gt.f32.partialorder %v563_v42, 0.0  ;;  %v876_v40 = vld [vmem:[#allocation7 + $0xd8] sm:$0xff]  ;;  %v867_v43 = vld [vmem:[#allocation7 + $0x90] sm:$0xff] }
 0x15a   :  { %2704 = vpow2.f32 %v737_v45  ;;  %v739_v48 = vmul.f32 1.442695, %v565_v46  ;;  %vm726_vm3 = vcmp.gt.f32.partialorder %v565_v46, 0.0  ;;  %v860_v45 = vld [vmem:[#allocation7 + $0x58] sm:$0xff] }
 0x15c   :  { %2706 = vpow2.f32 %v739_v48  ;;  %v852_v48 = vld [vmem:[#allocation7 + $0x18] sm:$0xff] }
 0x160   :  { %v2701_v53 = vpop.eup %2700 }
 0x161   :  { %v2607_v55 = vadd.f32 -1.0, %v2701_v53  ;;  %v1100_v53 = vld [vmem:[#allocation7 + $0x7d8] sm:$0xff] }
 0x162   :  { %v2703_v58 = vpop.eup %2702 }
 0x163   :  { %v753_v60 = vsel %vm721_vm0, %v557_v31, %v2607_v55  ;;  %v2608_v61 = vadd.f32 -1.0, %v2703_v58  ;;  %v915_v31 = vld [vmem:[#allocation7 + $0x210] sm:$0xff]  ;;  %v388_v55 = vrot.slane %v3054_v52, %v3017_v63  ;;  %v392_v58 = vrot.slane %v3054_v52, %v3019_v1 }
 0x164   :  { %v797_v0 = vmul.f32 %v784_v56, %v753_v60  ;;  %v1083_v60 = vld [vmem:[#allocation7 + $0x750] sm:$0xff] }
 0x165   :  { %v754_v4 = vsel %vm722_vm1, %v559_v35, %v2608_v61  ;;  %v899_v35 = vld [vmem:[#allocation7 + $0x190] sm:$0xff]  ;;  %v408_v61 = vrot.slane %v388_v55, %v3017_v63 }
 0x166   :  { %v798_v6 = vmul.f32 %v788_v59, %v754_v4  ;;  %v3043_v9 = vadd.f32 %v828_v3, %v797_v0  ;;  %v1075_v0 = vld [vmem:[#allocation7 + $0x710] sm:$0xff]  ;;  %v1068_v4 = vld [vmem:[#allocation7 + $0x6d8] sm:$0xff] }
 0x167   :  { %v2705_v7 = vpop.eup %2704 }
 0x168   :  { %v3041_v8 = vadd.f32 %v832_v62, %v798_v6  ;;  %v2611_v11 = vadd.f32 -1.0, %v2705_v7 }
 0x169   :  { %v2707_v14 = vpop.eup %2706 }
 0x16a   :  { %1501 = vmatprep.mubr.f32.mxu0 %v3041_v8  ;;  %v757_v17 = vsel %vm725_vm2, %v563_v42, %v2611_v11  ;;  %v2612_v18 = vadd.f32 -1.0, %v2707_v14  ;;  %v868_v42 = vld [vmem:[#allocation7 + $0x98] sm:$0xff]  ;;  %v1067_v11 = vld [vmem:[#allocation7 + $0x6d0] sm:$0xff] }
 0x16b   :  { %1502 = vmatmul.mubr.f32.vlgmr.msra.gmra.mxu0 %v3043_v9  ;;  %v801_v21 = vmul.f32 %v784_v56, %v757_v17  ;;  %v1092_v56 = vld [vmem:[#allocation7 + $0x798] sm:$0xff] }
 0x16c   :  { %1592 = vmatpush1.msra.mxu0 %v971_v12  ;;  %v758_v23 = vsel %vm726_vm3, %v565_v46, %v2612_v18  ;;  %v859_v46 = vld [vmem:[#allocation7 + $0x50] sm:$0xff]  ;;  %v1060_v14 = vld [vmem:[#allocation7 + $0x698] sm:$0xff] }
 0x16d   :  { %1593 = vmatprep.subr.mxu0 %v964_v15  ;;  %v802_v25 = vmul.f32 %v788_v59, %v758_v23  ;;  %v3047_v27 = vadd.f32 %v828_v3, %v801_v21  ;;  %v1084_v59 = vld [vmem:[#allocation7 + $0x758] sm:$0xff]  ;;  %v412_v3 = vrot.slane %v392_v58, %v3017_v63  ;;  %v1059_v18 = vld [vmem:[#allocation7 + $0x690] sm:$0xff] }
 0x16e   :  { %1594 = vmatpush1.msra.mxu0 %v963_v19 }
 0x16f   :  { %1595 = vmatprep.subr.mxu0 %v956_v22  ;;  %v3049_v5 = vadd.f32 %v832_v62, %v802_v25  ;;  %v1076_v62 = vld [vmem:[#allocation7 + $0x718] sm:$0xff]  ;;  %v1051_v25 = vld [vmem:[#allocation7 + $0x650] sm:$0xff] }
 0x170   :  { %1596 = vmatpush1.msra.mxu0 %v955_v24  ;;  %v1052_v22 = vld [vmem:[#allocation7 + $0x658] sm:$0xff] }
 0x171   :  { %1597 = vmatprep.subr.mxu0 %v948_v26  ;;  %1507 = vmatprep.mubr.f32.mxu0 %v3049_v5 }
 0x172   :  { %1598 = vmatpush1.msra.mxu0 %v947_v2 }
 0x173   :  { %1508 = vmatmul.mubr.f32.gmra.mxu0 %v3047_v27  ;;  %1599 = vmatprep.subr.mxu0 %v940_v28 }
 0x174   :  { %1655 = vmatprep.mubr.f32.mxu0 %v3041_v8  ;;  %1600 = vmatpush1.msra.mxu0 %v939_v10  ;;  %v1044_v10 = vld [vmem:[#allocation7 + $0x618] sm:$0xff] }
 0x175   :  { %1601 = vmatprep.subr.mxu0 %v932_v16 }
 0x176   :  { %1602 = vmatpush1.msra.mxu0 %v931_v29 }
 0x177   :  { %1603 = vmatprep.subr.mxu0 %v924_v30  ;;  %v1043_v30 = vld [vmem:[#allocation7 + $0x610] sm:$0xff] }
 0x178   :  { %1604 = vmatpush1.msra.mxu0 %v923_v13 }
 0x179   :  { %1605 = vmatprep.subr.mxu0 %v916_v20 }
 0x17a   :  { %1606 = vmatpush1.msra.mxu0 %v915_v31  ;;  %v1036_v31 = vld [vmem:[#allocation7 + $0x5d8] sm:$0xff] }
 0x17b   :  { %1607 = vmatprep.subr.mxu0 %v908_v32 }
 0x17c   :  { %1608 = vmatpush1.msra.mxu0 %v907_v33  ;;  %v1035_v33 = vld [vmem:[#allocation7 + $0x5d0] sm:$0xff] }
 0x17d   :  { %1609 = vmatprep.subr.mxu0 %v900_v34 }
 0x17e   :  { %1610 = vmatpush1.msra.mxu0 %v899_v35  ;;  %v1028_v35 = vld [vmem:[#allocation7 + $0x598] sm:$0xff] }
 0x17f   :  { %1611 = vmatprep.subr.mxu0 %v892_v36 }
 0x180   :  { %1612 = vmatpush1.msra.mxu0 %v891_v37  ;;  %v1027_v37 = vld [vmem:[#allocation7 + $0x590] sm:$0xff] }
 0x181   :  { %1613 = vmatprep.subr.mxu0 %v884_v38 }
 0x182   :  { %1614 = vmatpush1.msra.mxu0 %v883_v39  ;;  %v1020_v39 = vld [vmem:[#allocation7 + $0x558] sm:$0xff] }
 0x183   :  { %1615 = vmatprep.subr.mxu0 %v876_v40  ;;  %v1019_v40 = vld [vmem:[#allocation7 + $0x550] sm:$0xff] }
 0x184   :  { %1616 = vmatpush1.msra.mxu0 %v875_v41  ;;  %v1012_v41 = vld [vmem:[#allocation7 + $0x518] sm:$0xff] }
 0x185   :  { %1617 = vmatprep.subr.mxu0 %v868_v42  ;;  %v1011_v42 = vld [vmem:[#allocation7 + $0x510] sm:$0xff] }
 0x186   :  { %1618 = vmatpush1.msra.mxu0 %v867_v43  ;;  %v1004_v43 = vld [vmem:[#allocation7 + $0x4d8] sm:$0xff] }
 0x187   :  { %1619 = vmatprep.subr.mxu0 %v860_v45  ;;  %v1003_v45 = vld [vmem:[#allocation7 + $0x4d0] sm:$0xff] }
 0x188   :  { %1620 = vmatpush1.msra.mxu0 %v859_v46  ;;  %v772_v46 = vrot.slane %v3054_v52, %v3025_v44 }
 0x189   :  { %1621 = vmatprep.subr.mxu0 %v852_v48  ;;  %v996_v48 = vld [vmem:[#allocation7 + $0x498] sm:$0xff] }
 0x18a   :  { %1622 = vmatpush1.msra.mxu0 %v851_v50  ;;  %v776_v50 = vrot.slane %v3054_v52, %v3027_v47 }
 0x18b   :  { %1623 = vmatprep.subr.mxu0 %v1100_v53  ;;  %v995_v53 = vld [vmem:[#allocation7 + $0x490] sm:$0xff] }
 0x18c   :  { %1624 = vmatpush2.msra.mxu0 %v1099_v54  ;;  %v988_v54 = vld [vmem:[#allocation7 + $0x458] sm:$0xff] }
 0x18d   :  { %1625 = vmatprep.subr.mxu0 %v1092_v56  ;;  %v987_v56 = vld [vmem:[#allocation7 + $0x450] sm:$0xff] }
 0x18e   :  { %1626 = vmatpush2.msra.mxu0 %v1091_v57  ;;  %v820_v57 = vrot.slane %v3054_v52, %v3029_v49 }
 0x18f   :  { %1627 = vmatprep.subr.mxu0 %v1084_v59  ;;  %v792_v59 = vrot.slane %v772_v46, %v3025_v44  ;;  %v934_v46 = vld [vmem:[#allocation7 + $0x2a8] sm:$0xff] }
 0x190   :  { %1628 = vmatpush2.msra.mxu0 %v1083_v60  ;;  %v633_v6 = vpop.f32.mrf.mxu0  ;;  %v816_v60 = vrot.slane %v3054_v52, %v3032_v51  ;;  %v973_v52 = vld [vmem:[#allocation7 + $0x3e0] sm:$0xff] }
 0x191   :  { %v710_v7 = vpop.f32.mrf.mxu1  ;;  %1629 = vmatprep.subr.mxu0 %v1076_v62  ;;  %v634_v12 = vadd.f32 %v633_v6, %v408_v61 }
 0x192   :  { %1630 = vmatpush2.msra.mxu0 %v1075_v0  ;;  %v635_v15 = vpop.f32.mrf.mxu0  ;;  %v796_v0 = vrot.slane %v776_v50, %v3025_v44  ;;  %v933_v50 = vld [vmem:[#allocation7 + $0x2a0] sm:$0xff] }
 0x193   :  { %v712_v17 = vpop.f32.mrf.mxu1  ;;  %1631 = vmatprep.subr.mxu0 %v1068_v4  ;;  %v3062_v19 = vadd.f32 %v710_v7, %v634_v12  ;;  %v636_v21 = vadd.f32 %v635_v15, %v412_v3  ;;  %v974_v7 = vld [vmem:[#allocation7 + $0x3e8] sm:$0xff]  ;;  %v836_v15 = vrot.slane %v816_v60, %v3032_v51  ;;  %v917_v60 = vld [vmem:[#allocation7 + $0x220] sm:$0xff] }
 0x194   :  { %1632 = vmatpush2.msra.mxu0 %v1067_v11  ;;  %v639_v23 = vpop.f32.mrf.mxu0  ;;  %v840_v11 = vrot.slane %v820_v57, %v3032_v51  ;;  %v1172_v57 = vld [vmem:[#allocation7 + $0xa18] sm:$0xff] }
 0x195   :  { %v716_v24 = vpop.f32.mrf.mxu1  ;;  %1633 = vmatprep.subr.mxu0 %v1060_v14  ;;  %v733_v26 = vmul.f32 1.442695, %v3062_v19  ;;  %v3065_v2 = vadd.f32 %v712_v17, %v636_v21  ;;  %v640_v28 = vadd.f32 %v639_v23, %v408_v61  ;;  %v980_v61 = vld [vmem:[#allocation7 + $0x418] sm:$0xff]  ;;  %vm723_vm4 = vcmp.gt.f32.partialorder %v3062_v19, 0.0  ;;  %v965_v23 = vld [vmem:[#allocation7 + $0x3a0] sm:$0xff] }
 0x196   :  { %1634 = vmatpush2.msra.mxu0 %v1059_v18  ;;  %v641_v16 = vpop.f32.mrf.mxu0  ;;  %v966_v18 = vld [vmem:[#allocation7 + $0x3a8] sm:$0xff] }
 0x197   :  { %v718_v29 = vpop.f32.mrf.mxu1  ;;  %1635 = vmatprep.subr.mxu0 %v1052_v22  ;;  %2708 = vpow2.f32 %v733_v26  ;;  %v735_v13 = vmul.f32 1.442695, %v3065_v2  ;;  %v642_v20 = vadd.f32 %v641_v16, %v412_v3  ;;  %v3068_v32 = vadd.f32 %v716_v24, %v640_v28  ;;  %v979_v3 = vld [vmem:[#allocation7 + $0x410] sm:$0xff] }
 0x198   :  { %1636 = vmatpush2.msra.mxu0 %v1051_v25  ;;  %vm724_vm5 = vcmp.gt.f32.partialorder %v3065_v2, 0.0 }
 0x199   :  { %1637 = vmatprep.subr.mxu0 %v1044_v10  ;;  %2710 = vpow2.f32 %v735_v13  ;;  %v3070_v34 = vadd.f32 %v718_v29, %v642_v20  ;;  %v741_v36 = vmul.f32 1.442695, %v3068_v32  ;;  %vm727_vm6 = vcmp.gt.f32.partialorder %v3068_v32, 0.0  ;;  %v1227_v29 = vld [vmem:[#allocation7 + $0xbd0] sm:$0xff]  ;;  %v1220_v20 = vld [vmem:[#allocation7 + $0xb98] sm:$0xff] }
 0x19a   :  { %1638 = vmatpush2.msra.mxu0 %v1043_v30  ;;  %v957_v30 = vld [vmem:[#allocation7 + $0x360] sm:$0xff] }
 0x19b   :  { %1639 = vmatprep.subr.mxu0 %v1036_v31  ;;  %v743_v38 = vmul.f32 1.442695, %v3070_v34  ;;  %2712 = vpow2.f32 %v741_v36  ;;  %vm728_vm7 = vcmp.gt.f32.partialorder %v3070_v34, 0.0  ;;  %v1219_v31 = vld [vmem:[#allocation7 + $0xb90] sm:$0xff]  ;;  %v1204_v36 = vld [vmem:[#allocation7 + $0xb18] sm:$0xff] }
 0x19c   :  { %1640 = vmatpush2.msra.mxu0 %v1035_v33 }
 0x19d   :  { %1641 = vmatprep.subr.mxu0 %v1028_v35  ;;  %2714 = vpow2.f32 %v743_v38  ;;  %v1212_v35 = vld [vmem:[#allocation7 + $0xb58] sm:$0xff]  ;;  %v1203_v38 = vld [vmem:[#allocation7 + $0xb10] sm:$0xff] }
 0x19e   :  { %1642 = vmatpush2.msra.mxu0 %v1027_v37  ;;  %v950_v37 = vld [vmem:[#allocation7 + $0x328] sm:$0xff] }
 0x19f   :  { %1643 = vmatprep.subr.mxu0 %v1020_v39  ;;  %v949_v39 = vld [vmem:[#allocation7 + $0x320] sm:$0xff] }
 0x1a0   :  { %1644 = vmatpush2.msra.mxu0 %v1019_v40  ;;  %v1196_v40 = vld [vmem:[#allocation7 + $0xad8] sm:$0xff] }
 0x1a1   :  { %1645 = vmatprep.subr.mxu0 %v1012_v41  ;;  %v942_v41 = vld [vmem:[#allocation7 + $0x2e8] sm:$0xff] }
 0x1a2   :  { %1646 = vmatpush2.msra.mxu0 %v1011_v42  ;;  %v1195_v42 = vld [vmem:[#allocation7 + $0xad0] sm:$0xff] }
 0x1a3   :  { %1647 = vmatprep.subr.mxu0 %v1004_v43  ;;  %v941_v43 = vld [vmem:[#allocation7 + $0x2e0] sm:$0xff] }
 0x1a4   :  { %1648 = vmatpush2.msra.mxu0 %v1003_v45  ;;  %v2709_v55 = vpop.eup %2708  ;;  %v1188_v45 = vld [vmem:[#allocation7 + $0xa98] sm:$0xff] }
 0x1a5   :  { %1649 = vmatprep.subr.mxu0 %v996_v48  ;;  %v2609_v58 = vadd.f32 -1.0, %v2709_v55  ;;  %v1187_v48 = vld [vmem:[#allocation7 + $0xa90] sm:$0xff] }
 0x1a6   :  { %1650 = vmatpush2.msra.mxu0 %v995_v53  ;;  %v2711_v62 = vpop.eup %2710  ;;  %v1180_v53 = vld [vmem:[#allocation7 + $0xa58] sm:$0xff]  ;;  %v1179_v55 = vld [vmem:[#allocation7 + $0xa50] sm:$0xff] }
 0x1a7   :  { %1651 = vmatprep.subr.mxu0 %v988_v54  ;;  %v755_v4 = vsel %vm723_vm4, %v3062_v19, %v2609_v58  ;;  %v2610_v6 = vadd.f32 -1.0, %v2711_v62  ;;  %v926_v54 = vld [vmem:[#allocation7 + $0x268] sm:$0xff] }
 0x1a8   :  { %1652 = vmatpush2.msra.mxu0 %v987_v56  ;;  %v2713_v12 = vpop.eup %2712  ;;  %v799_v14 = vmul.f32 %v792_v59, %v755_v4  ;;  %v925_v56 = vld [vmem:[#allocation7 + $0x260] sm:$0xff]  ;;  %v918_v58 = vld [vmem:[#allocation7 + $0x228] sm:$0xff]  ;;  %v1156_v4 = vld [vmem:[#allocation7 + $0x998] sm:$0xff] }
 0x1a9   :  { %1653 = vmatprep.subr.mxu0 %v980_v61  ;;  %v756_v17 = vsel %vm724_vm5, %v3065_v2, %v2610_v6  ;;  %v2613_v22 = vadd.f32 -1.0, %v2713_v12  ;;  %v958_v2 = vld [vmem:[#allocation7 + $0x368] sm:$0xff]  ;;  %v1164_v61 = vld [vmem:[#allocation7 + $0x9d8] sm:$0xff] }
 0x1aa   :  { %1654 = vmatpush2.msra.mxu0 %v979_v3  ;;  %v2715_v19 = vpop.eup %2714  ;;  %v800_v21 = vmul.f32 %v796_v0, %v756_v17  ;;  %v3097_v28 = vadd.f32 %v836_v15, %v799_v14  ;;  %v910_v62 = vld [vmem:[#allocation7 + $0x1e8] sm:$0xff]  ;;  %v909_v3 = vld [vmem:[#allocation7 + $0x1e0] sm:$0xff]  ;;  %v1147_v14 = vld [vmem:[#allocation7 + $0x950] sm:$0xff] }
 0x1ab   :  { %1656 = vmatmul.mubr.f32.vlgmr.msra.gmra.mxu0 %v3043_v9  ;;  %1745 = vmatprep.subr.mxu0 %v974_v7  ;;  %v2614_v24 = vadd.f32 -1.0, %v2715_v19  ;;  %v759_v25 = vsel %vm727_vm6, %v3068_v32, %v2613_v22  ;;  %v902_v6 = vld [vmem:[#allocation7 + $0x1a8] sm:$0xff]  ;;  %v1155_v7 = vld [vmem:[#allocation7 + $0x990] sm:$0xff]  ;;  %v1140_v17 = vld [vmem:[#allocation7 + $0x918] sm:$0xff] }
 0x1ac   :  { %1661 = vmatprep.mubr.f32.mxu0 %v3049_v5  ;;  %1746 = vmatpush1.msra.mxu0 %v973_v52  ;;  %v3095_v26 = vadd.f32 %v840_v11, %v800_v21  ;;  %v803_v10 = vmul.f32 %v792_v59, %v759_v25  ;;  %v1171_v59 = vld [vmem:[#allocation7 + $0xa10] sm:$0xff]  ;;  %v1148_v52 = vld [vmem:[#allocation7 + $0x958] sm:$0xff]  ;;  %v894_v12 = vld [vmem:[#allocation7 + $0x168] sm:$0xff] }
 0x1ad   :  { %1747 = vmatprep.subr.mxu0 %v966_v18  ;;  %v760_v16 = vsel %vm728_vm7, %v3070_v34, %v2614_v24  ;;  %v1211_v34 = vld [vmem:[#allocation7 + $0xb50] sm:$0xff]  ;;  %v886_v18 = vld [vmem:[#allocation7 + $0x128] sm:$0xff]  ;;  %v885_v21 = vld [vmem:[#allocation7 + $0x120] sm:$0xff] }
 0x1ae   :  { %1748 = vmatpush1.msra.mxu0 %v965_v23  ;;  %v804_v13 = vmul.f32 %v796_v0, %v760_v16  ;;  %1578 = vmatprep.mubr.f32.mxu1 %v3095_v26  ;;  %v3103_v32 = vadd.f32 %v836_v15, %v803_v10  ;;  %v1163_v0 = vld [vmem:[#allocation7 + $0x9d0] sm:$0xff]  ;;  %v893_v15 = vld [vmem:[#allocation7 + $0x160] sm:$0xff]  ;;  %v1132_v22 = vld [vmem:[#allocation7 + $0x8d8] sm:$0xff] }
 0x1af   :  { %1662 = vmatmul.mubr.f32.gmra.mxu0 %v3047_v27  ;;  %1579 = vmatmul.mubr.f32.vlgmr.msra.gmra.mxu1 %v3097_v28  ;;  %v1139_v19 = vld [vmem:[#allocation7 + $0x910] sm:$0xff]  ;;  %v878_v23 = vld [vmem:[#allocation7 + $0xe8] sm:$0xff]  ;;  %v877_v25 = vld [vmem:[#allocation7 + $0xe0] sm:$0xff] }
 0x1b0   :  { %1749 = vmatprep.subr.mxu0 %v958_v2  ;;  %1669 = vmatpush1.msra.mxu1 %v1227_v29  ;;  %v3105_v33 = vadd.f32 %v840_v11, %v804_v13  ;;  %v901_v11 = vld [vmem:[#allocation7 + $0x1a0] sm:$0xff]  ;;  %v1131_v24 = vld [vmem:[#allocation7 + $0x8d0] sm:$0xff]  ;;  %v1124_v2 = vld [vmem:[#allocation7 + $0x898] sm:$0xff] }
 0x1b1   :  { %1750 = vmatpush1.msra.mxu0 %v957_v30  ;;  %1670 = vmatprep.subr.mxu1 %v1220_v20  ;;  %v870_v10 = vld [vmem:[#allocation7 + $0xa8] sm:$0xff]  ;;  %v1123_v16 = vld [vmem:[#allocation7 + $0x890] sm:$0xff]  ;;  %v869_v29 = vld [vmem:[#allocation7 + $0xa0] sm:$0xff] }
 0x1b2   :  { %1809 = vmatprep.mubr.f32.mxu0 %v3041_v8  ;;  %1671 = vmatpush1.msra.mxu1 %v1219_v31  ;;  %v1116_v30 = vld [vmem:[#allocation7 + $0x858] sm:$0xff]  ;;  %v862_v13 = vld [vmem:[#allocation7 + $0x68] sm:$0xff]  ;;  %v1115_v20 = vld [vmem:[#allocation7 + $0x850] sm:$0xff] }
 0x1b3   :  { %1584 = vmatprep.mubr.f32.mxu1 %v3105_v33  ;;  %1672 = vmatprep.subr.mxu1 %v1212_v35  ;;  %v861_v31 = vld [vmem:[#allocation7 + $0x60] sm:$0xff]  ;;  %v1108_v35 = vld [vmem:[#allocation7 + $0x818] sm:$0xff] }
 0x1b4   :  { %1585 = vmatmul.mubr.f32.gmra.mxu1 %v3103_v32  ;;  %1751 = vmatprep.subr.mxu0 %v950_v37  ;;  %v853_v37 = vld [vmem:[#allocation7 + $0x20] sm:$0xff] }
 0x1b5   :  { %1673 = vmatpush1.msra.mxu1 %v1211_v34  ;;  %1732 = vmatprep.mubr.f32.mxu1 %v3095_v26  ;;  %v854_v34 = vld [vmem:[#allocation7 + $0x28] sm:$0xff] }
 0x1b6   :  { %1674 = vmatprep.subr.mxu1 %v1204_v36  ;;  %1752 = vmatpush1.msra.mxu0 %v949_v39  ;;  %v1107_v36 = vld [vmem:[#allocation7 + $0x810] sm:$0xff]  ;;  %v1102_v39 = vld [vmem:[#allocation7 + $0x7e8] sm:$0xff] }
 0x1b7   :  { %1675 = vmatpush1.msra.mxu1 %v1203_v38  ;;  %1753 = vmatprep.subr.mxu0 %v942_v41  ;;  %v1356_v38 = vld [vmem:[#allocation7 + $0xfd8] sm:$0xff]  ;;  %v1101_v41 = vld [vmem:[#allocation7 + $0x7e0] sm:$0xff] }
 0x1b8   :  { %1676 = vmatprep.subr.mxu1 %v1196_v40  ;;  %1754 = vmatpush1.msra.mxu0 %v941_v43  ;;  %v1355_v40 = vld [vmem:[#allocation7 + $0xfd0] sm:$0xff]  ;;  %v1094_v43 = vld [vmem:[#allocation7 + $0x7a8] sm:$0xff] }
 0x1b9   :  { %1677 = vmatpush1.msra.mxu1 %v1195_v42  ;;  %1755 = vmatprep.subr.mxu0 %v934_v46  ;;  %v1348_v42 = vld [vmem:[#allocation7 + $0xf98] sm:$0xff]  ;;  %v1093_v46 = vld [vmem:[#allocation7 + $0x7a0] sm:$0xff] }
 0x1ba   :  { %1678 = vmatprep.subr.mxu1 %v1188_v45  ;;  %1756 = vmatpush1.msra.mxu0 %v933_v50  ;;  %v1347_v45 = vld [vmem:[#allocation7 + $0xf90] sm:$0xff]  ;;  %v1086_v50 = vld [vmem:[#allocation7 + $0x768] sm:$0xff] }
 0x1bb   :  { %1679 = vmatpush1.msra.mxu1 %v1187_v48  ;;  %1757 = vmatprep.subr.mxu0 %v926_v54  ;;  %v1340_v48 = vld [vmem:[#allocation7 + $0xf58] sm:$0xff]  ;;  %v1085_v54 = vld [vmem:[#allocation7 + $0x760] sm:$0xff] }
 0x1bc   :  { %1680 = vmatprep.subr.mxu1 %v1180_v53  ;;  %1758 = vmatpush1.msra.mxu0 %v925_v56  ;;  %v1339_v53 = vld [vmem:[#allocation7 + $0xf50] sm:$0xff]  ;;  %v1078_v56 = vld [vmem:[#allocation7 + $0x728] sm:$0xff] }
 0x1bd   :  { %1681 = vmatpush1.msra.mxu1 %v1179_v55  ;;  %1759 = vmatprep.subr.mxu0 %v918_v58  ;;  %v1332_v55 = vld [vmem:[#allocation7 + $0xf18] sm:$0xff]  ;;  %v1077_v58 = vld [vmem:[#allocation7 + $0x720] sm:$0xff] }
 0x1be   :  { %1682 = vmatprep.subr.mxu1 %v1172_v57  ;;  %1760 = vmatpush1.msra.mxu0 %v917_v60  ;;  %v1331_v57 = vld [vmem:[#allocation7 + $0xf10] sm:$0xff]  ;;  %v1070_v60 = vld [vmem:[#allocation7 + $0x6e8] sm:$0xff] }
 0x1bf   :  { %1683 = vmatpush1.msra.mxu1 %v1171_v59  ;;  %1761 = vmatprep.subr.mxu0 %v910_v62  ;;  %v1324_v59 = vld [vmem:[#allocation7 + $0xed8] sm:$0xff]  ;;  %v1069_v62 = vld [vmem:[#allocation7 + $0x6e0] sm:$0xff] }
 0x1c0   :  { %1684 = vmatprep.subr.mxu1 %v1164_v61  ;;  %1762 = vmatpush1.msra.mxu0 %v909_v3  ;;  %v1323_v61 = vld [vmem:[#allocation7 + $0xed0] sm:$0xff]  ;;  %v1062_v3 = vld [vmem:[#allocation7 + $0x6a8] sm:$0xff] }
 0x1c1   :  { %1685 = vmatpush1.msra.mxu1 %v1163_v0  ;;  %1763 = vmatprep.subr.mxu0 %v902_v6  ;;  %v1316_v0 = vld [vmem:[#allocation7 + $0xe98] sm:$0xff]  ;;  %v1061_v6 = vld [vmem:[#allocation7 + $0x6a0] sm:$0xff] }
 0x1c2   :  { %1686 = vmatprep.subr.mxu1 %v1156_v4  ;;  %1764 = vmatpush1.msra.mxu0 %v901_v11  ;;  %v1315_v4 = vld [vmem:[#allocation7 + $0xe90] sm:$0xff]  ;;  %v1054_v11 = vld [vmem:[#allocation7 + $0x668] sm:$0xff] }
 0x1c3   :  { %1687 = vmatpush1.msra.mxu1 %v1155_v7  ;;  %1765 = vmatprep.subr.mxu0 %v894_v12  ;;  %v1308_v7 = vld [vmem:[#allocation7 + $0xe58] sm:$0xff]  ;;  %v1053_v12 = vld [vmem:[#allocation7 + $0x660] sm:$0xff] }
 0x1c4   :  { %1688 = vmatprep.subr.mxu1 %v1148_v52  ;;  %1766 = vmatpush1.msra.mxu0 %v893_v15  ;;  %v1307_v52 = vld [vmem:[#allocation7 + $0xe50] sm:$0xff]  ;;  %v1046_v15 = vld [vmem:[#allocation7 + $0x628] sm:$0xff] }
 0x1c5   :  { %1689 = vmatpush1.msra.mxu1 %v1147_v14  ;;  %1767 = vmatprep.subr.mxu0 %v886_v18  ;;  %v1300_v14 = vld [vmem:[#allocation7 + $0xe18] sm:$0xff]  ;;  %v1045_v18 = vld [vmem:[#allocation7 + $0x620] sm:$0xff] }
 0x1c6   :  { %1690 = vmatprep.subr.mxu1 %v1140_v17  ;;  %1768 = vmatpush1.msra.mxu0 %v885_v21  ;;  %v1299_v17 = vld [vmem:[#allocation7 + $0xe10] sm:$0xff]  ;;  %v1038_v21 = vld [vmem:[#allocation7 + $0x5e8] sm:$0xff] }
 0x1c7   :  { %1691 = vmatpush1.msra.mxu1 %v1139_v19  ;;  %1769 = vmatprep.subr.mxu0 %v878_v23  ;;  %v1292_v19 = vld [vmem:[#allocation7 + $0xdd8] sm:$0xff]  ;;  %v1037_v23 = vld [vmem:[#allocation7 + $0x5e0] sm:$0xff] }
 0x1c8   :  { %1692 = vmatprep.subr.mxu1 %v1132_v22  ;;  %1770 = vmatpush1.msra.mxu0 %v877_v25  ;;  %v1291_v22 = vld [vmem:[#allocation7 + $0xdd0] sm:$0xff]  ;;  %v1030_v25 = vld [vmem:[#allocation7 + $0x5a8] sm:$0xff] }
 0x1c9   :  { %1693 = vmatpush1.msra.mxu1 %v1131_v24  ;;  %1771 = vmatprep.subr.mxu0 %v870_v10  ;;  %v1284_v24 = vld [vmem:[#allocation7 + $0xd98] sm:$0xff]  ;;  %v1029_v10 = vld [vmem:[#allocation7 + $0x5a0] sm:$0xff] }
 0x1ca   :  { %1694 = vmatprep.subr.mxu1 %v1124_v2  ;;  %1772 = vmatpush1.msra.mxu0 %v869_v29  ;;  %v1283_v2 = vld [vmem:[#allocation7 + $0xd90] sm:$0xff]  ;;  %v1022_v29 = vld [vmem:[#allocation7 + $0x568] sm:$0xff] }
 0x1cb   :  { %1695 = vmatpush1.msra.mxu1 %v1123_v16  ;;  %1773 = vmatprep.subr.mxu0 %v862_v13  ;;  %v1276_v16 = vld [vmem:[#allocation7 + $0xd58] sm:$0xff]  ;;  %v1021_v13 = vld [vmem:[#allocation7 + $0x560] sm:$0xff] }
 0x1cc   :  { %1696 = vmatprep.subr.mxu1 %v1116_v30  ;;  %1774 = vmatpush1.msra.mxu0 %v861_v31  ;;  %v1275_v30 = vld [vmem:[#allocation7 + $0xd50] sm:$0xff]  ;;  %v1014_v31 = vld [vmem:[#allocation7 + $0x528] sm:$0xff] }
 0x1cd   :  { %1697 = vmatpush1.msra.mxu1 %v1115_v20  ;;  %1775 = vmatprep.subr.mxu0 %v854_v34  ;;  %v1268_v20 = vld [vmem:[#allocation7 + $0xd18] sm:$0xff]  ;;  %v1013_v34 = vld [vmem:[#allocation7 + $0x520] sm:$0xff] }
 0x1ce   :  { %1698 = vmatprep.subr.mxu1 %v1108_v35  ;;  %1776 = vmatpush1.msra.mxu0 %v853_v37  ;;  %v1267_v35 = vld [vmem:[#allocation7 + $0xd10] sm:$0xff]  ;;  %v1006_v37 = vld [vmem:[#allocation7 + $0x4e8] sm:$0xff] }
 0x1cf   :  { %1699 = vmatpush1.msra.mxu1 %v1107_v36  ;;  %1777 = vmatprep.subr.mxu0 %v1102_v39  ;;  %v1260_v36 = vld [vmem:[#allocation7 + $0xcd8] sm:$0xff]  ;;  %v1005_v39 = vld [vmem:[#allocation7 + $0x4e0] sm:$0xff] }
 0x1d0   :  { %1700 = vmatprep.subr.mxu1 %v1356_v38  ;;  %1778 = vmatpush2.msra.mxu0 %v1101_v41  ;;  %v1259_v38 = vld [vmem:[#allocation7 + $0xcd0] sm:$0xff]  ;;  %v998_v41 = vld [vmem:[#allocation7 + $0x4a8] sm:$0xff] }
 0x1d1   :  { %1701 = vmatpush2.msra.mxu1 %v1355_v40  ;;  %1779 = vmatprep.subr.mxu0 %v1094_v43  ;;  %v1252_v40 = vld [vmem:[#allocation7 + $0xc98] sm:$0xff]  ;;  %v997_v43 = vld [vmem:[#allocation7 + $0x4a0] sm:$0xff] }
 0x1d2   :  { %1702 = vmatprep.subr.mxu1 %v1348_v42  ;;  %1780 = vmatpush2.msra.mxu0 %v1093_v46  ;;  %v1251_v42 = vld [vmem:[#allocation7 + $0xc90] sm:$0xff]  ;;  %v990_v46 = vld [vmem:[#allocation7 + $0x468] sm:$0xff] }
 0x1d3   :  { %1703 = vmatpush2.msra.mxu1 %v1347_v45  ;;  %1781 = vmatprep.subr.mxu0 %v1086_v50  ;;  %v1244_v45 = vld [vmem:[#allocation7 + $0xc58] sm:$0xff]  ;;  %v989_v50 = vld [vmem:[#allocation7 + $0x460] sm:$0xff] }
 0x1d4   :  { %1704 = vmatprep.subr.mxu1 %v1340_v48  ;;  %1782 = vmatpush2.msra.mxu0 %v1085_v54  ;;  %v1243_v48 = vld [vmem:[#allocation7 + $0xc50] sm:$0xff]  ;;  %v982_v54 = vld [vmem:[#allocation7 + $0x428] sm:$0xff] }
 0x1d5   :  { %1705 = vmatpush2.msra.mxu1 %v1339_v53  ;;  %1783 = vmatprep.subr.mxu0 %v1078_v56  ;;  %v1236_v53 = vld [vmem:[#allocation7 + $0xc18] sm:$0xff]  ;;  %v981_v56 = vld [vmem:[#allocation7 + $0x420] sm:$0xff] }
 0x1d6   :  { %1706 = vmatprep.subr.mxu1 %v1332_v55  ;;  %1784 = vmatpush2.msra.mxu0 %v1077_v58  ;;  %v1235_v55 = vld [vmem:[#allocation7 + $0xc10] sm:$0xff]  ;;  %v976_v58 = vld [vmem:[#allocation7 + $0x3f8] sm:$0xff] }
 0x1d7   :  { %1707 = vmatpush2.msra.mxu1 %v1331_v57  ;;  %1785 = vmatprep.subr.mxu0 %v1070_v60  ;;  %v1230_v57 = vld [vmem:[#allocation7 + $0xbe8] sm:$0xff]  ;;  %v975_v60 = vld [vmem:[#allocation7 + $0x3f0] sm:$0xff] }
 0x1d8   :  { %1708 = vmatprep.subr.mxu1 %v1324_v59  ;;  %1786 = vmatpush2.msra.mxu0 %v1069_v62  ;;  %v1229_v59 = vld [vmem:[#allocation7 + $0xbe0] sm:$0xff]  ;;  %v968_v62 = vld [vmem:[#allocation7 + $0x3b8] sm:$0xff] }
 0x1d9   :  { %1709 = vmatpush2.msra.mxu1 %v1323_v61  ;;  %1787 = vmatprep.subr.mxu0 %v1062_v3  ;;  %v1222_v61 = vld [vmem:[#allocation7 + $0xba8] sm:$0xff]  ;;  %v967_v3 = vld [vmem:[#allocation7 + $0x3b0] sm:$0xff] }
 0x1da   :  { %1710 = vmatprep.subr.mxu1 %v1316_v0  ;;  %1788 = vmatpush2.msra.mxu0 %v1061_v6  ;;  %v1221_v0 = vld [vmem:[#allocation7 + $0xba0] sm:$0xff]  ;;  %v960_v6 = vld [vmem:[#allocation7 + $0x378] sm:$0xff] }
 0x1db   :  { %1711 = vmatpush2.msra.mxu1 %v1315_v4  ;;  %1789 = vmatprep.subr.mxu0 %v1054_v11  ;;  %v1214_v4 = vld [vmem:[#allocation7 + $0xb68] sm:$0xff]  ;;  %v959_v11 = vld [vmem:[#allocation7 + $0x370] sm:$0xff] }
 0x1dc   :  { %1712 = vmatprep.subr.mxu1 %v1308_v7  ;;  %1790 = vmatpush2.msra.mxu0 %v1053_v12  ;;  %v1213_v7 = vld [vmem:[#allocation7 + $0xb60] sm:$0xff]  ;;  %v952_v12 = vld [vmem:[#allocation7 + $0x338] sm:$0xff] }
 0x1dd   :  { %1713 = vmatpush2.msra.mxu1 %v1307_v52  ;;  %1791 = vmatprep.subr.mxu0 %v1046_v15  ;;  %v1206_v52 = vld [vmem:[#allocation7 + $0xb28] sm:$0xff]  ;;  %v951_v15 = vld [vmem:[#allocation7 + $0x330] sm:$0xff] }
 0x1de   :  { %1714 = vmatprep.subr.mxu1 %v1300_v14  ;;  %1792 = vmatpush2.msra.mxu0 %v1045_v18  ;;  %v1205_v14 = vld [vmem:[#allocation7 + $0xb20] sm:$0xff]  ;;  %v944_v18 = vld [vmem:[#allocation7 + $0x2f8] sm:$0xff] }
 0x1df   :  { %1715 = vmatpush2.msra.mxu1 %v1299_v17  ;;  %1793 = vmatprep.subr.mxu0 %v1038_v21  ;;  %v1198_v17 = vld [vmem:[#allocation7 + $0xae8] sm:$0xff]  ;;  %v943_v21 = vld [vmem:[#allocation7 + $0x2f0] sm:$0xff] }
 0x1e0   :  { %1716 = vmatprep.subr.mxu1 %v1292_v19  ;;  %1794 = vmatpush2.msra.mxu0 %v1037_v23  ;;  %v1197_v19 = vld [vmem:[#allocation7 + $0xae0] sm:$0xff]  ;;  %v936_v23 = vld [vmem:[#allocation7 + $0x2b8] sm:$0xff] }
 0x1e1   :  { %1717 = vmatpush2.msra.mxu1 %v1291_v22  ;;  %1795 = vmatprep.subr.mxu0 %v1030_v25  ;;  %v1190_v22 = vld [vmem:[#allocation7 + $0xaa8] sm:$0xff]  ;;  %v935_v25 = vld [vmem:[#allocation7 + $0x2b0] sm:$0xff] }
 0x1e2   :  { %1718 = vmatprep.subr.mxu1 %v1284_v24  ;;  %1796 = vmatpush2.msra.mxu0 %v1029_v10  ;;  %v1189_v24 = vld [vmem:[#allocation7 + $0xaa0] sm:$0xff]  ;;  %v928_v10 = vld [vmem:[#allocation7 + $0x278] sm:$0xff] }
 0x1e3   :  { %1719 = vmatpush2.msra.mxu1 %v1283_v2  ;;  %1797 = vmatprep.subr.mxu0 %v1022_v29  ;;  %v1182_v2 = vld [vmem:[#allocation7 + $0xa68] sm:$0xff] }
 0x1e4   :  { %1720 = vmatprep.subr.mxu1 %v1276_v16  ;;  %1798 = vmatpush2.msra.mxu0 %v1021_v13  ;;  %v927_v16 = vld [vmem:[#allocation7 + $0x270] sm:$0xff]  ;;  %v1174_v29 = vld [vmem:[#allocation7 + $0xa28] sm:$0xff]  ;;  %v1173_v13 = vld [vmem:[#allocation7 + $0xa20] sm:$0xff] }
 0x1e5   :  { %1721 = vmatpush2.msra.mxu1 %v1275_v30  ;;  %1799 = vmatprep.subr.mxu0 %v1014_v31  ;;  %v920_v30 = vld [vmem:[#allocation7 + $0x238] sm:$0xff]  ;;  %v1166_v31 = vld [vmem:[#allocation7 + $0x9e8] sm:$0xff] }
 0x1e6   :  { %1722 = vmatprep.subr.mxu1 %v1268_v20  ;;  %1800 = vmatpush2.msra.mxu0 %v1013_v34  ;;  %v919_v20 = vld [vmem:[#allocation7 + $0x230] sm:$0xff]  ;;  %v1165_v34 = vld [vmem:[#allocation7 + $0x9e0] sm:$0xff] }
 0x1e7   :  { %1723 = vmatpush2.msra.mxu1 %v1267_v35  ;;  %1801 = vmatprep.subr.mxu0 %v1006_v37  ;;  %v912_v35 = vld [vmem:[#allocation7 + $0x1f8] sm:$0xff]  ;;  %v1158_v37 = vld [vmem:[#allocation7 + $0x9a8] sm:$0xff] }
 0x1e8   :  { %1724 = vmatprep.subr.mxu1 %v1260_v36  ;;  %1802 = vmatpush2.msra.mxu0 %v1005_v39  ;;  %v911_v36 = vld [vmem:[#allocation7 + $0x1f0] sm:$0xff]  ;;  %v1157_v39 = vld [vmem:[#allocation7 + $0x9a0] sm:$0xff] }
 0x1e9   :  { %1725 = vmatpush2.msra.mxu1 %v1259_v38  ;;  %1803 = vmatprep.subr.mxu0 %v998_v41  ;;  %v904_v38 = vld [vmem:[#allocation7 + $0x1b8] sm:$0xff]  ;;  %v1150_v41 = vld [vmem:[#allocation7 + $0x968] sm:$0xff] }
 0x1ea   :  { %1726 = vmatprep.subr.mxu1 %v1252_v40  ;;  %1804 = vmatpush2.msra.mxu0 %v997_v43  ;;  %v903_v40 = vld [vmem:[#allocation7 + $0x1b0] sm:$0xff]  ;;  %v1149_v43 = vld [vmem:[#allocation7 + $0x960] sm:$0xff] }
 0x1eb   :  { %1727 = vmatpush2.msra.mxu1 %v1251_v42  ;;  %1805 = vmatprep.subr.mxu0 %v990_v46  ;;  %v896_v42 = vld [vmem:[#allocation7 + $0x178] sm:$0xff]  ;;  %v1142_v46 = vld [vmem:[#allocation7 + $0x928] sm:$0xff] }
 0x1ec   :  { %1728 = vmatprep.subr.mxu1 %v1244_v45  ;;  %1806 = vmatpush2.msra.mxu0 %v989_v50  ;;  %v895_v45 = vld [vmem:[#allocation7 + $0x170] sm:$0xff]  ;;  %v1141_v50 = vld [vmem:[#allocation7 + $0x920] sm:$0xff] }
 0x1ed   :  { %1729 = vmatpush2.msra.mxu1 %v1243_v48  ;;  %1807 = vmatprep.subr.mxu0 %v982_v54  ;;  %v888_v48 = vld [vmem:[#allocation7 + $0x138] sm:$0xff]  ;;  %v1134_v54 = vld [vmem:[#allocation7 + $0x8e8] sm:$0xff] }
 0x1ee   :  { %1730 = vmatprep.subr.mxu1 %v1236_v53  ;;  %1808 = vmatpush2.msra.mxu0 %v981_v56  ;;  %v887_v53 = vld [vmem:[#allocation7 + $0x130] sm:$0xff]  ;;  %v1133_v56 = vld [vmem:[#allocation7 + $0x8e0] sm:$0xff] }
 0x1ef   :  { %1731 = vmatpush2.msra.mxu1 %v1235_v55  ;;  %1810 = vmatmul.mubr.f32.vlgmr.msra.gmra.mxu0 %v3043_v9  ;;  %v880_v55 = vld [vmem:[#allocation7 + $0xf8] sm:$0xff] }
 0x1f0   :  { %1733 = vmatmul.mubr.f32.vlgmr.msra.gmra.mxu1 %v3097_v28  ;;  %1822 = vmatprep.subr.mxu1 %v1230_v57  ;;  %v879_v57 = vld [vmem:[#allocation7 + $0xf0] sm:$0xff] }
 0x1f1   :  { %1899 = vmatprep.subr.mxu0 %v976_v58  ;;  %1738 = vmatprep.mubr.f32.mxu1 %v3105_v33  ;;  %v1126_v58 = vld [vmem:[#allocation7 + $0x8a8] sm:$0xff] }
 0x1f2   :  { %1815 = vmatprep.mubr.f32.mxu0 %v3049_v5  ;;  %1823 = vmatpush1.msra.mxu1 %v1229_v59  ;;  %v872_v59 = vld [vmem:[#allocation7 + $0xb8] sm:$0xff] }
 0x1f3   :  { %1900 = vmatpush1.msra.mxu0 %v975_v60  ;;  %1824 = vmatprep.subr.mxu1 %v1222_v61  ;;  %v1125_v60 = vld [vmem:[#allocation7 + $0x8a0] sm:$0xff]  ;;  %v871_v61 = vld [vmem:[#allocation7 + $0xb0] sm:$0xff] }
 0x1f4   :  { %1901 = vmatprep.subr.mxu0 %v968_v62  ;;  %1825 = vmatpush1.msra.mxu1 %v1221_v0  ;;  %v1118_v62 = vld [vmem:[#allocation7 + $0x868] sm:$0xff]  ;;  %v864_v0 = vld [vmem:[#allocation7 + $0x78] sm:$0xff] }
 0x1f5   :  { %1902 = vmatpush1.msra.mxu0 %v967_v3  ;;  %1739 = vmatmul.mubr.f32.gmra.mxu1 %v3103_v32  ;;  %v1117_v3 = vld [vmem:[#allocation7 + $0x860] sm:$0xff] }
 0x1f6   :  { %1816 = vmatmul.mubr.f32.gmra.mxu0 %v3047_v27  ;;  %1826 = vmatprep.subr.mxu1 %v1214_v4  ;;  %v863_v4 = vld [vmem:[#allocation7 + $0x70] sm:$0xff] }
 0x1f7   :  { %1903 = vmatprep.subr.mxu0 %v960_v6  ;;  %1827 = vmatpush1.msra.mxu1 %v1213_v7  ;;  %v1110_v6 = vld [vmem:[#allocation7 + $0x828] sm:$0xff]  ;;  %v856_v7 = vld [vmem:[#allocation7 + $0x38] sm:$0xff] }
 0x1f8   :  { %1886 = vmatprep.mubr.f32.mxu1 %v3095_v26  ;;  %1904 = vmatpush1.msra.mxu0 %v959_v11  ;;  %v1109_v11 = vld [vmem:[#allocation7 + $0x820] sm:$0xff] }
 0x1f9   :  { %1963 = vmatprep.mubr.f32.mxu0 %v3041_v8  ;;  %1828 = vmatprep.subr.mxu1 %v1206_v52  ;;  %v1181_v8 = vld [vmem:[#allocation7 + $0xa60] sm:$0xff]  ;;  %v855_v52 = vld [vmem:[#allocation7 + $0x30] sm:$0xff] }
 0x1fa   :  { %1905 = vmatprep.subr.mxu0 %v952_v12  ;;  %1829 = vmatpush1.msra.mxu1 %v1205_v14  ;;  %v1358_v12 = vld [vmem:[#allocation7 + $0xfe8] sm:$0xff]  ;;  %v1104_v14 = vld [vmem:[#allocation7 + $0x7f8] sm:$0xff] }
 0x1fb   :  { %1906 = vmatpush1.msra.mxu0 %v951_v15  ;;  %1830 = vmatprep.subr.mxu1 %v1198_v17  ;;  %v1357_v15 = vld [vmem:[#allocation7 + $0xfe0] sm:$0xff]  ;;  %v1103_v17 = vld [vmem:[#allocation7 + $0x7f0] sm:$0xff] }
 0x1fc   :  { %1907 = vmatprep.subr.mxu0 %v944_v18  ;;  %1831 = vmatpush1.msra.mxu1 %v1197_v19  ;;  %v1350_v18 = vld [vmem:[#allocation7 + $0xfa8] sm:$0xff]  ;;  %v1096_v19 = vld [vmem:[#allocation7 + $0x7b8] sm:$0xff] }
 0x1fd   :  { %1908 = vmatpush1.msra.mxu0 %v943_v21  ;;  %1832 = vmatprep.subr.mxu1 %v1190_v22  ;;  %v1349_v21 = vld [vmem:[#allocation7 + $0xfa0] sm:$0xff]  ;;  %v1095_v22 = vld [vmem:[#allocation7 + $0x7b0] sm:$0xff] }
 0x1fe   :  { %1909 = vmatprep.subr.mxu0 %v936_v23  ;;  %1833 = vmatpush1.msra.mxu1 %v1189_v24  ;;  %v1342_v23 = vld [vmem:[#allocation7 + $0xf68] sm:$0xff]  ;;  %v1088_v24 = vld [vmem:[#allocation7 + $0x778] sm:$0xff] }
 0x1ff   :  { %1910 = vmatpush1.msra.mxu0 %v935_v25  ;;  %1834 = vmatprep.subr.mxu1 %v1182_v2  ;;  %v1341_v25 = vld [vmem:[#allocation7 + $0xf60] sm:$0xff]  ;;  %v1087_v2 = vld [vmem:[#allocation7 + $0x770] sm:$0xff] }
 0x200   :  { %1911 = vmatprep.subr.mxu0 %v928_v10  ;;  %1835 = vmatpush1.msra.mxu1 %v1181_v8  ;;  %v1334_v10 = vld [vmem:[#allocation7 + $0xf28] sm:$0xff]  ;;  %v1080_v8 = vld [vmem:[#allocation7 + $0x738] sm:$0xff] }
 0x201   :  { %1912 = vmatpush1.msra.mxu0 %v927_v16  ;;  %1836 = vmatprep.subr.mxu1 %v1174_v29  ;;  %v1333_v16 = vld [vmem:[#allocation7 + $0xf20] sm:$0xff]  ;;  %v1079_v29 = vld [vmem:[#allocation7 + $0x730] sm:$0xff] }
 0x202   :  { %1913 = vmatprep.subr.mxu0 %v920_v30  ;;  %1837 = vmatpush1.msra.mxu1 %v1173_v13  ;;  %v1326_v30 = vld [vmem:[#allocation7 + $0xee8] sm:$0xff]  ;;  %v1072_v13 = vld [vmem:[#allocation7 + $0x6f8] sm:$0xff] }
 0x203   :  { %1914 = vmatpush1.msra.mxu0 %v919_v20  ;;  %1838 = vmatprep.subr.mxu1 %v1166_v31  ;;  %v1325_v20 = vld [vmem:[#allocation7 + $0xee0] sm:$0xff]  ;;  %v1071_v31 = vld [vmem:[#allocation7 + $0x6f0] sm:$0xff] }
 0x204   :  { %1915 = vmatprep.subr.mxu0 %v912_v35  ;;  %1839 = vmatpush1.msra.mxu1 %v1165_v34  ;;  %v1318_v35 = vld [vmem:[#allocation7 + $0xea8] sm:$0xff]  ;;  %v1064_v34 = vld [vmem:[#allocation7 + $0x6b8] sm:$0xff] }
 0x205   :  { %1916 = vmatpush1.msra.mxu0 %v911_v36  ;;  %1840 = vmatprep.subr.mxu1 %v1158_v37  ;;  %v1317_v36 = vld [vmem:[#allocation7 + $0xea0] sm:$0xff]  ;;  %v1063_v37 = vld [vmem:[#allocation7 + $0x6b0] sm:$0xff] }
 0x206   :  { %1917 = vmatprep.subr.mxu0 %v904_v38  ;;  %1841 = vmatpush1.msra.mxu1 %v1157_v39  ;;  %v1310_v38 = vld [vmem:[#allocation7 + $0xe68] sm:$0xff]  ;;  %v1056_v39 = vld [vmem:[#allocation7 + $0x678] sm:$0xff] }
 0x207   :  { %1918 = vmatpush1.msra.mxu0 %v903_v40  ;;  %1842 = vmatprep.subr.mxu1 %v1150_v41  ;;  %v1309_v40 = vld [vmem:[#allocation7 + $0xe60] sm:$0xff]  ;;  %v1055_v41 = vld [vmem:[#allocation7 + $0x670] sm:$0xff] }
 0x208   :  { %1919 = vmatprep.subr.mxu0 %v896_v42  ;;  %1843 = vmatpush1.msra.mxu1 %v1149_v43  ;;  %v1302_v42 = vld [vmem:[#allocation7 + $0xe28] sm:$0xff]  ;;  %v1048_v43 = vld [vmem:[#allocation7 + $0x638] sm:$0xff] }
 0x209   :  { %1920 = vmatpush1.msra.mxu0 %v895_v45  ;;  %1844 = vmatprep.subr.mxu1 %v1142_v46  ;;  %v1301_v45 = vld [vmem:[#allocation7 + $0xe20] sm:$0xff]  ;;  %v1047_v46 = vld [vmem:[#allocation7 + $0x630] sm:$0xff] }
 0x20a   :  { %1921 = vmatprep.subr.mxu0 %v888_v48  ;;  %1845 = vmatpush1.msra.mxu1 %v1141_v50  ;;  %v1294_v48 = vld [vmem:[#allocation7 + $0xde8] sm:$0xff]  ;;  %v1040_v50 = vld [vmem:[#allocation7 + $0x5f8] sm:$0xff] }
 0x20b   :  { %1922 = vmatpush1.msra.mxu0 %v887_v53  ;;  %1846 = vmatprep.subr.mxu1 %v1134_v54  ;;  %v1293_v53 = vld [vmem:[#allocation7 + $0xde0] sm:$0xff]  ;;  %v1039_v54 = vld [vmem:[#allocation7 + $0x5f0] sm:$0xff] }
 0x20c   :  { %1923 = vmatprep.subr.mxu0 %v880_v55  ;;  %1847 = vmatpush1.msra.mxu1 %v1133_v56  ;;  %v1286_v55 = vld [vmem:[#allocation7 + $0xda8] sm:$0xff]  ;;  %v1032_v56 = vld [vmem:[#allocation7 + $0x5b8] sm:$0xff] }
 0x20d   :  { %1924 = vmatpush1.msra.mxu0 %v879_v57  ;;  %1848 = vmatprep.subr.mxu1 %v1126_v58  ;;  %v1285_v57 = vld [vmem:[#allocation7 + $0xda0] sm:$0xff]  ;;  %v1031_v58 = vld [vmem:[#allocation7 + $0x5b0] sm:$0xff] }
 0x20e   :  { %1925 = vmatprep.subr.mxu0 %v872_v59  ;;  %1849 = vmatpush1.msra.mxu1 %v1125_v60  ;;  %v1278_v59 = vld [vmem:[#allocation7 + $0xd68] sm:$0xff]  ;;  %v1024_v60 = vld [vmem:[#allocation7 + $0x578] sm:$0xff] }
 0x20f   :  { %1926 = vmatpush1.msra.mxu0 %v871_v61  ;;  %1850 = vmatprep.subr.mxu1 %v1118_v62  ;;  %v1277_v61 = vld [vmem:[#allocation7 + $0xd60] sm:$0xff]  ;;  %v1023_v62 = vld [vmem:[#allocation7 + $0x570] sm:$0xff] }
 0x210   :  { %1927 = vmatprep.subr.mxu0 %v864_v0  ;;  %1851 = vmatpush1.msra.mxu1 %v1117_v3  ;;  %v1270_v0 = vld [vmem:[#allocation7 + $0xd28] sm:$0xff]  ;;  %v1016_v3 = vld [vmem:[#allocation7 + $0x538] sm:$0xff] }
 0x211   :  { %1928 = vmatpush1.msra.mxu0 %v863_v4  ;;  %1852 = vmatprep.subr.mxu1 %v1110_v6  ;;  %v1269_v4 = vld [vmem:[#allocation7 + $0xd20] sm:$0xff]  ;;  %v1015_v6 = vld [vmem:[#allocation7 + $0x530] sm:$0xff] }
 0x212   :  { %1929 = vmatprep.subr.mxu0 %v856_v7  ;;  %1853 = vmatpush1.msra.mxu1 %v1109_v11  ;;  %v1262_v7 = vld [vmem:[#allocation7 + $0xce8] sm:$0xff]  ;;  %v1008_v11 = vld [vmem:[#allocation7 + $0x4f8] sm:$0xff] }
 0x213   :  { %1930 = vmatpush1.msra.mxu0 %v855_v52  ;;  %1854 = vmatprep.subr.mxu1 %v1358_v12  ;;  %v1261_v52 = vld [vmem:[#allocation7 + $0xce0] sm:$0xff]  ;;  %v1007_v12 = vld [vmem:[#allocation7 + $0x4f0] sm:$0xff] }
 0x214   :  { %1931 = vmatprep.subr.mxu0 %v1104_v14  ;;  %1855 = vmatpush2.msra.mxu1 %v1357_v15  ;;  %v1254_v14 = vld [vmem:[#allocation7 + $0xca8] sm:$0xff]  ;;  %v1000_v15 = vld [vmem:[#allocation7 + $0x4b8] sm:$0xff] }
 0x215   :  { %1932 = vmatpush2.msra.mxu0 %v1103_v17  ;;  %1856 = vmatprep.subr.mxu1 %v1350_v18  ;;  %v1253_v17 = vld [vmem:[#allocation7 + $0xca0] sm:$0xff]  ;;  %v999_v18 = vld [vmem:[#allocation7 + $0x4b0] sm:$0xff] }
 0x216   :  { %1933 = vmatprep.subr.mxu0 %v1096_v19  ;;  %1857 = vmatpush2.msra.mxu1 %v1349_v21  ;;  %v1246_v19 = vld [vmem:[#allocation7 + $0xc68] sm:$0xff]  ;;  %v992_v21 = vld [vmem:[#allocation7 + $0x478] sm:$0xff] }
 0x217   :  { %1934 = vmatpush2.msra.mxu0 %v1095_v22  ;;  %1858 = vmatprep.subr.mxu1 %v1342_v23  ;;  %v1245_v22 = vld [vmem:[#allocation7 + $0xc60] sm:$0xff]  ;;  %v991_v23 = vld [vmem:[#allocation7 + $0x470] sm:$0xff] }
 0x218   :  { %1935 = vmatprep.subr.mxu0 %v1088_v24  ;;  %1859 = vmatpush2.msra.mxu1 %v1341_v25  ;;  %v1238_v24 = vld [vmem:[#allocation7 + $0xc28] sm:$0xff]  ;;  %v984_v25 = vld [vmem:[#allocation7 + $0x438] sm:$0xff] }
 0x219   :  { %1936 = vmatpush2.msra.mxu0 %v1087_v2  ;;  %1860 = vmatprep.subr.mxu1 %v1334_v10  ;;  %v1237_v2 = vld [vmem:[#allocation7 + $0xc20] sm:$0xff]  ;;  %v983_v10 = vld [vmem:[#allocation7 + $0x430] sm:$0xff] }
 0x21a   :  { %1937 = vmatprep.subr.mxu0 %v1080_v8  ;;  %1861 = vmatpush2.msra.mxu1 %v1333_v16  ;;  %v1232_v8 = vld [vmem:[#allocation7 + $0xbf8] sm:$0xff]  ;;  %v1231_v16 = vld [vmem:[#allocation7 + $0xbf0] sm:$0xff] }
 0x21b   :  { %1938 = vmatpush2.msra.mxu0 %v1079_v29  ;;  %1862 = vmatprep.subr.mxu1 %v1326_v30  ;;  %v1224_v29 = vld [vmem:[#allocation7 + $0xbb8] sm:$0xff]  ;;  %v1223_v30 = vld [vmem:[#allocation7 + $0xbb0] sm:$0xff] }
 0x21c   :  { %1939 = vmatprep.subr.mxu0 %v1072_v13  ;;  %1863 = vmatpush2.msra.mxu1 %v1325_v20  ;;  %v1216_v13 = vld [vmem:[#allocation7 + $0xb78] sm:$0xff]  ;;  %v1215_v20 = vld [vmem:[#allocation7 + $0xb70] sm:$0xff] }
 0x21d   :  { %1940 = vmatpush2.msra.mxu0 %v1071_v31  ;;  %1864 = vmatprep.subr.mxu1 %v1318_v35  ;;  %v1208_v31 = vld [vmem:[#allocation7 + $0xb38] sm:$0xff]  ;;  %v1207_v35 = vld [vmem:[#allocation7 + $0xb30] sm:$0xff] }
 0x21e   :  { %1941 = vmatprep.subr.mxu0 %v1064_v34  ;;  %1865 = vmatpush2.msra.mxu1 %v1317_v36  ;;  %v1199_v34 = vld [vmem:[#allocation7 + $0xaf0] sm:$0xff] }
 0x21f   :  { %1942 = vmatpush2.msra.mxu0 %v1063_v37  ;;  %1866 = vmatprep.subr.mxu1 %v1310_v38  ;;  %v1191_v36 = vld [vmem:[#allocation7 + $0xab0] sm:$0xff]  ;;  %v1184_v37 = vld [vmem:[#allocation7 + $0xa78] sm:$0xff] }
 0x220   :  { %1943 = vmatprep.subr.mxu0 %v1056_v39  ;;  %1867 = vmatpush2.msra.mxu1 %v1309_v40  ;;  %v1183_v38 = vld [vmem:[#allocation7 + $0xa70] sm:$0xff]  ;;  %v1168_v40 = vld [vmem:[#allocation7 + $0x9f8] sm:$0xff] }
 0x221   :  { %1944 = vmatpush2.msra.mxu0 %v1055_v41  ;;  %1868 = vmatprep.subr.mxu1 %v1302_v42  ;;  %v1175_v39 = vld [vmem:[#allocation7 + $0xa30] sm:$0xff] }
 0x222   :  { %1945 = vmatprep.subr.mxu0 %v1048_v43  ;;  %1869 = vmatpush2.msra.mxu1 %v1301_v45  ;;  %v1167_v41 = vld [vmem:[#allocation7 + $0x9f0] sm:$0xff]  ;;  %v1152_v43 = vld [vmem:[#allocation7 + $0x978] sm:$0xff] }
 0x223   :  { %1946 = vmatpush2.msra.mxu0 %v1047_v46  ;;  %1870 = vmatprep.subr.mxu1 %v1294_v48  ;;  %v1159_v42 = vld [vmem:[#allocation7 + $0x9b0] sm:$0xff]  ;;  %v1144_v46 = vld [vmem:[#allocation7 + $0x938] sm:$0xff] }
 0x224   :  { %1947 = vmatprep.subr.mxu0 %v1040_v50  ;;  %1871 = vmatpush2.msra.mxu1 %v1293_v53  ;;  %v1151_v45 = vld [vmem:[#allocation7 + $0x970] sm:$0xff]  ;;  %v1136_v50 = vld [vmem:[#allocation7 + $0x8f8] sm:$0xff] }
 0x225   :  { %1948 = vmatpush2.msra.mxu0 %v1039_v54  ;;  %1872 = vmatprep.subr.mxu1 %v1286_v55  ;;  %v1143_v48 = vld [vmem:[#allocation7 + $0x930] sm:$0xff]  ;;  %v1128_v54 = vld [vmem:[#allocation7 + $0x8b8] sm:$0xff] }
 0x226   :  { %1949 = vmatprep.subr.mxu0 %v1032_v56  ;;  %1873 = vmatpush2.msra.mxu1 %v1285_v57  ;;  %v1135_v53 = vld [vmem:[#allocation7 + $0x8f0] sm:$0xff]  ;;  %v1120_v56 = vld [vmem:[#allocation7 + $0x878] sm:$0xff] }
 0x227   :  { %1950 = vmatpush2.msra.mxu0 %v1031_v58  ;;  %1874 = vmatprep.subr.mxu1 %v1278_v59  ;;  %v1127_v55 = vld [vmem:[#allocation7 + $0x8b0] sm:$0xff]  ;;  %v1112_v58 = vld [vmem:[#allocation7 + $0x838] sm:$0xff] }
 0x228   :  { %1951 = vmatprep.subr.mxu0 %v1024_v60  ;;  %1875 = vmatpush2.msra.mxu1 %v1277_v61  ;;  %v1119_v57 = vld [vmem:[#allocation7 + $0x870] sm:$0xff]  ;;  %v1360_v60 = vld [vmem:[#allocation7 + $0xff8] sm:$0xff] }
 0x229   :  { %1952 = vmatpush2.msra.mxu0 %v1023_v62  ;;  %1876 = vmatprep.subr.mxu1 %v1270_v0  ;;  %v1111_v59 = vld [vmem:[#allocation7 + $0x830] sm:$0xff]  ;;  %v1352_v62 = vld [vmem:[#allocation7 + $0xfb8] sm:$0xff] }
 0x22a   :  { %1953 = vmatprep.subr.mxu0 %v1016_v3  ;;  %1877 = vmatpush2.msra.mxu1 %v1269_v4  ;;  %v1359_v61 = vld [vmem:[#allocation7 + $0xff0] sm:$0xff]  ;;  %v1344_v3 = vld [vmem:[#allocation7 + $0xf78] sm:$0xff] }
 0x22b   :  { %1954 = vmatpush2.msra.mxu0 %v1015_v6  ;;  %1878 = vmatprep.subr.mxu1 %v1262_v7  ;;  %v1351_v0 = vld [vmem:[#allocation7 + $0xfb0] sm:$0xff]  ;;  %v1336_v6 = vld [vmem:[#allocation7 + $0xf38] sm:$0xff] }
 0x22c   :  { %1955 = vmatprep.subr.mxu0 %v1008_v11  ;;  %1879 = vmatpush2.msra.mxu1 %v1261_v52  ;;  %v1343_v4 = vld [vmem:[#allocation7 + $0xf70] sm:$0xff]  ;;  %v1328_v11 = vld [vmem:[#allocation7 + $0xef8] sm:$0xff] }
 0x22d   :  { %1956 = vmatpush2.msra.mxu0 %v1007_v12  ;;  %1880 = vmatprep.subr.mxu1 %v1254_v14  ;;  %v1335_v7 = vld [vmem:[#allocation7 + $0xf30] sm:$0xff]  ;;  %v1320_v12 = vld [vmem:[#allocation7 + $0xeb8] sm:$0xff] }
 0x22e   :  { %1957 = vmatprep.subr.mxu0 %v1000_v15  ;;  %1881 = vmatpush2.msra.mxu1 %v1253_v17  ;;  %v1327_v52 = vld [vmem:[#allocation7 + $0xef0] sm:$0xff]  ;;  %v1312_v15 = vld [vmem:[#allocation7 + $0xe78] sm:$0xff] }
 0x22f   :  { %1958 = vmatpush2.msra.mxu0 %v999_v18  ;;  %1882 = vmatprep.subr.mxu1 %v1246_v19  ;;  %v1319_v14 = vld [vmem:[#allocation7 + $0xeb0] sm:$0xff]  ;;  %v1304_v18 = vld [vmem:[#allocation7 + $0xe38] sm:$0xff] }
 0x230   :  { %1959 = vmatprep.subr.mxu0 %v992_v21  ;;  %1883 = vmatpush2.msra.mxu1 %v1245_v22  ;;  %v1311_v17 = vld [vmem:[#allocation7 + $0xe70] sm:$0xff]  ;;  %v1296_v21 = vld [vmem:[#allocation7 + $0xdf8] sm:$0xff] }
 0x231   :  { %1960 = vmatpush2.msra.mxu0 %v991_v23  ;;  %1884 = vmatprep.subr.mxu1 %v1238_v24  ;;  %v1303_v19 = vld [vmem:[#allocation7 + $0xe30] sm:$0xff]  ;;  %v1288_v23 = vld [vmem:[#allocation7 + $0xdb8] sm:$0xff] }
 0x232   :  { %1961 = vmatprep.subr.mxu0 %v984_v25  ;;  %1885 = vmatpush2.msra.mxu1 %v1237_v2  ;;  %v1295_v22 = vld [vmem:[#allocation7 + $0xdf0] sm:$0xff]  ;;  %v1280_v25 = vld [vmem:[#allocation7 + $0xd78] sm:$0xff] }
 0x233   :  { %1962 = vmatpush2.msra.mxu0 %v983_v10  ;;  %1887 = vmatmul.mubr.f32.vlgmr.msra.gmra.mxu1 %v3097_v28  ;;  %v1287_v24 = vld [vmem:[#allocation7 + $0xdb0] sm:$0xff]  ;;  %v1272_v10 = vld [vmem:[#allocation7 + $0xd38] sm:$0xff] }
 0x234   :  { %1964 = vmatmul.mubr.f32.vlgmr.msra.gmra.mxu0 %v3043_v9  ;;  %1976 = vmatprep.subr.mxu1 %v1232_v8  ;;  %v1200_v9 = vld [vmem:[#allocation7 + $0xaf8] sm:$0xff]  ;;  %v1279_v2 = vld [vmem:[#allocation7 + $0xd70] sm:$0xff] }
 0x235   :  { %1892 = vmatprep.mubr.f32.mxu1 %v3105_v33  ;;  %1969 = vmatprep.mubr.f32.mxu0 %v3049_v5  ;;  %v1192_v5 = vld [vmem:[#allocation7 + $0xab8] sm:$0xff]  ;;  %v1271_v8 = vld [vmem:[#allocation7 + $0xd30] sm:$0xff] }
 0x236   :  { %1977 = vmatpush1.msra.mxu1 %v1231_v16  ;;  %v1264_v16 = vld [vmem:[#allocation7 + $0xcf8] sm:$0xff] }
 0x237   :  { %1978 = vmatprep.subr.mxu1 %v1224_v29  ;;  %1893 = vmatmul.mubr.f32.gmra.mxu1 %v3103_v32  ;;  %v1263_v29 = vld [vmem:[#allocation7 + $0xcf0] sm:$0xff] }
 0x238   :  { %1979 = vmatpush1.msra.mxu1 %v1223_v30  ;;  %1970 = vmatmul.mubr.f32.gmra.mxu0 %v3047_v27  ;;  %v1176_v27 = vld [vmem:[#allocation7 + $0xa38] sm:$0xff] }
 0x239   :  { %1980 = vmatprep.subr.mxu1 %v1216_v13  ;;  %2040 = vmatprep.mubr.f32.mxu1 %v3095_v26  ;;  %v1160_v26 = vld [vmem:[#allocation7 + $0x9b8] sm:$0xff]  ;;  %v1255_v13 = vld [vmem:[#allocation7 + $0xcb0] sm:$0xff] }
 0x23a   :  { %1981 = vmatpush1.msra.mxu1 %v1215_v20  ;;  %v1256_v30 = vld [vmem:[#allocation7 + $0xcb8] sm:$0xff] }
 0x23b   :  { %1982 = vmatprep.subr.mxu1 %v1208_v31  ;;  %v1248_v20 = vld [vmem:[#allocation7 + $0xc78] sm:$0xff]  ;;  %v1247_v31 = vld [vmem:[#allocation7 + $0xc70] sm:$0xff] }
 0x23c   :  { %1983 = vmatpush1.msra.mxu1 %v1207_v35  ;;  %v1240_v35 = vld [vmem:[#allocation7 + $0xc38] sm:$0xff] }
 0x23d   :  { %1984 = vmatprep.subr.mxu1 %v1200_v9  ;;  %v1239_v9 = vld [vmem:[#allocation7 + $0xc30] sm:$0xff] }
 0x23e   :  { %1985 = vmatpush1.msra.mxu1 %v1199_v34  ;;  %v2352_v34 = vld [vmem:[#allocation8 + $0xf8] sm:$0xff] }
 0x23f   :  { %1986 = vmatprep.subr.mxu1 %v1192_v5  ;;  %2636 = vmatprep.subr.mxu0 %v2352_v34  ;;  %v2336_v5 = vld [vmem:[#allocation8 + $0x78] sm:$0xff] }
 0x240   :  { %1987 = vmatpush1.msra.mxu1 %v1191_v36  ;;  %2637 = vmatpush3.msra.mxu0 %v2336_v5  ;;  %v2351_v36 = vld [vmem:[#allocation8 + $0xf0] sm:$0xff] }
 0x241   :  { %1988 = vmatprep.subr.mxu1 %v1184_v37  ;;  %2638 = vmatprep.subr.mxu0 %v2351_v36  ;;  %v2335_v37 = vld [vmem:[#allocation8 + $0x70] sm:$0xff] }
 0x242   :  { %1989 = vmatpush1.msra.mxu1 %v1183_v38  ;;  %2639 = vmatpush3.msra.mxu0 %v2335_v37  ;;  %v2350_v38 = vld [vmem:[#allocation8 + $0xe8] sm:$0xff] }
 0x243   :  { %1990 = vmatprep.subr.mxu1 %v1176_v27  ;;  %2640 = vmatprep.subr.mxu0 %v2350_v38  ;;  %v2334_v27 = vld [vmem:[#allocation8 + $0x68] sm:$0xff] }
 0x244   :  { %1991 = vmatpush1.msra.mxu1 %v1175_v39  ;;  %2641 = vmatpush3.msra.mxu0 %v2334_v27  ;;  %v2349_v39 = vld [vmem:[#allocation8 + $0xe0] sm:$0xff] }
 0x245   :  { %1992 = vmatprep.subr.mxu1 %v1168_v40  ;;  %2642 = vmatprep.subr.mxu0 %v2349_v39  ;;  %v2333_v40 = vld [vmem:[#allocation8 + $0x60] sm:$0xff] }
 0x246   :  { %1993 = vmatpush1.msra.mxu1 %v1167_v41  ;;  %2643 = vmatpush3.msra.mxu0 %v2333_v40  ;;  %v2331_v41 = vld [vmem:[#allocation8 + $0x50] sm:$0xff]  ;;  %v3149_v27 = vld [vmem:[#allocation10 + $0x20] sm:$0x77] }
 0x247   :  { %1994 = vmatprep.subr.mxu1 %v1160_v26  ;;  %v2346_v26 = vld [vmem:[#allocation8 + $0xc8] sm:$0xff]  ;;  %v1388_v40 = vrot.slane %v3149_v27, %v3019_v1 }
 0x248   :  { %1995 = vmatpush1.msra.mxu1 %v1159_v42  ;;  %v2330_v42 = vld [vmem:[#allocation8 + $0x48] sm:$0xff] }
 0x249   :  { %1996 = vmatprep.subr.mxu1 %v1152_v43  ;;  %v2345_v43 = vld [vmem:[#allocation8 + $0xc0] sm:$0xff] }
 0x24a   :  { %1997 = vmatpush1.msra.mxu1 %v1151_v45  ;;  %v2329_v45 = vld [vmem:[#allocation8 + $0x40] sm:$0xff] }
 0x24b   :  { %1998 = vmatprep.subr.mxu1 %v1144_v46  ;;  %v2344_v46 = vld [vmem:[#allocation8 + $0xb8] sm:$0xff] }
 0x24c   :  { %1999 = vmatpush1.msra.mxu1 %v1143_v48  ;;  %v2328_v48 = vld [vmem:[#allocation8 + $0x38] sm:$0xff] }
 0x24d   :  { %2000 = vmatprep.subr.mxu1 %v1136_v50  ;;  %v2343_v50 = vld [vmem:[#allocation8 + $0xb0] sm:$0xff] }
 0x24e   :  { %2001 = vmatpush1.msra.mxu1 %v1135_v53  ;;  %v2327_v53 = vld [vmem:[#allocation8 + $0x30] sm:$0xff] }
 0x24f   :  { %2002 = vmatprep.subr.mxu1 %v1128_v54  ;;  %v2342_v54 = vld [vmem:[#allocation8 + $0xa8] sm:$0xff] }
 0x250   :  { %2003 = vmatpush1.msra.mxu1 %v1127_v55  ;;  %v2326_v55 = vld [vmem:[#allocation8 + $0x28] sm:$0xff] }
 0x251   :  { %2004 = vmatprep.subr.mxu1 %v1120_v56  ;;  %v2341_v56 = vld [vmem:[#allocation8 + $0xa0] sm:$0xff] }
 0x252   :  { %2005 = vmatpush1.msra.mxu1 %v1119_v57  ;;  %v2325_v57 = vld [vmem:[#allocation8 + $0x20] sm:$0xff] }
 0x253   :  { %2006 = vmatprep.subr.mxu1 %v1112_v58  ;;  %v2340_v58 = vld [vmem:[#allocation8 + $0x98] sm:$0xff] }
 0x254   :  { %2007 = vmatpush1.msra.mxu1 %v1111_v59  ;;  %v2324_v59 = vld [vmem:[#allocation8 + $0x18] sm:$0xff] }
 0x255   :  { %2008 = vmatprep.subr.mxu1 %v1360_v60  ;;  %v2339_v60 = vld [vmem:[#allocation8 + $0x90] sm:$0xff] }
 0x256   :  { %2009 = vmatpush2.msra.mxu1 %v1359_v61  ;;  %v2323_v61 = vld [vmem:[#allocation8 + $0x10] sm:$0xff] }
 0x257   :  { %2010 = vmatprep.subr.mxu1 %v1352_v62  ;;  %v2338_v62 = vld [vmem:[#allocation8 + $0x88] sm:$0xff] }
 0x258   :  { %2011 = vmatpush2.msra.mxu1 %v1351_v0  ;;  %v2322_v0 = vld [vmem:[#allocation8 + $0x8] sm:$0xff] }
 0x259   :  { %2012 = vmatprep.subr.mxu1 %v1344_v3  ;;  %v2337_v3 = vld [vmem:[#allocation8 + $0x80] sm:$0xff] }
 0x25a   :  { %2013 = vmatpush2.msra.mxu1 %v1343_v4  ;;  %v2321_v4 = vld [vmem:[#allocation8] sm:$0xff] }
 0x25b   :  { %2014 = vmatprep.subr.mxu1 %v1336_v6  ;;  %v1503_v6 = vpop.f32.mrf.mxu0 }
 0x25c   :  { %2015 = vmatpush2.msra.mxu1 %v1335_v7 }
 0x25d   :  { %2016 = vmatprep.subr.mxu1 %v1328_v11  ;;  %v1505_v11 = vpop.f32.mrf.mxu0 }
 0x25e   :  { %2017 = vmatpush2.msra.mxu1 %v1327_v52 }
 0x25f   :  { %2018 = vmatprep.subr.mxu1 %v1320_v12  ;;  %v1509_v12 = vpop.f32.mrf.mxu0 }
 0x260   :  { %2019 = vmatpush2.msra.mxu1 %v1319_v14 }
 0x261   :  { %2020 = vmatprep.subr.mxu1 %v1312_v15  ;;  %v1511_v15 = vpop.f32.mrf.mxu0 }
 0x262   :  { %2021 = vmatpush2.msra.mxu1 %v1311_v17  ;;  %v3129_v17 = vld [vmem:[#allocation10 + $0x10] sm:$0x77] }
 0x263   :  { %2022 = vmatprep.subr.mxu1 %v1304_v18 }
 0x264   :  { %2023 = vmatpush2.msra.mxu1 %v1303_v19 }
 0x265   :  { %2024 = vmatprep.subr.mxu1 %v1296_v21 }
 0x266   :  { %2025 = vmatpush2.msra.mxu1 %v1295_v22  ;;  %v1368_v22 = vrot.slane %v3129_v17, %v3017_v63 }
 0x267   :  { %2026 = vmatprep.subr.mxu1 %v1288_v23  ;;  %v1372_v23 = vrot.slane %v3129_v17, %v3019_v1 }
 0x268   :  { %2027 = vmatpush2.msra.mxu1 %v1287_v24 }
 0x269   :  { %2028 = vmatprep.subr.mxu1 %v1280_v25  ;;  %v3135_v25 = vld [vmem:[#allocation10 + $0x18] sm:$0x77] }
 0x26a   :  { %2029 = vmatpush2.msra.mxu1 %v1279_v2 }
 0x26b   :  { %2030 = vmatprep.subr.mxu1 %v1272_v10  ;;  %v1657_v18 = vpop.f32.mrf.mxu0  ;;  %v1408_v10 = vrot.slane %v1368_v22, %v3017_v63  ;;  %v2136_v22 = vrot.slane %v3129_v17, %v3025_v44 }
 0x26c   :  { %2031 = vmatpush2.msra.mxu1 %v1271_v8  ;;  %v1412_v8 = vrot.slane %v1372_v23, %v3017_v63 }
 0x26d   :  { %2032 = vmatprep.subr.mxu1 %v1264_v16  ;;  %v1659_v24 = vpop.f32.mrf.mxu0  ;;  %v1376_v16 = vrot.slane %v3135_v25, %v3017_v63 }
 0x26e   :  { %2033 = vmatpush2.msra.mxu1 %v1263_v29 }
 0x26f   :  { %2034 = vmatprep.subr.mxu1 %v1256_v30  ;;  %v1580_v7 = vpop.f32.mrf.mxu1  ;;  %v1663_v29 = vpop.f32.mrf.mxu0  ;;  %v1380_v30 = vrot.slane %v3135_v25, %v3019_v1 }
 0x270   :  { %2035 = vmatpush2.msra.mxu1 %v1255_v13 }
 0x271   :  { %2036 = vmatprep.subr.mxu1 %v1248_v20  ;;  %v1582_v52 = vpop.f32.mrf.mxu1  ;;  %v1504_v20 = vadd.f32 %v1503_v6, %v1408_v10  ;;  %v1420_v5 = vrot.slane %v1380_v30, %v3017_v63 }
 0x272   :  { %2037 = vmatpush2.msra.mxu1 %v1247_v31  ;;  %v1506_v31 = vadd.f32 %v1505_v11, %v1412_v8 }
 0x273   :  { %2038 = vmatprep.subr.mxu1 %v1240_v35  ;;  %v1416_v35 = vrot.slane %v1376_v16, %v3017_v63  ;;  %v3144_v34 = vadd.f32 %v1580_v7, %v1504_v20  ;;  %v3171_v7 = vld [vmem:[#allocation10 + $0x28] sm:$0x77] }
 0x274   :  { %2039 = vmatpush2.msra.mxu1 %v1239_v9  ;;  %v1586_v14 = vpop.f32.mrf.mxu1  ;;  %v1665_v9 = vpop.f32.mrf.mxu0  ;;  %v3147_v36 = vadd.f32 %v1582_v52, %v1506_v31  ;;  %v2140_v31 = vrot.slane %v3129_v17, %v3027_v47 }
 0x275   :  { %2041 = vmatmul.mubr.f32.vlgmr.msra.gmra.mxu1 %v3097_v28  ;;  %v2348_v28 = vld [vmem:[#allocation8 + $0xd8] sm:$0xff]  ;;  %v1658_v39 = vadd.f32 %v1657_v18, %v1416_v35  ;;  %vm2053_vm8 = vcmp.gt.f32.partialorder %v3144_v34, 0.0 }
 0x276   :  { %2046 = vmatprep.mubr.f32.mxu1 %v3105_v33  ;;  %2644 = vmatprep.subr.mxu0 %v2348_v28  ;;  %v2332_v33 = vld [vmem:[#allocation8 + $0x58] sm:$0xff]  ;;  %v1588_v19 = vpop.f32.mrf.mxu1  ;;  %vm2054_vm9 = vcmp.gt.f32.partialorder %v3147_v36, 0.0 }
 0x277   :  { %2645 = vmatpush3.msra.mxu0 %v2332_v33  ;;  %v1510_v33 = vadd.f32 %v1509_v12, %v1408_v10  ;;  %v1666_v12 = vadd.f32 %v1665_v9, %v1420_v5  ;;  %v2228_v9 = vrot.slane %v3129_v17, %v3029_v49 }
 0x279   :  { %2047 = vmatmul.mubr.f32.gmra.mxu1 %v3103_v32  ;;  %v2347_v32 = vld [vmem:[#allocation8 + $0xd0] sm:$0xff] }
 0x27a   :  { %2646 = vmatprep.subr.mxu0 %v2347_v32  ;;  %v2069_v32 = vmul.f32 1.442695, %v3144_v34 }
 0x27b   :  { %2647 = vmatpush3.msra.mxu0 %v2331_v41  ;;  %v1660_v41 = vadd.f32 %v1659_v24, %v1420_v5 }
 0x27c   :  { %2648 = vmatprep.subr.mxu0 %v2346_v26  ;;  %v2071_v26 = vmul.f32 1.442695, %v3147_v36  ;;  %2716 = vpow2.f32 %v2069_v32 }
 0x27d   :  { %2649 = vmatpush3.msra.mxu0 %v2330_v42 }
 0x27e   :  { %2650 = vmatprep.subr.mxu0 %v2345_v43  ;;  %v1384_v43 = vrot.slane %v3149_v27, %v3017_v63  ;;  %2718 = vpow2.f32 %v2071_v26 }
 0x27f   :  { %2651 = vmatpush3.msra.mxu0 %v2329_v45 }
 0x280   :  { %2652 = vmatprep.subr.mxu0 %v2344_v46  ;;  %v1512_v46 = vadd.f32 %v1511_v15, %v1412_v8  ;;  %v1396_v8 = vrot.slane %v3171_v7, %v3019_v1  ;;  %v3202_v1 = vrot.slane %v2136_v22, %v3025_v44 }
 0x281   :  { %2653 = vmatpush3.msra.mxu0 %v2328_v48  ;;  %v3159_v48 = vadd.f32 %v1586_v14, %v1510_v33 }
 0x282   :  { %2654 = vmatprep.subr.mxu0 %v2343_v50 }
 0x283   :  { %2655 = vmatpush3.msra.mxu0 %v2327_v53  ;;  %v1428_v53 = vrot.slane %v1388_v40, %v3017_v63  ;;  %v1436_v40 = vrot.slane %v1396_v8, %v3017_v63  ;;  %vm2061_vm10 = vcmp.gt.f32.partialorder %v3159_v48, 0.0 }
 0x284   :  { %2656 = vmatprep.subr.mxu0 %v2342_v54 }
 0x285   :  { %2657 = vmatpush3.msra.mxu0 %v2326_v55  ;;  %v3164_v55 = vadd.f32 %v1588_v19, %v1512_v46  ;;  %v3219_v46 = vrot.slane %v2228_v9, %v3032_v51 }
 0x286   :  { %2658 = vmatprep.subr.mxu0 %v2341_v56 }
 0x287   :  { %2659 = vmatpush3.msra.mxu0 %v2325_v57  ;;  %v1424_v57 = vrot.slane %v1384_v43, %v3017_v63  ;;  %v3216_v43 = vrot.slane %v2140_v31, %v3025_v44  ;;  %vm2062_vm13 = vcmp.gt.f32.partialorder %v3164_v55, 0.0 }
 0x288   :  { %2660 = vmatprep.subr.mxu0 %v2340_v58 }
 0x289   :  { %2661 = vmatpush3.msra.mxu0 %v2324_v59  ;;  %v2085_v59 = vmul.f32 1.442695, %v3159_v48  ;;  %v2717_v5 = vpop.eup %2716 }
 0x28a   :  { %2662 = vmatprep.subr.mxu0 %v2339_v60  ;;  %v2615_v26 = vadd.f32 -1.0, %v2717_v5 }
 0x28b   :  { %2663 = vmatpush3.msra.mxu0 %v2323_v61 }
 0x28c   :  { %2664 = vmatprep.subr.mxu0 %v2338_v62 }
 0x28d   :  { %2665 = vmatpush3.msra.mxu0 %v2322_v0  ;;  %v1664_v0 = vadd.f32 %v1663_v29, %v1416_v35  ;;  %v2224_v29 = vrot.slane %v3129_v17, %v3032_v51  ;;  %v2232_v17 = vrot.slane %v3135_v25, %v3032_v51 }
 0x28e   :  { %2666 = vmatprep.subr.mxu0 %v2337_v3  ;;  %v2087_v3 = vmul.f32 1.442695, %v3164_v55 }
 0x28f   :  { %2667 = vmatpush3.msra.mxu0 %v2321_v4  ;;  %v3210_v33 = vrot.slane %v2224_v29, %v3032_v51 }
 0x2af   :  { %v1811_v37 = vpop.f32.mrf.mxu0 }
 0x2b0   :  { %v1734_v21 = vpop.f32.mrf.mxu1  ;;  %v1812_v4 = vadd.f32 %v1811_v37, %v1424_v57 }
 0x2b1   :  { %v3155_v42 = vadd.f32 %v1734_v21, %v1658_v39  ;;  %v1813_v45 = vpop.f32.mrf.mxu0  ;;  %v1392_v21 = vrot.slane %v3171_v7, %v3017_v63  ;;  %v2144_v39 = vrot.slane %v3135_v25, %v3025_v44 }
 0x2b2   :  { %v1736_v2 = vpop.f32.mrf.mxu1  ;;  %v1814_v61 = vadd.f32 %v1813_v45, %v1428_v53 }
 0x2b3   :  { %v3161_v50 = vadd.f32 %v1736_v2, %v1660_v41  ;;  %v2073_v56 = vmul.f32 1.442695, %v3155_v42  ;;  %v1432_v35 = vrot.slane %v1392_v21, %v3017_v63  ;;  %vm2055_vm11 = vcmp.gt.f32.partialorder %v3155_v42, 0.0 }
 0x2b5   :  { %v1740_v13 = vpop.f32.mrf.mxu1  ;;  %v2075_v60 = vmul.f32 1.442695, %v3161_v50  ;;  %2720 = vpow2.f32 %v2073_v56  ;;  %vm2056_vm12 = vcmp.gt.f32.partialorder %v3161_v50, 0.0 }
 0x2b6   :  { %v1817_v58 = vpop.f32.mrf.mxu0  ;;  %2722 = vpow2.f32 %v2085_v59  ;;  %v3175_v52 = vadd.f32 %v1740_v13, %v1664_v0  ;;  %v3226_v59 = vrot.slane %v2144_v39, %v3025_v44  ;;  %v3233_v0 = vrot.slane %v2232_v17, %v3032_v51 }
 0x2b7   :  { %v1742_v38 = vpop.f32.mrf.mxu1  ;;  %2724 = vpow2.f32 %v2075_v60  ;;  %v1818_v23 = vadd.f32 %v1817_v58, %v1424_v57  ;;  %v2236_v57 = vrot.slane %v3135_v25, %v3029_v49  ;;  %v2240_v39 = vrot.slane %v3149_v27, %v3032_v51 }
 0x2b8   :  { %v1819_v6 = vpop.f32.mrf.mxu0  ;;  %2726 = vpow2.f32 %v2087_v3  ;;  %v3183_v24 = vadd.f32 %v1742_v38, %v1666_v12  ;;  %v2089_v10 = vmul.f32 1.442695, %v3175_v52  ;;  %v2719_v38 = vpop.eup %2718  ;;  %vm2063_vm14 = vcmp.gt.f32.partialorder %v3175_v52, 0.0 }
 0x2b9   :  { %v1820_v19 = vadd.f32 %v1819_v6, %v1428_v53  ;;  %v2616_v53 = vadd.f32 -1.0, %v2719_v38  ;;  %v2117_v6 = vsel %vm2053_vm8, %v3144_v34, %v2615_v26  ;;  %v2152_v38 = vrot.slane %v3149_v27, %v3025_v44 }
 0x2ba   :  { %v2091_v37 = vmul.f32 1.442695, %v3183_v24  ;;  %v2156_v26 = vrot.slane %v3149_v27, %v3027_v47  ;;  %vm2064_vm0 = vcmp.gt.f32.partialorder %v3183_v24, 0.0 }
 0x2bb   :  { %v2118_v21 = vsel %vm2054_vm9, %v3147_v36, %v2616_v53 }
 0x2c2   :  { %v2721_v58 = vpop.eup %2720 }
 0x2c3   :  { %v2617_v22 = vadd.f32 -1.0, %v2721_v58 }
 0x2f3   :  { %v1888_v28 = vpop.f32.mrf.mxu1 }
 0x2f4   :  { %v3177_v14 = vadd.f32 %v1888_v28, %v1812_v4  ;;  %v1965_v15 = vpop.f32.mrf.mxu0 }
 0x2f5   :  { %v1890_v54 = vpop.f32.mrf.mxu1  ;;  %v1966_v45 = vadd.f32 %v1965_v15, %v1432_v35 }
 0x2f6   :  { %v3173_v11 = vadd.f32 %v1890_v54, %v1814_v61  ;;  %v2077_v30 = vmul.f32 1.442695, %v3177_v14  ;;  %v1967_v13 = vpop.f32.mrf.mxu0  ;;  %v2148_v54 = vrot.slane %v3135_v25, %v3027_v47  ;;  %vm2057_vm1 = vcmp.gt.f32.partialorder %v3177_v14, 0.0 }
 0x2f7   :  { %v1894_v62 = vpop.f32.mrf.mxu1  ;;  %v1968_v60 = vadd.f32 %v1967_v13, %v1436_v40 }
 0x2f8   :  { %v2079_v2 = vmul.f32 1.442695, %v3173_v11  ;;  %v3194_v20 = vadd.f32 %v1894_v62, %v1818_v23  ;;  %v1971_v41 = vpop.f32.mrf.mxu0  ;;  %v2723_v62 = vpop.eup %2722  ;;  %v3241_v23 = vrot.slane %v2148_v54, %v3025_v44  ;;  %vm2058_vm15 = vcmp.gt.f32.partialorder %v3173_v11, 0.0 }
 0x2f9   :  { %v1896_v18 = vpop.f32.mrf.mxu1  ;;  %v2725_v25 = vpop.eup %2724  ;;  %v1972_v12 = vadd.f32 %v1971_v41, %v1432_v35  ;;  %v2623_v13 = vadd.f32 -1.0, %v2723_v62 }
 0x2fa   :  { %v3189_v16 = vadd.f32 %v1896_v18, %v1820_v19  ;;  %2728 = vpow2.f32 %v2079_v2  ;;  %v2093_v32 = vmul.f32 1.442695, %v3194_v20  ;;  %v1973_v3 = vpop.f32.mrf.mxu0  ;;  %v2727_v19 = vpop.eup %2726  ;;  %v2618_v36 = vadd.f32 -1.0, %v2725_v25 }
 0x2fb   :  { %2730 = vpow2.f32 %v2089_v10  ;;  %v3244_v10 = vrot.slane %v2236_v57, %v3032_v51  ;;  %v1974_v8 = vadd.f32 %v1973_v3, %v1436_v40  ;;  %v2624_v35 = vadd.f32 -1.0, %v2727_v19 }
 0x2fc   :  { %v2095_v28 = vmul.f32 1.442695, %v3189_v16  ;;  %2732 = vpow2.f32 %v2077_v30  ;;  %v2205_v30 = vmul.f32 %v3202_v1, %v2117_v6  ;;  %v2120_v41 = vsel %vm2056_vm12, %v3161_v50, %v2618_v36 }
 0x2fd   :  { %2734 = vpow2.f32 %v2091_v37  ;;  %v2206_v37 = vmul.f32 %v3216_v43, %v2118_v21  ;;  %v2192_v57 = vrot.slane %v2152_v38, %v3025_v44  ;;  %v2208_v62 = vmul.f32 %v3241_v23, %v2120_v41 }
 0x2fe   :  { %2736 = vpow2.f32 %v2095_v28  ;;  %v2119_v28 = vsel %vm2055_vm11, %v3155_v42, %v2617_v22  ;;  %v3270_v54 = vadd.f32 %v3210_v33, %v2205_v30  ;;  %v3275_v42 = vsel %vm2061_vm10, %v3159_v48, %v2623_v13 }
 0x2ff   :  { %2738 = vpow2.f32 %v2093_v32  ;;  %v2207_v50 = vmul.f32 %v3226_v59, %v2119_v28  ;;  %v3287_v48 = vadd.f32 %v3219_v46, %v2206_v37  ;;  %v2248_v21 = vrot.slane %v3171_v7, %v3032_v51 }
 0x300   :  { %v2164_v22 = vrot.slane %v3171_v7, %v3027_v47  ;;  %v2296_v13 = vadd.f32 %v3244_v10, %v2208_v62  ;;  %vm2065_vm2 = vcmp.gt.f32.partialorder %v3194_v20, 0.0  ;;  %vm2066_vm3 = vcmp.gt.f32.partialorder %v3189_v16, 0.0 }
 0x301   :  { %vm2491_vm10 = vcmask 130048  }
 0x307   :  { %v2729_v40 = vpop.eup %2728 }
 0x308   :  { %v2731_v32 = vpop.eup %2730  ;;  %v2620_v58 = vadd.f32 -1.0, %v2729_v40 }
 0x309   :  { %v2733_v53 = vpop.eup %2732  ;;  %v2625_v3 = vadd.f32 -1.0, %v2731_v32 }
 0x30a   :  { %v2619_v6 = vadd.f32 -1.0, %v2733_v53 }
 0x30c   :  { %v2121_v47 = vsel %vm2057_vm1, %v3177_v14, %v2619_v6 }
 0x30d   :  { %v2209_v14 = vmul.f32 %v2192_v57, %v2121_v47 }
 0x335   :  { %v2042_v56 = vpop.f32.mrf.mxu1 }
 0x336   :  { %v3228_v61 = vadd.f32 %v2042_v56, %v1966_v45  ;;  %v2244_v45 = vrot.slane %v3149_v27, %v3029_v49  ;;  %v2126_v56 = vsel %vm2062_vm13, %v3164_v55, %v2624_v35  ;;  %v2160_v27 = vrot.slane %v3171_v7, %v3025_v44 }
 0x337   :  { %v2044_v4 = vpop.f32.mrf.mxu1  ;;  %v3290_v25 = vmul.f32 %v3216_v43, %v2126_v56  ;;  %v2122_v43 = vsel %vm2058_vm15, %v3173_v11, %v2620_v58  ;;  %v2288_v11 = vrot.slane %v2248_v21, %v3032_v51 }
 0x338   :  { %v2081_v15 = vmul.f32 1.442695, %v3228_v61  ;;  %v3237_v18 = vadd.f32 %v2044_v4, %v1968_v60  ;;  %v2735_v60 = vpop.eup %2734  ;;  %v3284_v4 = vrot.slane %v2240_v39, %v3032_v51  ;;  %v2204_v39 = vrot.slane %v2164_v22, %v3025_v44 }
 0x339   :  { %v2048_v2 = vpop.f32.mrf.mxu1  ;;  %v2737_v55 = vpop.eup %2736  ;;  %vm2059_vm4 = vcmp.gt.f32.partialorder %v3228_v61, 0.0 }
 0x33a   :  { %2740 = vpow2.f32 %v2081_v15  ;;  %v2083_v34 = vmul.f32 1.442695, %v3237_v18  ;;  %v3247_v29 = vadd.f32 %v2048_v2, %v1972_v12  ;;  %v2196_v12 = vrot.slane %v2156_v26, %v3025_v44  ;;  %v2739_v19 = vpop.eup %2738 }
 0x33b   :  { %v2050_v31 = vpop.f32.mrf.mxu1  ;;  %v2284_v15 = vrot.slane %v2244_v45, %v3032_v51  ;;  %v3301_v2 = vadd.f32 %v3233_v0, %v2207_v50  ;;  %v2628_v30 = vadd.f32 -1.0, %v2737_v55  ;;  %v2627_v35 = vadd.f32 -1.0, %v2739_v19 }
 0x33c   :  { %2742 = vpow2.f32 %v2083_v34  ;;  %v2097_v9 = vmul.f32 1.442695, %v3247_v29  ;;  %v3252_v5 = vadd.f32 %v2050_v31, %v1974_v8  ;;  %v2200_v8 = vrot.slane %v2160_v27, %v3025_v44 }
 0x33d   :  { %v2127_v34 = vsel %vm2063_vm14, %v3175_v52, %v2625_v3  ;;  %v2626_v31 = vadd.f32 -1.0, %v2735_v60  ;;  %v2210_v37 = vmul.f32 %v2196_v12, %v2122_v43  ;;  %v2130_v28 = vsel %vm2066_vm3, %v3189_v16, %v2628_v30 }
 0x33e   :  { %2744 = vpow2.f32 %v2097_v9  ;;  %v2099_v17 = vmul.f32 1.442695, %v3252_v5  ;;  %v2252_v9 = vrot.slane %v3171_v7, %v3029_v49  ;;  %v2215_v40 = vmul.f32 %v3226_v59, %v2127_v34 }
 0x33f   :  { %v2129_v32 = vsel %vm2065_vm2, %v3194_v20, %v2627_v35  ;;  %vm2060_vm5 = vcmp.gt.f32.partialorder %v3237_v18, 0.0  ;;  %v2128_v26 = vsel %vm2064_vm0, %v3183_v24, %v2626_v31  ;;  %v2298_v56 = vadd.f32 %v2284_v15, %v2210_v37 }
 0x340   :  { %2746 = vpow2.f32 %v2099_v17  ;;  %v2292_v59 = vrot.slane %v2252_v9, %v3032_v51  ;;  %v2218_v50 = vmul.f32 %v2196_v12, %v2130_v28  ;;  %vm2067_vm6 = vcmp.gt.f32.partialorder %v3247_v29, 0.0 }
 0x341   :  { %v2297_v20 = vadd.f32 %v3284_v4, %v2209_v14  ;;  %v2217_v27 = vmul.f32 %v2192_v57, %v2129_v32  ;;  %v2216_v3 = vmul.f32 %v3241_v23, %v2128_v26  ;;  %vm2068_vm7 = vcmp.gt.f32.partialorder %v3252_v5, 0.0  ;;  %v2485_v26 = vld [vmem:[#allocation11 + $0x8] sm:$0xff] }
 0x342   :  { %v2310_v19 = vmax.f32 %v3287_v48, %v2298_v56  ;;  %v2306_v22 = vadd.f32 %v2284_v15, %v2218_v50  ;;  %v2303_v23 = vadd.f32 %v3233_v0, %v2215_v40  ;;  %2678 = vmatprep.subr.mxu1 %v2485_v26  ;;  %v2484_v56 = vld [vmem:[#allocation11] sm:$0xff] }
 0x343   :  { %v2309_v43 = vmax.f32 %v3270_v54, %v2297_v20  ;;  %2679 = vmatpush3.msra.mxu1 %v2485_v26 }
 0x344   :  { %2680 = vmatprep.subr.mxu1 %v2484_v56 }
 0x345   :  { %2681 = vmatpush3.msra.mxu1 %v2484_v56 }
 0x347   :  { %v2741_v36 = vpop.eup %2740 }
 0x348   :  { %v2621_v38 = vadd.f32 -1.0, %v2741_v36 }
 0x349   :  { %v2743_v52 = vpop.eup %2742 }
 0x34a   :  { %v2123_v49 = vsel %vm2059_vm4, %v3228_v61, %v2621_v38  ;;  %v2622_v7 = vadd.f32 -1.0, %v2743_v52 }
 0x34b   :  { %v2745_v17 = vpop.eup %2744  ;;  %v2211_v41 = vmul.f32 %v2200_v8, %v2123_v49 }
 0x34c   :  { %v2124_v45 = vsel %vm2060_vm5, %v3237_v18, %v2622_v7  ;;  %v2629_v53 = vadd.f32 -1.0, %v2745_v17  ;;  %v2213_v18 = vmul.f32 %v3202_v1, %v3275_v42  ;;  %v2302_v1 = vadd.f32 %v3219_v46, %v3290_v25 }
 0x34d   :  { %v2747_v16 = vpop.eup %2746  ;;  %v2299_v61 = vadd.f32 %v2288_v11, %v2211_v41  ;;  %v2212_v58 = vmul.f32 %v2204_v39, %v2124_v45  ;;  %v2304_v42 = vadd.f32 %v3244_v10, %v2216_v3  ;;  %v2633_v3 = vld [vmem:[#allocation11 + $0x10] ss:$0 sm:$0xff] }
 0x34e   :  { %v2131_v60 = vsel %vm2067_vm6, %v3247_v29, %v2629_v53  ;;  %v2630_v62 = vadd.f32 -1.0, %v2747_v16  ;;  %v2301_v48 = vadd.f32 %v3210_v33, %v2213_v18  ;;  %v2314_v15 = vmax.f32 %v2302_v1, %v2306_v22 }
 0x34f   :  { %v2219_v55 = vmul.f32 %v2200_v8, %v2131_v60  ;;  %v2300_v24 = vadd.f32 %v2292_v59, %v2212_v58  ;;  %v2311_v6 = vmax.f32 %v3301_v2, %v2299_v61  ;;  %v2305_v8 = vadd.f32 %v3284_v4, %v2217_v27  ;;  %v110_v4 = vld [vmem:[#allocation10 + $0x30] sm:$0x7] }
 0x350   :  { %v2132_v12 = vsel %vm2068_vm7, %v3252_v5, %v2630_v62  ;;  %v2356_v46 = vrot.slane %v110_v4, %v3017_v63  ;;  %v2445_v52 = vrot.slane %v110_v4, %v3025_v44  ;;  %v2451_v14 = vrot.slane %v110_v4, %v3032_v51 }
 0x351   :  { %v2220_v21 = vmul.f32 %v2204_v39, %v2132_v12  ;;  %v2312_v57 = vmax.f32 %v2296_v13, %v2300_v24  ;;  %v2307_v29 = vadd.f32 %v2288_v11, %v2219_v55  ;;  %v2317_v5 = vmax.f32 %v2309_v43, %v2311_v6 }
 0x352   :  { %v2313_v54 = vmax.f32 %v2301_v48, %v2305_v8 }
 0x353   :  { %v2318_v34 = vmax.f32 %v2310_v19, %v2312_v57  ;;  %v2308_v2 = vadd.f32 %v2292_v59, %v2220_v21  ;;  %v2315_v30 = vmax.f32 %v2303_v23, %v2307_v29 }
 0x355   :  { %2421 = vmatprep.mubr.f32.mxu0 %v2318_v34  ;;  %v2316_v13 = vmax.f32 %v2304_v42, %v2308_v2  ;;  %v2319_v0 = vmax.f32 %v2313_v54, %v2315_v30 }
 0x356   :  { %2422 = vmatmul.mubr.f32.vlgmr.msra.gmra.mxu0 %v2317_v5 }
 0x357   :  { %v2320_v36 = vmax.f32 %v2314_v15, %v2316_v13 }
 0x359   :  { %2426 = vmatprep.mubr.f32.mxu0 %v2320_v36 }
 0x35a   :  { %2427 = vmatmul.mubr.f32.gmra.mxu0 %v2319_v0 }
 0x416   :  { %v2668_v31 = vpop.f32.mrf.mxu0 }
 0x418   :  { %v2669_v25 = vpop.f32.mrf.mxu0 }
 0x419   :  { %v2670_v10 = vadd.f32 %v2669_v25, %v2668_v31 }
 0x41a   :  { %v2671_v47 = vpop.f32.mrf.mxu0 }
 0x41b   :  { %v2424_v35 = vadd.f32 %v2670_v10, %v2356_v46 }
 0x41c   :  { %v2672_v9 = vpop.f32.mrf.mxu0 }
 0x41d   :  { %v2434_v33 = vmul.f32 1.442695, %v2424_v35  ;;  %v2673_v37 = vadd.f32 %v2672_v9, %v2671_v47  ;;  %vm2432_vm8 = vcmp.gt.f32.partialorder %v2424_v35, 0.0 }
 0x41f   :  { %2748 = vpow2.f32 %v2434_v33  ;;  %v2429_v38 = vadd.f32 %v2673_v37, %v2356_v46 }
 0x421   :  { %v2436_v11 = vmul.f32 1.442695, %v2429_v38  ;;  %vm2433_vm9 = vcmp.gt.f32.partialorder %v2429_v38, 0.0 }
 0x423   :  { %2750 = vpow2.f32 %v2436_v11 }
 0x42c   :  { %v2749_v39 = vpop.eup %2748 }
 0x42d   :  { %v2631_v40 = vadd.f32 -1.0, %v2749_v39 }
 0x42f   :  { %v2440_v28 = vsel %vm2432_vm8, %v2424_v35, %v2631_v40 }
 0x430   :  { %v2751_v63 = vpop.eup %2750  ;;  %v2446_v49 = vmul.f32 %v2445_v52, %v2440_v28 }
 0x431   :  { %v2632_v7 = vadd.f32 -1.0, %v2751_v63 }
 0x432   :  { %v2452_v17 = vadd.f32 %v2451_v14, %v2446_v49 }
 0x433   :  { %v2441_v32 = vsel %vm2433_vm9, %v2429_v38, %v2632_v7 }
 0x434   :  { %2456 = vrot.lane.b32.xlu0 %v2452_v17, %s2919_s18  ;;  %v2447_v41 = vmul.f32 %v2445_v52, %v2441_v32 }
 0x436   :  { %v2453_v59 = vadd.f32 %v2451_v14, %v2447_v41 }
 0x438   :  { %2458 = vrot.lane.b32.xlu0 %v2453_v59, %s2919_s18 }
 0x4a6   :  { %v2457_v44 = vpop.permute.xlu0 %2456 }
 0x4a7   :  { %v2462_v45 = vmax.f32 %v2452_v17, %v2457_v44 }
 0x4a9   :  { %2466 = vrot.lane.b32.xlu1 %v2462_v45, %s2922_s4 }
 0x4aa   :  { %v2459_v51 = vpop.permute.xlu0 %2458 }
 0x4ab   :  { %v2463_v53 = vmax.f32 %v2453_v59, %v2459_v51 }
 0x4ad   :  { %2468 = vrot.lane.b32.xlu1 %v2463_v53, %s2922_s4 }
 0x51b   :  { %v2467_v16 = vpop.permute.xlu1 %2466 }
 0x51c   :  { %v2472_v50 = vmax.f32 %v2462_v45, %v2467_v16 }
 0x51e   :  { %2476 = vrot.lane.b32.xlu0 %v2472_v50, %s2923_s5 }
 0x51f   :  { %v2469_v61 = vpop.permute.xlu1 %2468 }
 0x520   :  { %v2473_v58 = vmax.f32 %v2463_v53, %v2469_v61 }
 0x522   :  { %2478 = vrot.lane.b32.xlu1 %v2473_v58, %s2923_s5 }
 0x590   :  { %v2477_v20 = vpop.permute.xlu0 %2476 }
 0x591   :  { %v2482_v27 = vmax.f32 %v2472_v50, %v2477_v20 }
 0x593   :  { %2682 = vmatprep.mubr.msk.f32.mxu1 %vm2491_vm10, %v2482_v27 }
 0x594   :  { %v2479_v60 = vpop.permute.xlu1 %2478 }
 0x595   :  { %v2483_v62 = vmax.f32 %v2473_v58, %v2479_v60 }
 0x597   :  { %2683 = vmatmul.mubr.msk.f32.vlgmr.msra.gmra.mxu1 %vm2491_vm10, %v2483_v62 }
 0x657   :  { %v2684_v55 = vpop.f32.mrf.mxu1 }
 0x658   :  { %v2570_v24 = vadd.f32 %v2684_v55, %v2633_v3 }
 0x659   :  { %v2564_v18 = vpop.f32.mrf.mxu1 }
 0x65a   :  { %v2574_v6 = vsub.f32 0.0, %v2570_v24  ;;  %v2565_v12 = vadd.f32 %v2633_v3, %v2564_v18 }
 0x65c   :  { %v2577_v19 = vmul.f32 1.442695, %v2574_v6  ;;  %v2573_v21 = vsub.f32 0.0, %v2565_v12 }
 0x65e   :  { %2752 = vpow2.f32 %v2577_v19  ;;  %v2575_v57 = vmul.f32 1.442695, %v2573_v21 }
 0x660   :  { %2754 = vpow2.f32 %v2575_v57 }
 0x66b   :  { %v2753_v22 = vpop.eup %2752 }
 0x66c   :  { %v2580_v29 = vadd.f32 1.0, %v2753_v22 }
 0x66d   :  { %v2755_v43 = vpop.eup %2754 }
 0x66e   :  { %2756 = vrcp.f32 %v2580_v29  ;;  %v2579_v23 = vadd.f32 1.0, %v2755_v43 }
 0x670   :  { %2758 = vrcp.f32 %v2579_v23 }
 0x67b   :  { %v2757_v8 = vpop.eup %2756 }
 0x67c   :  { %2586 = vst [vmem:[#allocation13 + $0x8] sm:$0xff] %v2757_v8 }
 0x67d   :  { %v2759_v34 = vpop.eup %2758 }
 0x67e   :  { %2585 = vst [vmem:[#allocation13] sm:$0xff] %v2759_v34 }
 0x67f   :  { %2891 = shalt.err (!%p2888_p6)
}
 0x680   :  { %2598 = dma.vmem_to_hbm [thread:$0]  %s2593_s30, 256, %s3361_s6, [#allocation4], %s2914_s7, %s2914_s7, %s2915_s8  }
 0x681   :  { %2908 = dma.done.wait [#allocation4], 256  }
 0x682   :  { %2909 = vsyncadd [#allocation4], 4294967040 }
 0x683   :  { %2602 = vsyncpa [#allocation3], 1 }
 0x684   :  { %2603 = vsyncpa [#allocation6], 1 }
 0x685   :  { %2604 = vsyncpa [#allocation9], 1 }
 0x686   :  { %2605 = vsyncpa [#allocation12], 1 }
 0x687   :  { %2606 = vsyncpa [#allocation4], 1 }

</bundles_post_ra>
